<compile_context>
chip_gen: v6e
topology: v6e:2x2x1
jax: 0.10.0
libtpu: 0.0.40
codegen_flags: <defaults>
</compile_context>

<pallas_src>
import jax
import jax.numpy as jnp
from jax import lax
from jax.experimental import pallas as pl
from jax.experimental.pallas import tpu as pltpu

KH = KW = 7
CIN = 3
COUT = 32
POOL = 16                     # fused 4x4 -> 4x4 max pool
H_OUT = W_OUT = 224           # conv output spatial size
P_OUT = H_OUT // POOL         # 14 pooled rows / cols
H_PAD = H_OUT + KH - 1        # 230 input rows (no H padding in ZeroPad2d((2,2)))
K_RAW = KH * KW * CIN         # 147 real conv taps
K_PAD = 160                   # padded contraction size (review: 147 -> 160)
CHUNKS = 4                    # independent matmuls per grid step (feeds 2-4 MXUs)
CHUNK_ROWS = POOL // CHUNKS   # 4 conv rows per chunk
CHUNK_M = CHUNK_ROWS * W_OUT  # 896 streamed LHS rows per chunk


def fused_kernel(p_ref, wt_ref, shift_ref, wd_ref, out_ref):
    """One grid step = (batch n, pooled row j): conv + BN + ReLU + 16x16 max
    pool + Linear partial sum over the 16 conv rows feeding pooled row j."""
    wt = wt_ref[...]                       # (160, 32) bf16, loop-invariant MXU-stationary operand
    pooled = None
    for c in range(CHUNKS):                # 4 independent MXU matmuls (small static unroll)
        lhs = p_ref[0, 0, pl.ds(c * CHUNK_M, CHUNK_M)]             # (896, 160) bf16, streamed
        y = jnp.dot(lhs, wt, preferred_element_type=jnp.float32)   # (896, 32) f32
        y = y.reshape(CHUNK_ROWS, P_OUT * POOL, COUT)              # (4, 224, 32)
        m = y[0]
        for r in range(1, CHUNK_ROWS):                             # row part of the 16x16 pool
            m = jnp.maximum(m, y[r])
        m = jnp.max(m.reshape(P_OUT, POOL, COUT), axis=1)          # (14, 32) column pool
        pooled = m if pooled is None else jnp.maximum(pooled, m)
    # Folded BN shift + ReLU applied once after the max (exact: per-channel
    # constant add and ReLU both commute with max; the BN scale is already
    # inside the matmul weights, i.e. applied before the max).
    act = jnp.maximum(pooled + shift_ref[...], 0.0)                # (14, 32)
    partial = jnp.sum(act * wd_ref[0])                             # Linear partial for pooled row j
    out_ref[...] = jnp.zeros_like(out_ref) + partial


@jax.jit
def model_forward(x_nchw, params):
    (w_conv, b_conv, gamma, beta, run_mean, run_var, w_dense, b_dense) = params
    eps = 1e-5
    N = x_nchw.shape[0]

    # ---- glue: NHWC, ZeroPad2d((2,2)) (width only), patch-major im2col, bf16 ----
    x = jnp.transpose(x_nchw, (0, 2, 3, 1))               # (N, 230, 226, 3)  single transpose
    x = jnp.pad(x, ((0, 0), (0, 0), (2, 2), (0, 0)))      # (N, 230, 230, 3)
    assert x.shape[1] == H_PAD and x.shape[2] == W_OUT + KW - 1
    x = x.astype(jnp.bfloat16)

    # Full-patch im2col with the patch (K) dimension LAST (lanes), order kh*21+kw*3+ci.
    patches = [x[:, kh:kh + H_OUT, kw:kw + W_OUT, :]
               for kh in range(KH) for kw in range(KW)]
    p = jnp.stack(patches, axis=3)                        # (N, 224, 224, 49, 3)
    p = p.reshape(N, H_OUT, W_OUT, K_RAW)                 # (N, 224, 224, 147)
    p = jnp.pad(p, ((0, 0), (0, 0), (0, 0), (0, K_PAD - K_RAW)))
    p = p.reshape(N, P_OUT, POOL * W_OUT, K_PAD)          # (N, 14, 3584, 160) bf16

    # Conv weights (co, ci, kh, kw) -> (kh*21 + kw*3 + ci, co), BN scale folded
    # in f32 BEFORE the bf16 cast (exact; sign of scale irrelevant since the
    # scale stays inside the matmul, i.e. before the max pool).
    scale = gamma / jnp.sqrt(run_var + eps)               # (32,) f32
    wt = jnp.transpose(w_conv, (2, 3, 1, 0)).reshape(K_RAW, COUT)
    wt = (wt * scale[None, :]).astype(jnp.bfloat16)
    wt = jnp.pad(wt, ((0, K_PAD - K_RAW), (0, 0)))        # (160, 32) bf16

    # Folded conv-bias + BatchNorm shift (eval mode, running stats).
    shift = (beta + (b_conv - run_mean) * scale).astype(jnp.float32).reshape(1, COUT)

    # torch Flatten of NCHW -> index co*196 + ph*14 + pw ; rearrange to (ph, pw, co).
    wd = jnp.transpose(w_dense.reshape(COUT, P_OUT, P_OUT), (1, 2, 0)).astype(jnp.float32)

    out = pl.pallas_call(
        fused_kernel,
        out_shape=jax.ShapeDtypeStruct((N, P_OUT, 1, 1), jnp.float32),
        grid_spec=pltpu.PrefetchScalarGridSpec(
            num_scalar_prefetch=0,
            grid=(N, P_OUT),
            in_specs=[
                pl.BlockSpec((1, 1, POOL * W_OUT, K_PAD), lambda n, j: (n, j, 0, 0)),
                pl.BlockSpec((K_PAD, COUT), lambda n, j: (0, 0)),
                pl.BlockSpec((1, COUT), lambda n, j: (0, 0)),
                pl.BlockSpec((1, P_OUT, COUT), lambda n, j: (j, 0, 0)),
            ],
            out_specs=pl.BlockSpec((1, 1, 1, 1), lambda n, j: (n, j, 0, 0)),
        ),
        compiler_params=pltpu.CompilerParams(
            dimension_semantics=("parallel", "parallel"),
            vmem_limit_bytes=32 * 1024 * 1024,
        ),
    )(p, wt, shift, wd)

    # Sum the 14 per-pooled-row Linear partials and add the dense bias.
    return out.reshape(N, P_OUT).sum(axis=1, keepdims=True) + b_dense.reshape(1, 1)


def reference(x_nchw, params):
    """Pure-JAX reference mirroring the PyTorch forward pass."""
    (w_conv, b_conv, gamma, beta, run_mean, run_var, w_dense, b_dense) = params
    eps = 1e-5
    x = jnp.pad(x_nchw, ((0, 0), (0, 0), (0, 0), (2, 2)))    # ZeroPad2d((2,2))
    y = lax.conv_general_dilated(x, w_conv, (1, 1), 'VALID',
                                 dimension_numbers=('NCHW', 'OIHW', 'NCHW'))
    y = y + b_conv[None, :, None, None]
    y = ((y - run_mean[None, :, None, None]) /
         jnp.sqrt(run_var[None, :, None, None] + eps) *
         gamma[None, :, None, None] + beta[None, :, None, None])
    y = jnp.maximum(y, 0.0)
    for _ in range(2):  # two MaxPool2d(4,4)
        n, c, h, w = y.shape
        y = y.reshape(n, c, h // 4, 4, w // 4, 4).max(axis=(3, 5))
    flat = y.reshape(y.shape[0], -1)
    return flat @ w_dense.T + b_dense[None, :]


if __name__ == "__main__":
    key = jax.random.PRNGKey(0)
    ks = jax.random.split(key, 9)

    # Input spatial size is fixed by Linear(6272, 1): 32 * 14 * 14 after pooling
    # -> conv output must be 224x224 -> input (H, W) = (230, 226) with torch's
    #    ZeroPad2d((2,2)) padding only the width.
    N, H, W = 2, 230, 226
    x = jax.random.normal(ks[0], (N, CIN, H, W), jnp.float32)

    w_conv = 0.05 * jax.random.normal(ks[1], (COUT, CIN, KH, KW), jnp.float32)
    b_conv = 0.05 * jax.random.normal(ks[2], (COUT,), jnp.float32)
    gamma = 1.0 + 0.1 * jax.random.normal(ks[3], (COUT,), jnp.float32)
    beta = 0.1 * jax.random.normal(ks[4], (COUT,), jnp.float32)
    run_mean = 0.1 * jax.random.normal(ks[5], (COUT,), jnp.float32)
    run_var = jax.random.uniform(ks[6], (COUT,), jnp.float32, 0.5, 1.5)
    w_dense = 0.02 * jax.random.normal(ks[7], (1, 6272), jnp.float32)
    b_dense = 0.02 * jax.random.normal(ks[8], (1,), jnp.float32)
    params = (w_conv, b_conv, gamma, beta, run_mean, run_var, w_dense, b_dense)

    out = jax.block_until_ready(model_forward(x, params))
    ref = jax.block_until_ready(reference(x, params))

    assert out.shape == (N, 1), out.shape
    if not bool(jnp.allclose(out, ref, rtol=5e-2, atol=5e-2)):
        raise SystemExit(f"MISMATCH: pallas={out.ravel()} ref={ref.ravel()}")
    print("KERNEL_OK")
</pallas_src>

<mosaic_0001>
module attributes {stable_mosaic.version = 11 : i64} {
  func.func @fused_kernel(%arg0: i32, %arg1: i32, %arg2: memref<1x1x3584x160xbf16, #tpu.memory_space<vmem>>, %arg3: memref<160x32xbf16, #tpu.memory_space<vmem>>, %arg4: memref<1x32xf32, #tpu.memory_space<vmem>>, %arg5: memref<1x14x32xf32, #tpu.memory_space<vmem>>, %arg6: memref<1x1x1x1xf32, #tpu.memory_space<vmem>>) attributes {dimension_semantics = [#tpu.dimension_semantics<parallel>, #tpu.dimension_semantics<parallel>], iteration_bounds = array<i64: 2, 14>, scalar_prefetch = 0 : i64, scratch_operands = 0 : i64, tpu.core_type = #tpu.core_type<tc>, window_params = [{transform_indices = @transform_0, window_bounds = array<i64: 1, 1, 3584, 160>}, {pipeline_mode = #tpu.pipeline_mode<synchronous>, transform_indices = @transform_1, window_bounds = array<i64: 160, 32>}, {pipeline_mode = #tpu.pipeline_mode<synchronous>, transform_indices = @transform_2, window_bounds = array<i64: 1, 32>}, {transform_indices = @transform_3, window_bounds = array<i64: 1, 14, 32>}, {transform_indices = @transform_4, window_bounds = array<i64: 1, 1, 1, 1>}]} {
    %c0 = arith.constant 0 : index
    %c0_0 = arith.constant 0 : index
    %0 = vector.load %arg3[%c0, %c0_0] : memref<160x32xbf16, #tpu.memory_space<vmem>>, vector<160x32xbf16>
    %c0_1 = arith.constant 0 : index
    %c0_2 = arith.constant 0 : index
    %c0_3 = arith.constant 0 : index
    %c0_4 = arith.constant 0 : index
    %1 = vector.load %arg2[%c0_1, %c0_2, %c0_3, %c0_4] : memref<1x1x3584x160xbf16, #tpu.memory_space<vmem>>, vector<1x1x896x160xbf16>
    %2 = vector.shape_cast %1 : vector<1x1x896x160xbf16> to vector<896x160xbf16>
    %cst = arith.constant dense<0.000000e+00> : vector<896x32xf32>
    %3 = tpu.matmul %2, %0, %cst {dimension_numbers = #tpu.dot_dimension_numbers<[1], [0], [0], [1], [0, 0, 1, 1], [], []>} : vector<896x160xbf16>, vector<160x32xbf16>, vector<896x32xf32> -> vector<896x32xf32>
    %4 = vector.shape_cast %3 : vector<896x32xf32> to vector<4x224x32xf32>
    %5 = vector.extract_strided_slice %4 {offsets = [0, 0, 0], sizes = [1, 224, 32], strides = [1, 1, 1]} : vector<4x224x32xf32> to vector<1x224x32xf32>
    %6 = vector.shape_cast %5 : vector<1x224x32xf32> to vector<224x32xf32>
    %7 = vector.extract_strided_slice %4 {offsets = [1, 0, 0], sizes = [1, 224, 32], strides = [1, 1, 1]} : vector<4x224x32xf32> to vector<1x224x32xf32>
    %8 = vector.shape_cast %7 : vector<1x224x32xf32> to vector<224x32xf32>
    %9 = arith.maximumf %6, %8 : vector<224x32xf32>
    %10 = vector.extract_strided_slice %4 {offsets = [2, 0, 0], sizes = [1, 224, 32], strides = [1, 1, 1]} : vector<4x224x32xf32> to vector<1x224x32xf32>
    %11 = vector.shape_cast %10 : vector<1x224x32xf32> to vector<224x32xf32>
    %12 = arith.maximumf %9, %11 : vector<224x32xf32>
    %13 = vector.extract_strided_slice %4 {offsets = [3, 0, 0], sizes = [1, 224, 32], strides = [1, 1, 1]} : vector<4x224x32xf32> to vector<1x224x32xf32>
    %14 = vector.shape_cast %13 : vector<1x224x32xf32> to vector<224x32xf32>
    %15 = arith.maximumf %12, %14 : vector<224x32xf32>
    %16 = vector.shape_cast %15 : vector<224x32xf32> to vector<14x16x32xf32>
    %cst_5 = arith.constant dense<0xFF800000> : vector<14x32xf32>
    %17 = vector.multi_reduction <maximumf>, %16, %cst_5 [1] : vector<14x16x32xf32> to vector<14x32xf32>
    %c0_6 = arith.constant 0 : index
    %c0_7 = arith.constant 0 : index
    %c896 = arith.constant 896 : index
    %c0_8 = arith.constant 0 : index
    %18 = vector.load %arg2[%c0_6, %c0_7, %c896, %c0_8] : memref<1x1x3584x160xbf16, #tpu.memory_space<vmem>>, vector<1x1x896x160xbf16>
    %19 = vector.shape_cast %18 : vector<1x1x896x160xbf16> to vector<896x160xbf16>
    %cst_9 = arith.constant dense<0.000000e+00> : vector<896x32xf32>
    %20 = tpu.matmul %19, %0, %cst_9 {dimension_numbers = #tpu.dot_dimension_numbers<[1], [0], [0], [1], [0, 0, 1, 1], [], []>} : vector<896x160xbf16>, vector<160x32xbf16>, vector<896x32xf32> -> vector<896x32xf32>
    %21 = vector.shape_cast %20 : vector<896x32xf32> to vector<4x224x32xf32>
    %22 = vector.extract_strided_slice %21 {offsets = [0, 0, 0], sizes = [1, 224, 32], strides = [1, 1, 1]} : vector<4x224x32xf32> to vector<1x224x32xf32>
    %23 = vector.shape_cast %22 : vector<1x224x32xf32> to vector<224x32xf32>
    %24 = vector.extract_strided_slice %21 {offsets = [1, 0, 0], sizes = [1, 224, 32], strides = [1, 1, 1]} : vector<4x224x32xf32> to vector<1x224x32xf32>
    %25 = vector.shape_cast %24 : vector<1x224x32xf32> to vector<224x32xf32>
    %26 = arith.maximumf %23, %25 : vector<224x32xf32>
    %27 = vector.extract_strided_slice %21 {offsets = [2, 0, 0], sizes = [1, 224, 32], strides = [1, 1, 1]} : vector<4x224x32xf32> to vector<1x224x32xf32>
    %28 = vector.shape_cast %27 : vector<1x224x32xf32> to vector<224x32xf32>
    %29 = arith.maximumf %26, %28 : vector<224x32xf32>
    %30 = vector.extract_strided_slice %21 {offsets = [3, 0, 0], sizes = [1, 224, 32], strides = [1, 1, 1]} : vector<4x224x32xf32> to vector<1x224x32xf32>
    %31 = vector.shape_cast %30 : vector<1x224x32xf32> to vector<224x32xf32>
    %32 = arith.maximumf %29, %31 : vector<224x32xf32>
    %33 = vector.shape_cast %32 : vector<224x32xf32> to vector<14x16x32xf32>
    %cst_10 = arith.constant dense<0xFF800000> : vector<14x32xf32>
    %34 = vector.multi_reduction <maximumf>, %33, %cst_10 [1] : vector<14x16x32xf32> to vector<14x32xf32>
    %35 = arith.maximumf %17, %34 : vector<14x32xf32>
    %c0_11 = arith.constant 0 : index
    %c0_12 = arith.constant 0 : index
    %c1792 = arith.constant 1792 : index
    %c0_13 = arith.constant 0 : index
    %36 = vector.load %arg2[%c0_11, %c0_12, %c1792, %c0_13] : memref<1x1x3584x160xbf16, #tpu.memory_space<vmem>>, vector<1x1x896x160xbf16>
    %37 = vector.shape_cast %36 : vector<1x1x896x160xbf16> to vector<896x160xbf16>
    %cst_14 = arith.constant dense<0.000000e+00> : vector<896x32xf32>
    %38 = tpu.matmul %37, %0, %cst_14 {dimension_numbers = #tpu.dot_dimension_numbers<[1], [0], [0], [1], [0, 0, 1, 1], [], []>} : vector<896x160xbf16>, vector<160x32xbf16>, vector<896x32xf32> -> vector<896x32xf32>
    %39 = vector.shape_cast %38 : vector<896x32xf32> to vector<4x224x32xf32>
    %40 = vector.extract_strided_slice %39 {offsets = [0, 0, 0], sizes = [1, 224, 32], strides = [1, 1, 1]} : vector<4x224x32xf32> to vector<1x224x32xf32>
    %41 = vector.shape_cast %40 : vector<1x224x32xf32> to vector<224x32xf32>
    %42 = vector.extract_strided_slice %39 {offsets = [1, 0, 0], sizes = [1, 224, 32], strides = [1, 1, 1]} : vector<4x224x32xf32> to vector<1x224x32xf32>
    %43 = vector.shape_cast %42 : vector<1x224x32xf32> to vector<224x32xf32>
    %44 = arith.maximumf %41, %43 : vector<224x32xf32>
    %45 = vector.extract_strided_slice %39 {offsets = [2, 0, 0], sizes = [1, 224, 32], strides = [1, 1, 1]} : vector<4x224x32xf32> to vector<1x224x32xf32>
    %46 = vector.shape_cast %45 : vector<1x224x32xf32> to vector<224x32xf32>
    %47 = arith.maximumf %44, %46 : vector<224x32xf32>
    %48 = vector.extract_strided_slice %39 {offsets = [3, 0, 0], sizes = [1, 224, 32], strides = [1, 1, 1]} : vector<4x224x32xf32> to vector<1x224x32xf32>
    %49 = vector.shape_cast %48 : vector<1x224x32xf32> to vector<224x32xf32>
    %50 = arith.maximumf %47, %49 : vector<224x32xf32>
    %51 = vector.shape_cast %50 : vector<224x32xf32> to vector<14x16x32xf32>
    %cst_15 = arith.constant dense<0xFF800000> : vector<14x32xf32>
    %52 = vector.multi_reduction <maximumf>, %51, %cst_15 [1] : vector<14x16x32xf32> to vector<14x32xf32>
    %53 = arith.maximumf %35, %52 : vector<14x32xf32>
    %c0_16 = arith.constant 0 : index
    %c0_17 = arith.constant 0 : index
    %c2688 = arith.constant 2688 : index
    %c0_18 = arith.constant 0 : index
    %54 = vector.load %arg2[%c0_16, %c0_17, %c2688, %c0_18] : memref<1x1x3584x160xbf16, #tpu.memory_space<vmem>>, vector<1x1x896x160xbf16>
    %55 = vector.shape_cast %54 : vector<1x1x896x160xbf16> to vector<896x160xbf16>
    %cst_19 = arith.constant dense<0.000000e+00> : vector<896x32xf32>
    %56 = tpu.matmul %55, %0, %cst_19 {dimension_numbers = #tpu.dot_dimension_numbers<[1], [0], [0], [1], [0, 0, 1, 1], [], []>} : vector<896x160xbf16>, vector<160x32xbf16>, vector<896x32xf32> -> vector<896x32xf32>
    %57 = vector.shape_cast %56 : vector<896x32xf32> to vector<4x224x32xf32>
    %58 = vector.extract_strided_slice %57 {offsets = [0, 0, 0], sizes = [1, 224, 32], strides = [1, 1, 1]} : vector<4x224x32xf32> to vector<1x224x32xf32>
    %59 = vector.shape_cast %58 : vector<1x224x32xf32> to vector<224x32xf32>
    %60 = vector.extract_strided_slice %57 {offsets = [1, 0, 0], sizes = [1, 224, 32], strides = [1, 1, 1]} : vector<4x224x32xf32> to vector<1x224x32xf32>
    %61 = vector.shape_cast %60 : vector<1x224x32xf32> to vector<224x32xf32>
    %62 = arith.maximumf %59, %61 : vector<224x32xf32>
    %63 = vector.extract_strided_slice %57 {offsets = [2, 0, 0], sizes = [1, 224, 32], strides = [1, 1, 1]} : vector<4x224x32xf32> to vector<1x224x32xf32>
    %64 = vector.shape_cast %63 : vector<1x224x32xf32> to vector<224x32xf32>
    %65 = arith.maximumf %62, %64 : vector<224x32xf32>
    %66 = vector.extract_strided_slice %57 {offsets = [3, 0, 0], sizes = [1, 224, 32], strides = [1, 1, 1]} : vector<4x224x32xf32> to vector<1x224x32xf32>
    %67 = vector.shape_cast %66 : vector<1x224x32xf32> to vector<224x32xf32>
    %68 = arith.maximumf %65, %67 : vector<224x32xf32>
    %69 = vector.shape_cast %68 : vector<224x32xf32> to vector<14x16x32xf32>
    %cst_20 = arith.constant dense<0xFF800000> : vector<14x32xf32>
    %70 = vector.multi_reduction <maximumf>, %69, %cst_20 [1] : vector<14x16x32xf32> to vector<14x32xf32>
    %71 = arith.maximumf %53, %70 : vector<14x32xf32>
    %c0_21 = arith.constant 0 : index
    %c0_22 = arith.constant 0 : index
    %72 = vector.load %arg4[%c0_21, %c0_22] : memref<1x32xf32, #tpu.memory_space<vmem>>, vector<1x32xf32>
    %73 = vector.broadcast %72 : vector<1x32xf32> to vector<14x32xf32>
    %74 = arith.addf %71, %73 : vector<14x32xf32>
    %cst_23 = arith.constant 0.000000e+00 : f32
    %75 = vector.broadcast %cst_23 : f32 to vector<14x32xf32>
    %76 = arith.maximumf %74, %75 : vector<14x32xf32>
    %c0_24 = arith.constant 0 : index
    %c0_25 = arith.constant 0 : index
    %c0_26 = arith.constant 0 : index
    %77 = vector.load %arg5[%c0_24, %c0_25, %c0_26] : memref<1x14x32xf32, #tpu.memory_space<vmem>>, vector<1x14x32xf32>
    %78 = vector.shape_cast %77 : vector<1x14x32xf32> to vector<14x32xf32>
    %79 = arith.mulf %76, %78 : vector<14x32xf32>
    %80 = vector.shape_cast %79 : vector<14x32xf32> to vector<1x14x32xf32>
    %cst_27 = arith.constant dense<0.000000e+00> : vector<1xf32>
    %81 = vector.multi_reduction <add>, %80, %cst_27 [1, 2] : vector<1x14x32xf32> to vector<1xf32>
    %82 = vector.shape_cast %81 : vector<1xf32> to vector<1x1x1xf32>
    %83 = vector.extract %82[0, 0, 0] : f32 from vector<1x1x1xf32>
    %cst_28 = arith.constant 0.000000e+00 : f32
    %84 = vector.broadcast %cst_28 : f32 to vector<1x1x1x1xf32>
    %85 = vector.broadcast %83 : f32 to vector<1x1x1x1xf32>
    %86 = arith.addf %84, %85 : vector<1x1x1x1xf32>
    %c0_29 = arith.constant 0 : index
    %c0_30 = arith.constant 0 : index
    %c0_31 = arith.constant 0 : index
    %c0_32 = arith.constant 0 : index
    %87 = vector.load %arg6[%c0_29, %c0_30, %c0_31, %c0_32] : memref<1x1x1x1xf32, #tpu.memory_space<vmem>>, vector<1x1x1x1xf32>
    tpu.vector_store %arg6[%c0_29, %c0_30, %c0_31, %c0_32], %86 {strides = array<i32>} : memref<1x1x1x1xf32, #tpu.memory_space<vmem>>, vector<1x1x1x1xf32>,
    return
  }
  func.func @transform_0(%arg0: i32, %arg1: i32) -> (i32, i32, i32, i32) {
    %c0_i32 = arith.constant 0 : i32
    %c0_i32_0 = arith.constant 0 : i32
    %c0_i32_1 = arith.constant 0 : i32
    return %arg0, %arg1, %c0_i32, %c0_i32_0 : i32, i32, i32, i32
  }
  func.func @transform_1(%arg0: i32, %arg1: i32) -> (i32, i32) {
    %c0_i32 = arith.constant 0 : i32
    %c0_i32_0 = arith.constant 0 : i32
    %c0_i32_1 = arith.constant 0 : i32
    return %c0_i32, %c0_i32_0 : i32, i32
  }
  func.func @transform_2(%arg0: i32, %arg1: i32) -> (i32, i32) {
    %c0_i32 = arith.constant 0 : i32
    %c0_i32_0 = arith.constant 0 : i32
    %c0_i32_1 = arith.constant 0 : i32
    return %c0_i32, %c0_i32_0 : i32, i32
  }
  func.func @transform_3(%arg0: i32, %arg1: i32) -> (i32, i32, i32) {
    %c0_i32 = arith.constant 0 : i32
    %c0_i32_0 = arith.constant 0 : i32
    %c0_i32_1 = arith.constant 0 : i32
    return %arg1, %c0_i32, %c0_i32_0 : i32, i32, i32
  }
  func.func @transform_4(%arg0: i32, %arg1: i32) -> (i32, i32, i32, i32) {
    %c0_i32 = arith.constant 0 : i32
    %c0_i32_0 = arith.constant 0 : i32
    %c0_i32_1 = arith.constant 0 : i32
    return %arg0, %arg1, %c0_i32, %c0_i32_0 : i32, i32, i32, i32
  }
}

</mosaic_0001>

<bundles_post_ra>
// kernel: model_forward.1
= control target key start
LH: loop header
LB: loop body
LE: loop exit
PB: predicated region body
PF: predicated region fallthrough
CT: control target
= control target key end

     0   :  { %s8000_s15 = smov 0   ;;  %s8002_s16 = smov 0   ;;  %s10170_s0 = inlined_call_operand.vmem [shape: bf16[2,14,3584,160], index: 0, kind: input, shape index: {}]   ;;  %s10171_s1 = inlined_call_operand.vmem [shape: bf16[160,32], index: 1, kind: input, shape index: {}]   ;;  %s10172_s2 = inlined_call_operand.vmem [shape: f32[1,32], index: 2, kind: input, shape index: {}]   ;;  %s10173_s3 = inlined_call_operand.vmem [shape: f32[14,14,32], index: 3, kind: input, shape index: {}]   ;;  %s10174_s4 = inlined_call_operand.vmem [shape: f32[2,14,1,1], index: 4, kind: output, shape index: {}]  }
   0x1   :  { %s8004_s17 = smov 0   ;;  %s8006_s18 = smov 0  }
   0x2   :  { %s8008_s19 = smov 0  }
   0x3 LB: > { %s23_s20 = sadd.s32 1, %s7964_s17  ;;  %s26_s21 = sadd.s32 1, %s7968_s18  ;;  %s7972_s19 = sphi %s8008_s19, %s14_s19   ;;  %s7968_s18 = sphi %s8006_s18, %s10554_s18   ;;  %s7964_s17 = sphi %s8004_s17, %s10553_s17   ;;  %s7960_s16 = sphi %s8002_s16, %s10552_s16   ;;  %s7956_s15 = sphi %s8000_s15, %s10551_s15  }
   0x4   : > { %p24_p0 = scmp.ge.s32.totalorder %s23_s20, 14  ;;  %p6516_p1 = scmp.ge.s32.totalorder %s7972_s19, 1 }
   0x5   : > { %p192_p2 = scmp.lt.s32.totalorder %s7972_s19, 29 }
   0x6   : > { %s10556_s20 = smov (%p24_p0, %s23_s20), 0  ;;  %s10558_s21 = smov (!%p24_p0, %s26_s21), %s7968_s18 }
   0x7   : > { %p193_p3 = pnand %p6516_p1, %p192_p2  ;;  %p28_p4 = scmp.ge.s32.totalorder %s10558_s21, 2 }
   0x9   : > { %s10560_s21 = smov (%p28_p4, %s10558_s21), 0  ;;  %196 = sbr.rel (%p193_p3) target bundleno = 1375 (0x55f), region = 36 }
   0xe   : > { %v8033_v0 = vld [vmem:[%s10171_s1 + $0x38] sm:$0xff]   ;;  %v7974_v1 = vmov 0   ;;  %p229_p5 = scmp.lt.s32.totalorder %s7960_s16, 1  ;;  %v8042_v2 = vld [vmem:[%s10171_s1 + $0x30] sm:$0xff]   ;;  %p231_p6 = scmp.lt.s32.totalorder %s7956_s15, 13  ;;  %v8056_v3 = vld [vmem:[%s10171_s1 + $0x28] sm:$0xff]  }
   0xf   : > { %1116 = vmatprep.subr.bf16.mxu0 %v7974_v1  ;;  %2591 = vmatprep.subr.bf16.mxu1 %v7974_v1  ;;  %v8066_v4 = vld [vmem:[%s10171_s1 + $0x20] sm:$0xff]   ;;  %vm947_vm0 = vcmask 261120   ;;  %v8082_v7 = vld [vmem:[%s10171_s1 + $0x18] sm:$0xff]   ;;  %v8093_v8 = vld [vmem:[%s10171_s1 + $0x10] sm:$0xff]   ;;  %vm6368_vm1 = vcmask 1041409   ;;  %vm6371_vm2 = vcmask 1042434  }
  0x10   : > { %1117 = vmatpush1.bf16.msra.mxu0 %v8033_v0  ;;  %2592 = vmatpush1.bf16.msra.mxu1 %v8033_v0  ;;  %s10562_s16 = smov (!%p229_p5, %s7960_s16), 1  ;;  %s10564_s15 = smov (!%p231_p6, %s7956_s15), 13  ;;  %v8102_v9 = vld [vmem:[%s10171_s1 + $0x8] sm:$0xff]   ;;  %v8111_v10 = vld [vmem:[%s10171_s1] sm:$0xff]   ;;  %vm6374_vm3 = vcmask 1043459   ;;  %vm6377_vm4 = vcmask 1044484  }
  0x11   : > { %1118 = vmatprep.subr.bf16.mxu0 %v7974_v1  ;;  %2593 = vmatprep.subr.bf16.mxu1 %v7974_v1  ;;  %s7207_s26 = smul.u32 12544, %s10562_s16  ;;  %v8120_v11 = vld [vmem:[%s10171_s1 + $0x48] sm:$0xff]   ;;  %v8129_v12 = vld [vmem:[%s10171_s1 + $0x40] sm:$0xff]   ;;  %vm6380_vm5 = vcmask 1045509   ;;  %vm6383_vm6 = vcmask 1046534   ;;  %vm6386_vm7 = vcmask 1047559  }
  0x12   : > { %s7206_s29 = smul.u32 896, %s10564_s15  ;;  %vm6401_vm8 = vcmask 259072   ;;  %vm6415_vm9 = vcmask 0  }
  0x14   : > { %1119 = vmatpush1.bf16.msra.mxu0 %v8042_v2  ;;  %2594 = vmatpush1.bf16.msra.mxu1 %v8042_v2  ;;  %s235_s30 = sadd.s32 %s7207_s26, %s7206_s29 }
  0x15   : > { %1120 = vmatprep.subr.bf16.mxu0 %v7974_v1  ;;  %2595 = vmatprep.subr.bf16.mxu1 %v7974_v1  ;;  %s6517_s5 = sshll.u32 %s235_s30, 2  ;;  %s7205_s30 = sshll.u32 %s10564_s15, 4 }
  0x16   : > { %s8071_s10 = scalar_lea.vmem %s10170_s0, %s6517_s5  ;;  %s9973_s9 = scalar_lea.vmem %s10173_s3, %s7205_s30 }
  0x17   : > { %v7264_v5 = vld [vmem:[%s8071_s10 + $0x4] ss:$8 sps:$4 sm:$0xff]   ;;  %v7262_v13 = vld [vmem:[%s8071_s10] ss:$8 sps:$4 sm:$0xff]   ;;  %v7268_v15 = vld [vmem:[%s8071_s10 + $0x14] ss:$8 sps:$4 sm:$0xff]  }
  0x18   : > { %1121 = vmatpush1.bf16.msra.mxu0 %v8056_v3  ;;  %2596 = vmatpush1.bf16.msra.mxu1 %v8056_v3  ;;  %v7267_v6 = vld [vmem:[%s8071_s10 + $0x384] ss:$8 sps:$4 sm:$0xff]   ;;  %v7265_v14 = vld [vmem:[%s8071_s10 + $0x380] ss:$8 sps:$4 sm:$0xff]   ;;  %v7270_v16 = vld [vmem:[%s8071_s10 + $0x394] ss:$8 sps:$4 sm:$0xff]  }
  0x19   : > { %1122 = vmatprep.subr.bf16.mxu0 %v7974_v1  ;;  %2597 = vmatprep.subr.bf16.mxu1 %v7974_v1  ;;  %v7272_v17 = vld [vmem:[%s8071_s10 + $0x10] ss:$8 sps:$4 sm:$0xff]   ;;  %v7274_v19 = vld [vmem:[%s8071_s10 + $0x24] ss:$8 sps:$4 sm:$0xff]   ;;  %v7278_v21 = vld [vmem:[%s8071_s10 + $0x20] ss:$8 sps:$4 sm:$0xff]  }
  0x1a   : > { %6642 = vmatprep.mubr.msk.bf16.mxu0 %vm947_vm0, %v7264_v5  ;;  %6810 = vmatprep.mubr.msk.bf16.mxu1 %vm947_vm0, %v7267_v6  ;;  %v7273_v18 = vld [vmem:[%s8071_s10 + $0x390] ss:$8 sps:$4 sm:$0xff]   ;;  %v7276_v20 = vld [vmem:[%s8071_s10 + $0x3a4] ss:$8 sps:$4 sm:$0xff]   ;;  %v7279_v22 = vld [vmem:[%s8071_s10 + $0x3a0] ss:$8 sps:$4 sm:$0xff]  }
  0x1b   : > { %v7280_v23 = vld [vmem:[%s8071_s10 + $0x34] ss:$8 sps:$4 sm:$0xff]   ;;  %v7284_v25 = vld [vmem:[%s8071_s10 + $0x30] ss:$8 sps:$4 sm:$0xff]   ;;  %v7286_v27 = vld [vmem:[%s8071_s10 + $0x44] ss:$8 sps:$4 sm:$0xff]  }
  0x1c   : > { %1123 = vmatpush1.bf16.msra.mxu0 %v8066_v4  ;;  %2598 = vmatpush1.bf16.msra.mxu1 %v8066_v4  ;;  %v7282_v24 = vld [vmem:[%s8071_s10 + $0x3b4] ss:$8 sps:$4 sm:$0xff]   ;;  %v7285_v26 = vld [vmem:[%s8071_s10 + $0x3b0] ss:$8 sps:$4 sm:$0xff]   ;;  %v7288_v28 = vld [vmem:[%s8071_s10 + $0x3c4] ss:$8 sps:$4 sm:$0xff]  }
  0x1d   : > { %1124 = vmatprep.subr.bf16.mxu0 %v7974_v1  ;;  %2599 = vmatprep.subr.bf16.mxu1 %v7974_v1  ;;  %v7290_v29 = vld [vmem:[%s8071_s10 + $0x40] ss:$8 sps:$4 sm:$0xff]   ;;  %v7292_v31 = vld [vmem:[%s8071_s10 + $0x54] ss:$8 sps:$4 sm:$0xff]   ;;  %v7296_v33 = vld [vmem:[%s8071_s10 + $0x50] ss:$8 sps:$4 sm:$0xff]  }
  0x1e   : > { %v7291_v30 = vld [vmem:[%s8071_s10 + $0x3c0] ss:$8 sps:$4 sm:$0xff]   ;;  %v7294_v32 = vld [vmem:[%s8071_s10 + $0x3d4] ss:$8 sps:$4 sm:$0xff]   ;;  %v7297_v34 = vld [vmem:[%s8071_s10 + $0x3d0] ss:$8 sps:$4 sm:$0xff]  }
  0x1f   : > { %v7298_v35 = vld [vmem:[%s8071_s10 + $0x64] ss:$8 sps:$4 sm:$0xff]   ;;  %v7302_v37 = vld [vmem:[%s8071_s10 + $0x60] ss:$8 sps:$4 sm:$0xff]   ;;  %v7304_v39 = vld [vmem:[%s8071_s10 + $0x74] ss:$8 sps:$4 sm:$0xff]  }
  0x20   : > { %1125 = vmatpush1.bf16.msra.mxu0 %v8082_v7  ;;  %2600 = vmatpush1.bf16.msra.mxu1 %v8082_v7  ;;  %v7300_v36 = vld [vmem:[%s8071_s10 + $0x3e4] ss:$8 sps:$4 sm:$0xff]   ;;  %v7303_v38 = vld [vmem:[%s8071_s10 + $0x3e0] ss:$8 sps:$4 sm:$0xff]   ;;  %v7306_v40 = vld [vmem:[%s8071_s10 + $0x3f4] ss:$8 sps:$4 sm:$0xff]  }
  0x21   : > { %1126 = vmatprep.subr.bf16.mxu0 %v7974_v1  ;;  %2601 = vmatprep.subr.bf16.mxu1 %v7974_v1  ;;  %v7308_v41 = vld [vmem:[%s8071_s10 + $0x70] ss:$8 sps:$4 sm:$0xff]   ;;  %v7310_v43 = vld [vmem:[%s8071_s10 + $0x84] ss:$8 sps:$4 sm:$0xff]   ;;  %v7314_v45 = vld [vmem:[%s8071_s10 + $0x80] ss:$8 sps:$4 sm:$0xff]  }
  0x22   : > { %v7309_v42 = vld [vmem:[%s8071_s10 + $0x3f0] ss:$8 sps:$4 sm:$0xff]   ;;  %v7312_v44 = vld [vmem:[%s8071_s10 + $0x404] ss:$8 sps:$4 sm:$0xff]   ;;  %v7315_v46 = vld [vmem:[%s8071_s10 + $0x400] ss:$8 sps:$4 sm:$0xff]  }
  0x23   : > { %v7316_v47 = vld [vmem:[%s8071_s10 + $0x94] ss:$8 sps:$4 sm:$0xff]   ;;  %v7320_v49 = vld [vmem:[%s8071_s10 + $0x90] ss:$8 sps:$4 sm:$0xff]   ;;  %v7322_v51 = vld [vmem:[%s8071_s10 + $0xa4] ss:$8 sps:$4 sm:$0xff]  }
  0x24   : > { %1127 = vmatpush1.bf16.msra.mxu0 %v8093_v8  ;;  %2602 = vmatpush1.bf16.msra.mxu1 %v8093_v8  ;;  %v7318_v48 = vld [vmem:[%s8071_s10 + $0x414] ss:$8 sps:$4 sm:$0xff]   ;;  %v7321_v50 = vld [vmem:[%s8071_s10 + $0x410] ss:$8 sps:$4 sm:$0xff]   ;;  %v7324_v52 = vld [vmem:[%s8071_s10 + $0x424] ss:$8 sps:$4 sm:$0xff]  }
  0x25   : > { %1128 = vmatprep.subr.bf16.mxu0 %v7974_v1  ;;  %2603 = vmatprep.subr.bf16.mxu1 %v7974_v1  ;;  %v7326_v53 = vld [vmem:[%s8071_s10 + $0xa0] ss:$8 sps:$4 sm:$0xff]   ;;  %v7328_v55 = vld [vmem:[%s8071_s10 + $0xb4] ss:$8 sps:$4 sm:$0xff]   ;;  %v7332_v57 = vld [vmem:[%s8071_s10 + $0xb0] ss:$8 sps:$4 sm:$0xff]  }
  0x26   : > { %v7327_v54 = vld [vmem:[%s8071_s10 + $0x420] ss:$8 sps:$4 sm:$0xff]   ;;  %v7330_v56 = vld [vmem:[%s8071_s10 + $0x434] ss:$8 sps:$4 sm:$0xff]   ;;  %v7333_v58 = vld [vmem:[%s8071_s10 + $0x430] ss:$8 sps:$4 sm:$0xff]  }
  0x27   : > { %v7334_v59 = vld [vmem:[%s8071_s10 + $0xc4] ss:$8 sps:$4 sm:$0xff]   ;;  %v7338_v61 = vld [vmem:[%s8071_s10 + $0xc0] ss:$8 sps:$4 sm:$0xff]   ;;  %v7340_v63 = vld [vmem:[%s8071_s10 + $0xd4] ss:$8 sps:$4 sm:$0xff]  }
  0x28   : > { %1129 = vmatpush1.bf16.msra.mxu0 %v8102_v9  ;;  %2604 = vmatpush1.bf16.msra.mxu1 %v8102_v9  ;;  %v7336_v60 = vld [vmem:[%s8071_s10 + $0x444] ss:$8 sps:$4 sm:$0xff]   ;;  %v7339_v62 = vld [vmem:[%s8071_s10 + $0x440] ss:$8 sps:$4 sm:$0xff]  }
  0x29   : > { %1130 = vmatprep.subr.bf16.mxu0 %v7974_v1  ;;  %2605 = vmatprep.subr.bf16.mxu1 %v7974_v1  ;;  %v7350_v5 = vld [vmem:[%s8071_s10 + $0xe0] ss:$8 sps:$4 sm:$0xff]  }
  0x2a   : > { %v7351_v6 = vld [vmem:[%s8071_s10 + $0x460] ss:$8 sps:$4 sm:$0xff]  }
  0x2c   : > { %1131 = vmatpush1.bf16.msra.mxu0 %v8111_v10  ;;  %2606 = vmatpush1.bf16.msra.mxu1 %v8111_v10 }
  0x2d   : > { %1144 = vmatprep.subr.bf16.mxu0 %v7974_v1  ;;  %2619 = vmatprep.subr.bf16.mxu1 %v7974_v1 }
  0x30   : > { %1145 = vmatpush2.bf16.msra.mxu0 %v8120_v11  ;;  %2620 = vmatpush2.bf16.msra.mxu1 %v8120_v11 }
  0x31   : > { %1146 = vmatprep.subr.bf16.mxu0 %v7974_v1  ;;  %2621 = vmatprep.subr.bf16.mxu1 %v7974_v1 }
  0x34   : > { %1147 = vmatpush2.bf16.msra.mxu0 %v8129_v12  ;;  %2622 = vmatpush2.bf16.msra.mxu1 %v8129_v12 }
  0x35   : > { %4080 = vmatprep.subr.bf16.mxu0 %v7974_v1  ;;  %5569 = vmatprep.subr.bf16.mxu1 %v7974_v1 }
  0x37   : > { %1149 = vmatmul.mubr.bf16.vlgmr.msra.gmra.mxu0 %v7262_v13  ;;  %2624 = vmatmul.mubr.bf16.vlgmr.msra.gmra.mxu1 %v7265_v14  ;;  %v7362_v13 = vld [vmem:[%s8071_s10 + $0x100] ss:$8 sps:$4 sm:$0xff]  }
  0x38   : > { %4081 = vmatpush1.bf16.msra.mxu0 %v8033_v0  ;;  %5570 = vmatpush1.bf16.msra.mxu1 %v8033_v0  ;;  %v7342_v0 = vld [vmem:[%s8071_s10 + $0x454] ss:$8 sps:$4 sm:$0xff]   ;;  %v7363_v14 = vld [vmem:[%s8071_s10 + $0x480] ss:$8 sps:$4 sm:$0xff]  }
  0x39   : > { %6643 = vmatprep.mubr.msk.bf16.mxu0 %vm947_vm0, %v7268_v15  ;;  %6811 = vmatprep.mubr.msk.bf16.mxu1 %vm947_vm0, %v7270_v16  ;;  %v7364_v15 = vld [vmem:[%s8071_s10 + $0x114] ss:$8 sps:$4 sm:$0xff]  }
  0x3a   : > { %4082 = vmatprep.subr.bf16.mxu0 %v7974_v1  ;;  %5571 = vmatprep.subr.bf16.mxu1 %v7974_v1  ;;  %v7366_v16 = vld [vmem:[%s8071_s10 + $0x494] ss:$8 sps:$4 sm:$0xff]  }
  0x3c   : > { %4083 = vmatpush1.bf16.msra.mxu0 %v8042_v2  ;;  %5572 = vmatpush1.bf16.msra.mxu1 %v8042_v2  ;;  %v7345_v2 = vld [vmem:[%s8071_s10 + $0x450] ss:$8 sps:$4 sm:$0xff]  }
  0x3d   : > { %4084 = vmatprep.subr.bf16.mxu0 %v7974_v1  ;;  %5573 = vmatprep.subr.bf16.mxu1 %v7974_v1 }
  0x3f   : > { %1157 = vmatmul.mubr.bf16.gmra.mxu0 %v7272_v17  ;;  %2632 = vmatmul.mubr.bf16.gmra.mxu1 %v7273_v18  ;;  %v7368_v17 = vld [vmem:[%s8071_s10 + $0x110] ss:$8 sps:$4 sm:$0xff]  }
  0x40   : > { %6644 = vmatprep.mubr.msk.bf16.mxu0 %vm947_vm0, %v7274_v19  ;;  %6812 = vmatprep.mubr.msk.bf16.mxu1 %vm947_vm0, %v7276_v20  ;;  %v7369_v18 = vld [vmem:[%s8071_s10 + $0x490] ss:$8 sps:$4 sm:$0xff]   ;;  %v7370_v19 = vld [vmem:[%s8071_s10 + $0x124] ss:$8 sps:$4 sm:$0xff]  }
  0x41   : > { %4085 = vmatpush1.bf16.msra.mxu0 %v8056_v3  ;;  %5574 = vmatpush1.bf16.msra.mxu1 %v8056_v3  ;;  %v7346_v3 = vld [vmem:[%s8071_s10 + $0xe4] ss:$8 sps:$4 sm:$0xff]  }
  0x42   : > { %4086 = vmatprep.subr.bf16.mxu0 %v7974_v1  ;;  %5575 = vmatprep.subr.bf16.mxu1 %v7974_v1  ;;  %v7372_v20 = vld [vmem:[%s8071_s10 + $0x4a4] ss:$8 sps:$4 sm:$0xff]  }
  0x45   : > { %4087 = vmatpush1.bf16.msra.mxu0 %v8066_v4  ;;  %5576 = vmatpush1.bf16.msra.mxu1 %v8066_v4  ;;  %v7348_v4 = vld [vmem:[%s8071_s10 + $0x464] ss:$8 sps:$4 sm:$0xff]  }
  0x46   : > { %4088 = vmatprep.subr.bf16.mxu0 %v7974_v1  ;;  %5577 = vmatprep.subr.bf16.mxu1 %v7974_v1 }
  0x47   : > { %1165 = vmatmul.mubr.bf16.gmra.mxu0 %v7278_v21  ;;  %2640 = vmatmul.mubr.bf16.gmra.mxu1 %v7279_v22  ;;  %v7374_v21 = vld [vmem:[%s8071_s10 + $0x120] ss:$8 sps:$4 sm:$0xff]  }
  0x48   : > { %6645 = vmatprep.mubr.msk.bf16.mxu0 %vm947_vm0, %v7280_v23  ;;  %6813 = vmatprep.mubr.msk.bf16.mxu1 %vm947_vm0, %v7282_v24  ;;  %v7375_v22 = vld [vmem:[%s8071_s10 + $0x4a0] ss:$8 sps:$4 sm:$0xff]   ;;  %v7376_v23 = vld [vmem:[%s8071_s10 + $0x134] ss:$8 sps:$4 sm:$0xff]  }
  0x49   : > { %4089 = vmatpush1.bf16.msra.mxu0 %v8082_v7  ;;  %5578 = vmatpush1.bf16.msra.mxu1 %v8082_v7  ;;  %v7352_v7 = vld [vmem:[%s8071_s10 + $0xf4] ss:$8 sps:$4 sm:$0xff]  }
  0x4a   : > { %4090 = vmatprep.subr.bf16.mxu0 %v7974_v1  ;;  %5579 = vmatprep.subr.bf16.mxu1 %v7974_v1  ;;  %v7378_v24 = vld [vmem:[%s8071_s10 + $0x4b4] ss:$8 sps:$4 sm:$0xff]  }
  0x4d   : > { %4091 = vmatpush1.bf16.msra.mxu0 %v8093_v8  ;;  %5580 = vmatpush1.bf16.msra.mxu1 %v8093_v8  ;;  %v7354_v8 = vld [vmem:[%s8071_s10 + $0x474] ss:$8 sps:$4 sm:$0xff]  }
  0x4e   : > { %4092 = vmatprep.subr.bf16.mxu0 %v7974_v1  ;;  %5581 = vmatprep.subr.bf16.mxu1 %v7974_v1 }
  0x4f   : > { %1173 = vmatmul.mubr.bf16.gmra.mxu0 %v7284_v25  ;;  %2648 = vmatmul.mubr.bf16.gmra.mxu1 %v7285_v26  ;;  %v7380_v25 = vld [vmem:[%s8071_s10 + $0x130] ss:$8 sps:$4 sm:$0xff]  }
  0x50   : > { %6646 = vmatprep.mubr.msk.bf16.mxu0 %vm947_vm0, %v7286_v27  ;;  %6814 = vmatprep.mubr.msk.bf16.mxu1 %vm947_vm0, %v7288_v28  ;;  %v7381_v26 = vld [vmem:[%s8071_s10 + $0x4b0] ss:$8 sps:$4 sm:$0xff]   ;;  %v7382_v27 = vld [vmem:[%s8071_s10 + $0x144] ss:$8 sps:$4 sm:$0xff]  }
  0x51   : > { %4093 = vmatpush1.bf16.msra.mxu0 %v8102_v9  ;;  %5582 = vmatpush1.bf16.msra.mxu1 %v8102_v9  ;;  %v7356_v9 = vld [vmem:[%s8071_s10 + $0xf0] ss:$8 sps:$4 sm:$0xff]   ;;  %v7384_v28 = vld [vmem:[%s8071_s10 + $0x4c4] ss:$8 sps:$4 sm:$0xff]  }
  0x52   : > { %4094 = vmatprep.subr.bf16.mxu0 %v7974_v1  ;;  %5583 = vmatprep.subr.bf16.mxu1 %v7974_v1 }
  0x55   : > { %4095 = vmatpush1.bf16.msra.mxu0 %v8111_v10  ;;  %5584 = vmatpush1.bf16.msra.mxu1 %v8111_v10  ;;  %v7357_v10 = vld [vmem:[%s8071_s10 + $0x470] ss:$8 sps:$4 sm:$0xff]  }
  0x56   : > { %4108 = vmatprep.subr.bf16.mxu0 %v7974_v1  ;;  %5597 = vmatprep.subr.bf16.mxu1 %v7974_v1 }
  0x57   : > { %1181 = vmatmul.mubr.bf16.gmra.mxu0 %v7290_v29  ;;  %2656 = vmatmul.mubr.bf16.gmra.mxu1 %v7291_v30  ;;  %v7386_v29 = vld [vmem:[%s8071_s10 + $0x140] ss:$8 sps:$4 sm:$0xff]  }
  0x58   : > { %6647 = vmatprep.mubr.msk.bf16.mxu0 %vm947_vm0, %v7292_v31  ;;  %6815 = vmatprep.mubr.msk.bf16.mxu1 %vm947_vm0, %v7294_v32  ;;  %v7387_v30 = vld [vmem:[%s8071_s10 + $0x4c0] ss:$8 sps:$4 sm:$0xff]   ;;  %v7388_v31 = vld [vmem:[%s8071_s10 + $0x154] ss:$8 sps:$4 sm:$0xff]  }
  0x59   : > { %4109 = vmatpush2.bf16.msra.mxu0 %v8120_v11  ;;  %5598 = vmatpush2.bf16.msra.mxu1 %v8120_v11  ;;  %v7358_v11 = vld [vmem:[%s8071_s10 + $0x104] ss:$8 sps:$4 sm:$0xff]   ;;  %v7390_v32 = vld [vmem:[%s8071_s10 + $0x4d4] ss:$8 sps:$4 sm:$0xff]  }
  0x5a   : > { %4110 = vmatprep.subr.bf16.mxu0 %v7974_v1  ;;  %5599 = vmatprep.subr.bf16.mxu1 %v7974_v1  ;;  %v7344_v1 = vld [vmem:[%s8071_s10 + $0xd0] ss:$8 sps:$4 sm:$0xff]  }
  0x5d   : > { %4111 = vmatpush2.bf16.msra.mxu0 %v8129_v12  ;;  %5600 = vmatpush2.bf16.msra.mxu1 %v8129_v12  ;;  %v7360_v12 = vld [vmem:[%s8071_s10 + $0x484] ss:$8 sps:$4 sm:$0xff]  }
  0x5f   : > { %1189 = vmatmul.mubr.bf16.gmra.mxu0 %v7296_v33  ;;  %2664 = vmatmul.mubr.bf16.gmra.mxu1 %v7297_v34  ;;  %v7392_v33 = vld [vmem:[%s8071_s10 + $0x150] ss:$8 sps:$4 sm:$0xff]  }
  0x60   : > { %6648 = vmatprep.mubr.msk.bf16.mxu0 %vm947_vm0, %v7298_v35  ;;  %6816 = vmatprep.mubr.msk.bf16.mxu1 %vm947_vm0, %v7300_v36  ;;  %v7393_v34 = vld [vmem:[%s8071_s10 + $0x4d0] ss:$8 sps:$4 sm:$0xff]   ;;  %v7394_v35 = vld [vmem:[%s8071_s10 + $0x164] ss:$8 sps:$4 sm:$0xff]  }
  0x61   : > { %v7396_v36 = vld [vmem:[%s8071_s10 + $0x4e4] ss:$8 sps:$4 sm:$0xff]  }
  0x67   : > { %1197 = vmatmul.mubr.bf16.gmra.mxu0 %v7302_v37  ;;  %2672 = vmatmul.mubr.bf16.gmra.mxu1 %v7303_v38  ;;  %v7398_v37 = vld [vmem:[%s8071_s10 + $0x160] ss:$8 sps:$4 sm:$0xff]  }
  0x68   : > { %6649 = vmatprep.mubr.msk.bf16.mxu0 %vm947_vm0, %v7304_v39  ;;  %6817 = vmatprep.mubr.msk.bf16.mxu1 %vm947_vm0, %v7306_v40  ;;  %v7399_v38 = vld [vmem:[%s8071_s10 + $0x4e0] ss:$8 sps:$4 sm:$0xff]   ;;  %v7400_v39 = vld [vmem:[%s8071_s10 + $0x174] ss:$8 sps:$4 sm:$0xff]  }
  0x69   : > { %v7402_v40 = vld [vmem:[%s8071_s10 + $0x4f4] ss:$8 sps:$4 sm:$0xff]  }
  0x6f   : > { %1205 = vmatmul.mubr.bf16.gmra.mxu0 %v7308_v41  ;;  %2680 = vmatmul.mubr.bf16.gmra.mxu1 %v7309_v42  ;;  %v7404_v41 = vld [vmem:[%s8071_s10 + $0x170] ss:$8 sps:$4 sm:$0xff]  }
  0x70   : > { %6650 = vmatprep.mubr.msk.bf16.mxu0 %vm947_vm0, %v7310_v43  ;;  %6818 = vmatprep.mubr.msk.bf16.mxu1 %vm947_vm0, %v7312_v44  ;;  %v7405_v42 = vld [vmem:[%s8071_s10 + $0x4f0] ss:$8 sps:$4 sm:$0xff]   ;;  %v7406_v43 = vld [vmem:[%s8071_s10 + $0x184] ss:$8 sps:$4 sm:$0xff]  }
  0x71   : > { %v7408_v44 = vld [vmem:[%s8071_s10 + $0x504] ss:$8 sps:$4 sm:$0xff]  }
  0x77   : > { %1213 = vmatmul.mubr.bf16.gmra.mxu0 %v7314_v45  ;;  %2688 = vmatmul.mubr.bf16.gmra.mxu1 %v7315_v46  ;;  %v7410_v45 = vld [vmem:[%s8071_s10 + $0x180] ss:$8 sps:$4 sm:$0xff]  }
  0x78   : > { %6651 = vmatprep.mubr.msk.bf16.mxu0 %vm947_vm0, %v7316_v47  ;;  %6819 = vmatprep.mubr.msk.bf16.mxu1 %vm947_vm0, %v7318_v48  ;;  %v7411_v46 = vld [vmem:[%s8071_s10 + $0x500] ss:$8 sps:$4 sm:$0xff]   ;;  %v7412_v47 = vld [vmem:[%s8071_s10 + $0x194] ss:$8 sps:$4 sm:$0xff]  }
  0x79   : > { %v7414_v48 = vld [vmem:[%s8071_s10 + $0x514] ss:$8 sps:$4 sm:$0xff]  }
  0x7f   : > { %1221 = vmatmul.mubr.bf16.gmra.mxu0 %v7320_v49  ;;  %2696 = vmatmul.mubr.bf16.gmra.mxu1 %v7321_v50 }
  0x80   : > { %6652 = vmatprep.mubr.msk.bf16.mxu0 %vm947_vm0, %v7322_v51  ;;  %6820 = vmatprep.mubr.msk.bf16.mxu1 %vm947_vm0, %v7324_v52 }
  0x87   : > { %1229 = vmatmul.mubr.bf16.gmra.mxu0 %v7326_v53  ;;  %2704 = vmatmul.mubr.bf16.gmra.mxu1 %v7327_v54 }
  0x88   : > { %6653 = vmatprep.mubr.msk.bf16.mxu0 %vm947_vm0, %v7328_v55  ;;  %6821 = vmatprep.mubr.msk.bf16.mxu1 %vm947_vm0, %v7330_v56  ;;  %v7416_v55 = vld [vmem:[%s8071_s10 + $0x190] ss:$8 sps:$4 sm:$0xff]  }
  0x89   : > { %v7417_v56 = vld [vmem:[%s8071_s10 + $0x510] ss:$8 sps:$4 sm:$0xff]  }
  0x8f   : > { %1237 = vmatmul.mubr.bf16.gmra.mxu0 %v7332_v57  ;;  %2712 = vmatmul.mubr.bf16.gmra.mxu1 %v7333_v58  ;;  %v7418_v57 = vld [vmem:[%s8071_s10 + $0x1a4] ss:$8 sps:$4 sm:$0xff]  }
  0x90   : > { %6654 = vmatprep.mubr.msk.bf16.mxu0 %vm947_vm0, %v7334_v59  ;;  %6822 = vmatprep.mubr.msk.bf16.mxu1 %vm947_vm0, %v7336_v60  ;;  %v7420_v58 = vld [vmem:[%s8071_s10 + $0x524] ss:$8 sps:$4 sm:$0xff]  }
  0x97   : > { %1245 = vmatmul.mubr.bf16.gmra.mxu0 %v7338_v61  ;;  %2720 = vmatmul.mubr.bf16.gmra.mxu1 %v7339_v62 }
  0x98   : > { %6655 = vmatprep.mubr.msk.bf16.mxu0 %vm947_vm0, %v7340_v63  ;;  %6823 = vmatprep.mubr.msk.bf16.mxu1 %vm947_vm0, %v7342_v0 }
  0x9f   : > { %1253 = vmatmul.mubr.bf16.gmra.mxu0 %v7344_v1  ;;  %2728 = vmatmul.mubr.bf16.gmra.mxu1 %v7345_v2 }
  0xa0   : > { %6656 = vmatprep.mubr.msk.bf16.mxu0 %vm947_vm0, %v7346_v3  ;;  %6824 = vmatprep.mubr.msk.bf16.mxu1 %vm947_vm0, %v7348_v4  ;;  %v7422_v3 = vld [vmem:[%s8071_s10 + $0x1a0] ss:$8 sps:$4 sm:$0xff]  }
  0xa1   : > { %v7423_v4 = vld [vmem:[%s8071_s10 + $0x520] ss:$8 sps:$4 sm:$0xff]  }
  0xa7   : > { %1261 = vmatmul.mubr.bf16.gmra.mxu0 %v7350_v5  ;;  %2736 = vmatmul.mubr.bf16.gmra.mxu1 %v7351_v6  ;;  %v7424_v5 = vld [vmem:[%s8071_s10 + $0x1b4] ss:$8 sps:$4 sm:$0xff]  }
  0xa8   : > { %6657 = vmatprep.mubr.msk.bf16.mxu0 %vm947_vm0, %v7352_v7  ;;  %6825 = vmatprep.mubr.msk.bf16.mxu1 %vm947_vm0, %v7354_v8  ;;  %v7426_v6 = vld [vmem:[%s8071_s10 + $0x534] ss:$8 sps:$4 sm:$0xff]  }
  0xaf   : > { %1269 = vmatmul.mubr.bf16.gmra.mxu0 %v7356_v9  ;;  %2744 = vmatmul.mubr.bf16.gmra.mxu1 %v7357_v10 }
  0xb0   : > { %6658 = vmatprep.mubr.msk.bf16.mxu0 %vm947_vm0, %v7358_v11  ;;  %6826 = vmatprep.mubr.msk.bf16.mxu1 %vm947_vm0, %v7360_v12 }
  0xb7   : > { %1277 = vmatmul.mubr.bf16.gmra.mxu0 %v7362_v13  ;;  %2752 = vmatmul.mubr.bf16.gmra.mxu1 %v7363_v14 }
  0xb8   : > { %6659 = vmatprep.mubr.msk.bf16.mxu0 %vm947_vm0, %v7364_v15  ;;  %6827 = vmatprep.mubr.msk.bf16.mxu1 %vm947_vm0, %v7366_v16  ;;  %v7428_v15 = vld [vmem:[%s8071_s10 + $0x1b0] ss:$8 sps:$4 sm:$0xff]  }
  0xb9   : > { %v7429_v16 = vld [vmem:[%s8071_s10 + $0x530] ss:$8 sps:$4 sm:$0xff]  }
  0xbf   : > { %1285 = vmatmul.mubr.bf16.gmra.mxu0 %v7368_v17  ;;  %2760 = vmatmul.mubr.bf16.gmra.mxu1 %v7369_v18  ;;  %v7430_v17 = vld [vmem:[%s8071_s10 + $0x1c4] ss:$8 sps:$4 sm:$0xff]  }
  0xc0   : > { %6660 = vmatprep.mubr.msk.bf16.mxu0 %vm947_vm0, %v7370_v19  ;;  %6828 = vmatprep.mubr.msk.bf16.mxu1 %vm947_vm0, %v7372_v20  ;;  %v7432_v18 = vld [vmem:[%s8071_s10 + $0x544] ss:$8 sps:$4 sm:$0xff]  }
  0xc7   : > { %1293 = vmatmul.mubr.bf16.gmra.mxu0 %v7374_v21  ;;  %2768 = vmatmul.mubr.bf16.gmra.mxu1 %v7375_v22 }
  0xc8   : > { %6661 = vmatprep.mubr.msk.bf16.mxu0 %vm947_vm0, %v7376_v23  ;;  %6829 = vmatprep.mubr.msk.bf16.mxu1 %vm947_vm0, %v7378_v24 }
  0xcf   : > { %1301 = vmatmul.mubr.bf16.gmra.mxu0 %v7380_v25  ;;  %2776 = vmatmul.mubr.bf16.gmra.mxu1 %v7381_v26 }
  0xd0   : > { %6662 = vmatprep.mubr.msk.bf16.mxu0 %vm947_vm0, %v7382_v27  ;;  %6830 = vmatprep.mubr.msk.bf16.mxu1 %vm947_vm0, %v7384_v28  ;;  %v7434_v27 = vld [vmem:[%s8071_s10 + $0x1c0] ss:$8 sps:$4 sm:$0xff]  }
  0xd1   : > { %v7435_v28 = vld [vmem:[%s8071_s10 + $0x540] ss:$8 sps:$4 sm:$0xff]  }
  0xd7   : > { %1309 = vmatmul.mubr.bf16.gmra.mxu0 %v7386_v29  ;;  %2784 = vmatmul.mubr.bf16.gmra.mxu1 %v7387_v30  ;;  %v7436_v29 = vld [vmem:[%s8071_s10 + $0x1d4] ss:$8 sps:$4 sm:$0xff]  }
  0xd8   : > { %6663 = vmatprep.mubr.msk.bf16.mxu0 %vm947_vm0, %v7388_v31  ;;  %6831 = vmatprep.mubr.msk.bf16.mxu1 %vm947_vm0, %v7390_v32  ;;  %v7438_v30 = vld [vmem:[%s8071_s10 + $0x554] ss:$8 sps:$4 sm:$0xff]  }
  0xdf   : > { %1317 = vmatmul.mubr.bf16.gmra.mxu0 %v7392_v33  ;;  %2792 = vmatmul.mubr.bf16.gmra.mxu1 %v7393_v34 }
  0xe0   : > { %6664 = vmatprep.mubr.msk.bf16.mxu0 %vm947_vm0, %v7394_v35  ;;  %6832 = vmatprep.mubr.msk.bf16.mxu1 %vm947_vm0, %v7396_v36 }
  0xe7   : > { %1325 = vmatmul.mubr.bf16.gmra.mxu0 %v7398_v37  ;;  %2800 = vmatmul.mubr.bf16.gmra.mxu1 %v7399_v38 }
  0xe8   : > { %6665 = vmatprep.mubr.msk.bf16.mxu0 %vm947_vm0, %v7400_v39  ;;  %6833 = vmatprep.mubr.msk.bf16.mxu1 %vm947_vm0, %v7402_v40  ;;  %v7440_v39 = vld [vmem:[%s8071_s10 + $0x1d0] ss:$8 sps:$4 sm:$0xff]  }
  0xe9   : > { %v7441_v40 = vld [vmem:[%s8071_s10 + $0x550] ss:$8 sps:$4 sm:$0xff]  }
  0xef   : > { %1333 = vmatmul.mubr.bf16.gmra.mxu0 %v7404_v41  ;;  %2808 = vmatmul.mubr.bf16.gmra.mxu1 %v7405_v42  ;;  %v7442_v41 = vld [vmem:[%s8071_s10 + $0x1e4] ss:$8 sps:$4 sm:$0xff]  }
  0xf0   : > { %6666 = vmatprep.mubr.msk.bf16.mxu0 %vm947_vm0, %v7406_v43  ;;  %6834 = vmatprep.mubr.msk.bf16.mxu1 %vm947_vm0, %v7408_v44  ;;  %v7444_v42 = vld [vmem:[%s8071_s10 + $0x564] ss:$8 sps:$4 sm:$0xff]  }
  0xf7   : > { %v8323_v49 = vpop.f32.mrf.mxu0  ;;  %1341 = vmatmul.mubr.bf16.gmra.mxu0 %v7410_v45  ;;  %v8325_v50 = vpop.f32.mrf.mxu1  ;;  %2816 = vmatmul.mubr.bf16.gmra.mxu1 %v7411_v46 }
  0xf8   : > { %6667 = vmatprep.mubr.msk.bf16.mxu0 %vm947_vm0, %v7412_v47  ;;  %6835 = vmatprep.mubr.msk.bf16.mxu1 %vm947_vm0, %v7414_v48 }
  0xf9   : > { %v1152_v51 = vpop.f32.mrf.mxu0  ;;  %v2627_v52 = vpop.f32.mrf.mxu1 }
  0xfb   : > { %v8329_v53 = vpop.f32.mrf.mxu0  ;;  %v8331_v54 = vpop.f32.mrf.mxu1 }
  0xfd   : > { %v1155_v59 = vpop.f32.mrf.mxu0  ;;  %v2630_v60 = vpop.f32.mrf.mxu1 }
  0xff   : > { %v8337_v61 = vpop.f32.mrf.mxu0  ;;  %1349 = vmatmul.mubr.bf16.gmra.mxu0 %v7416_v55  ;;  %v8339_v62 = vpop.f32.mrf.mxu1  ;;  %2824 = vmatmul.mubr.bf16.gmra.mxu1 %v7417_v56  ;;  %v7446_v55 = vld [vmem:[%s8071_s10 + $0x1e0] ss:$8 sps:$4 sm:$0xff]  }
 0x100   : > { %6668 = vmatprep.mubr.msk.bf16.mxu0 %vm947_vm0, %v7418_v57  ;;  %6836 = vmatprep.mubr.msk.bf16.mxu1 %vm947_vm0, %v7420_v58  ;;  %v7447_v56 = vld [vmem:[%s8071_s10 + $0x560] ss:$8 sps:$4 sm:$0xff]   ;;  %v7448_v57 = vld [vmem:[%s8071_s10 + $0x1f4] ss:$8 sps:$4 sm:$0xff]  }
 0x101   : > { %v1160_v63 = vpop.f32.mrf.mxu0  ;;  %v2635_v0 = vpop.f32.mrf.mxu1  ;;  %v7450_v58 = vld [vmem:[%s8071_s10 + $0x574] ss:$8 sps:$4 sm:$0xff]  }
 0x103   : > { %v8343_v1 = vpop.f32.mrf.mxu0  ;;  %v8345_v2 = vpop.f32.mrf.mxu1 }
 0x105   : > { %v1163_v7 = vpop.f32.mrf.mxu0  ;;  %v2638_v8 = vpop.f32.mrf.mxu1 }
 0x106   : > { %v7452_v7 = vld [vmem:[%s8071_s10 + $0x1f0] ss:$8 sps:$4 sm:$0xff]  }
 0x107   : > { %v8351_v9 = vpop.f32.mrf.mxu0  ;;  %1357 = vmatmul.mubr.bf16.gmra.mxu0 %v7422_v3  ;;  %v8353_v10 = vpop.f32.mrf.mxu1  ;;  %2832 = vmatmul.mubr.bf16.gmra.mxu1 %v7423_v4  ;;  %v7453_v8 = vld [vmem:[%s8071_s10 + $0x570] ss:$8 sps:$4 sm:$0xff]  }
 0x108   : > { %6669 = vmatprep.mubr.msk.bf16.mxu0 %vm947_vm0, %v7424_v5  ;;  %6837 = vmatprep.mubr.msk.bf16.mxu1 %vm947_vm0, %v7426_v6 }
 0x109   : > { %v1168_v11 = vpop.f32.mrf.mxu0  ;;  %v2643_v12 = vpop.f32.mrf.mxu1 }
 0x10a   : > { %v7454_v11 = vld [vmem:[%s8071_s10 + $0x204] ss:$8 sps:$4 sm:$0xff]  }
 0x10b   : > { %v8357_v13 = vpop.f32.mrf.mxu0  ;;  %v8359_v14 = vpop.f32.mrf.mxu1  ;;  %v7456_v12 = vld [vmem:[%s8071_s10 + $0x584] ss:$8 sps:$4 sm:$0xff]  }
 0x10d   : > { %v1171_v19 = vpop.f32.mrf.mxu0  ;;  %v2646_v20 = vpop.f32.mrf.mxu1 }
 0x10f   : > { %v8365_v21 = vpop.f32.mrf.mxu0  ;;  %1365 = vmatmul.mubr.bf16.gmra.mxu0 %v7428_v15  ;;  %v8367_v22 = vpop.f32.mrf.mxu1  ;;  %2840 = vmatmul.mubr.bf16.gmra.mxu1 %v7429_v16 }
 0x110   : > { %6670 = vmatprep.mubr.msk.bf16.mxu0 %vm947_vm0, %v7430_v17  ;;  %6838 = vmatprep.mubr.msk.bf16.mxu1 %vm947_vm0, %v7432_v18 }
 0x111   : > { %v1176_v23 = vpop.f32.mrf.mxu0  ;;  %v2651_v24 = vpop.f32.mrf.mxu1 }
 0x113   : > { %v8371_v25 = vpop.f32.mrf.mxu0  ;;  %v8373_v26 = vpop.f32.mrf.mxu1 }
 0x115   : > { %v1179_v31 = vpop.f32.mrf.mxu0  ;;  %v2654_v32 = vpop.f32.mrf.mxu1 }
 0x117   : > { %v8379_v33 = vpop.f32.mrf.mxu0  ;;  %1373 = vmatmul.mubr.bf16.gmra.mxu0 %v7434_v27  ;;  %v8381_v34 = vpop.f32.mrf.mxu1  ;;  %2848 = vmatmul.mubr.bf16.gmra.mxu1 %v7435_v28  ;;  %v7458_v27 = vld [vmem:[%s8071_s10 + $0x200] ss:$8 sps:$4 sm:$0xff]  }
 0x118   : > { %6671 = vmatprep.mubr.msk.bf16.mxu0 %vm947_vm0, %v7436_v29  ;;  %6839 = vmatprep.mubr.msk.bf16.mxu1 %vm947_vm0, %v7438_v30  ;;  %v7459_v28 = vld [vmem:[%s8071_s10 + $0x580] ss:$8 sps:$4 sm:$0xff]   ;;  %v7460_v29 = vld [vmem:[%s8071_s10 + $0x214] ss:$8 sps:$4 sm:$0xff]  }
 0x119   : > { %v1184_v35 = vpop.f32.mrf.mxu0  ;;  %v2659_v36 = vpop.f32.mrf.mxu1  ;;  %v7462_v30 = vld [vmem:[%s8071_s10 + $0x594] ss:$8 sps:$4 sm:$0xff]  }
 0x11b   : > { %v8385_v37 = vpop.f32.mrf.mxu0  ;;  %v8387_v38 = vpop.f32.mrf.mxu1 }
 0x11d   : > { %v1187_v43 = vpop.f32.mrf.mxu0  ;;  %v2662_v44 = vpop.f32.mrf.mxu1 }
 0x11e   : > { %v7464_v43 = vld [vmem:[%s8071_s10 + $0x210] ss:$8 sps:$4 sm:$0xff]  }
 0x11f   : > { %v8393_v45 = vpop.f32.mrf.mxu0  ;;  %1381 = vmatmul.mubr.bf16.gmra.mxu0 %v7440_v39  ;;  %v8395_v46 = vpop.f32.mrf.mxu1  ;;  %2856 = vmatmul.mubr.bf16.gmra.mxu1 %v7441_v40  ;;  %v7465_v44 = vld [vmem:[%s8071_s10 + $0x590] ss:$8 sps:$4 sm:$0xff]  }
 0x120   : > { %6672 = vmatprep.mubr.msk.bf16.mxu0 %vm947_vm0, %v7442_v41  ;;  %6840 = vmatprep.mubr.msk.bf16.mxu1 %vm947_vm0, %v7444_v42 }
 0x121   : > { %v1192_v47 = vpop.f32.mrf.mxu0  ;;  %v2667_v48 = vpop.f32.mrf.mxu1 }
 0x122   : > { %v7466_v47 = vld [vmem:[%s8071_s10 + $0x224] ss:$8 sps:$4 sm:$0xff]  }
 0x123   : > { %v8399_v51 = vpop.f32.mrf.mxu0  ;;  %v8401_v52 = vpop.f32.mrf.mxu1  ;;  %v7468_v48 = vld [vmem:[%s8071_s10 + $0x5a4] ss:$8 sps:$4 sm:$0xff]  }
 0x125   : > { %v1195_v59 = vpop.f32.mrf.mxu0  ;;  %v2670_v60 = vpop.f32.mrf.mxu1 }
 0x127   : > { %v8407_v63 = vpop.f32.mrf.mxu0  ;;  %1389 = vmatmul.mubr.bf16.gmra.mxu0 %v7446_v55  ;;  %v8409_v0 = vpop.f32.mrf.mxu1  ;;  %2864 = vmatmul.mubr.bf16.gmra.mxu1 %v7447_v56 }
 0x128   : > { %10203 = vst [vmem:[#allocation2_spill] sm:$0xff] %v8407_v63  ;;  %10204 = vst [vmem:[#allocation3_spill] sm:$0xff] %v8409_v0  ;;  %6673 = vmatprep.mubr.msk.bf16.mxu0 %vm947_vm0, %v7448_v57  ;;  %6841 = vmatprep.mubr.msk.bf16.mxu1 %vm947_vm0, %v7450_v58 }
 0x129   : > { %v1200_v3 = vpop.f32.mrf.mxu0  ;;  %v2675_v4 = vpop.f32.mrf.mxu1 }
 0x12b   : > { %v8413_v5 = vpop.f32.mrf.mxu0  ;;  %v8415_v6 = vpop.f32.mrf.mxu1 }
 0x12c   : > { %10205 = vst [vmem:[#allocation4_spill] sm:$0xff] %v8413_v5  ;;  %10206 = vst [vmem:[#allocation5_spill] sm:$0xff] %v8415_v6  ;;  %v7536_v6 = vld [vmem:[%s8071_s10 + $0x2d0] ss:$8 sps:$4 sm:$0xff]  }
 0x12d   : > { %v1203_v15 = vpop.f32.mrf.mxu0  ;;  %v2678_v16 = vpop.f32.mrf.mxu1 }
 0x12f   : > { %v8421_v17 = vpop.f32.mrf.mxu0  ;;  %1397 = vmatmul.mubr.bf16.gmra.mxu0 %v7452_v7  ;;  %v8423_v18 = vpop.f32.mrf.mxu1  ;;  %2872 = vmatmul.mubr.bf16.gmra.mxu1 %v7453_v8  ;;  %v7470_v7 = vld [vmem:[%s8071_s10 + $0x220] ss:$8 sps:$4 sm:$0xff]  }
 0x130   : > { %10207 = vst [vmem:[#allocation6_spill] sm:$0xff] %v8421_v17  ;;  %10208 = vst [vmem:[#allocation7_spill] sm:$0xff] %v8423_v18  ;;  %6674 = vmatprep.mubr.msk.bf16.mxu0 %vm947_vm0, %v7454_v11  ;;  %6842 = vmatprep.mubr.msk.bf16.mxu1 %vm947_vm0, %v7456_v12  ;;  %v7471_v8 = vld [vmem:[%s8071_s10 + $0x5a0] ss:$8 sps:$4 sm:$0xff]   ;;  %v7472_v11 = vld [vmem:[%s8071_s10 + $0x234] ss:$8 sps:$4 sm:$0xff]  }
 0x131   : > { %v1208_v19 = vpop.f32.mrf.mxu0  ;;  %v2683_v20 = vpop.f32.mrf.mxu1  ;;  %v7474_v12 = vld [vmem:[%s8071_s10 + $0x5b4] ss:$8 sps:$4 sm:$0xff]  }
 0x133   : > { %v8427_v23 = vpop.f32.mrf.mxu0  ;;  %v8429_v24 = vpop.f32.mrf.mxu1 }
 0x134   : > { %10209 = vst [vmem:[#allocation8_spill] sm:$0xff] %v8427_v23  ;;  %10210 = vst [vmem:[#allocation9_spill] sm:$0xff] %v8429_v24  ;;  %v7530_v24 = vld [vmem:[%s8071_s10 + $0x2c0] ss:$8 sps:$4 sm:$0xff]  }
 0x135   : > { %v1211_v31 = vpop.f32.mrf.mxu0  ;;  %v2686_v32 = vpop.f32.mrf.mxu1 }
 0x136   : > { %v7476_v31 = vld [vmem:[%s8071_s10 + $0x230] ss:$8 sps:$4 sm:$0xff]  }
 0x137   : > { %v8435_v35 = vpop.f32.mrf.mxu0  ;;  %1405 = vmatmul.mubr.bf16.gmra.mxu0 %v7458_v27  ;;  %v8437_v36 = vpop.f32.mrf.mxu1  ;;  %2880 = vmatmul.mubr.bf16.gmra.mxu1 %v7459_v28  ;;  %v7477_v32 = vld [vmem:[%s8071_s10 + $0x5b0] ss:$8 sps:$4 sm:$0xff]  }
 0x138   : > { %10211 = vst [vmem:[#allocation10_spill] sm:$0xff] %v8435_v35  ;;  %10212 = vst [vmem:[#allocation11_spill] sm:$0xff] %v8437_v36  ;;  %6675 = vmatprep.mubr.msk.bf16.mxu0 %vm947_vm0, %v7460_v29  ;;  %6843 = vmatprep.mubr.msk.bf16.mxu1 %vm947_vm0, %v7462_v30 }
 0x139   : > { %v1216_v39 = vpop.f32.mrf.mxu0  ;;  %v2691_v40 = vpop.f32.mrf.mxu1 }
 0x13a   : > { %v7478_v39 = vld [vmem:[%s8071_s10 + $0x244] ss:$8 sps:$4 sm:$0xff]  }
 0x13b   : > { %v8441_v41 = vpop.f32.mrf.mxu0  ;;  %v8443_v42 = vpop.f32.mrf.mxu1  ;;  %v7480_v40 = vld [vmem:[%s8071_s10 + $0x5c4] ss:$8 sps:$4 sm:$0xff]  }
 0x13c   : > { %10213 = vst [vmem:[#allocation12_spill] sm:$0xff] %v8441_v41  ;;  %10214 = vst [vmem:[#allocation13_spill] sm:$0xff] %v8443_v42  ;;  %v7524_v42 = vld [vmem:[%s8071_s10 + $0x2b0] ss:$8 sps:$4 sm:$0xff]  }
 0x13d   : > { %v1219_v55 = vpop.f32.mrf.mxu0  ;;  %v2694_v56 = vpop.f32.mrf.mxu1 }
 0x13f   : > { %v8449_v57 = vpop.f32.mrf.mxu0  ;;  %1413 = vmatmul.mubr.bf16.gmra.mxu0 %v7464_v43  ;;  %v8451_v58 = vpop.f32.mrf.mxu1  ;;  %2888 = vmatmul.mubr.bf16.gmra.mxu1 %v7465_v44 }
 0x140   : > { %10215 = vst [vmem:[#allocation14_spill] sm:$0xff] %v8449_v57  ;;  %10216 = vst [vmem:[#allocation15_spill] sm:$0xff] %v8451_v58  ;;  %6676 = vmatprep.mubr.msk.bf16.mxu0 %vm947_vm0, %v7466_v47  ;;  %6844 = vmatprep.mubr.msk.bf16.mxu1 %vm947_vm0, %v7468_v48 }
 0x141   : > { %v1224_v59 = vpop.f32.mrf.mxu0  ;;  %v2699_v60 = vpop.f32.mrf.mxu1 }
 0x143   : > { %v8455_v3 = vpop.f32.mrf.mxu0  ;;  %v8457_v4 = vpop.f32.mrf.mxu1 }
 0x144   : > { %10217 = vst [vmem:[#allocation16_spill] sm:$0xff] %v8455_v3  ;;  %10218 = vst [vmem:[#allocation17_spill] sm:$0xff] %v8457_v4  ;;  %v7518_v4 = vld [vmem:[%s8071_s10 + $0x2a0] ss:$8 sps:$4 sm:$0xff]  }
 0x145   : > { %v1227_v15 = vpop.f32.mrf.mxu0  ;;  %v2702_v16 = vpop.f32.mrf.mxu1 }
 0x147   : > { %v8463_v19 = vpop.f32.mrf.mxu0  ;;  %1421 = vmatmul.mubr.bf16.gmra.mxu0 %v7470_v7  ;;  %v8465_v20 = vpop.f32.mrf.mxu1  ;;  %2896 = vmatmul.mubr.bf16.gmra.mxu1 %v7471_v8  ;;  %v7482_v7 = vld [vmem:[%s8071_s10 + $0x240] ss:$8 sps:$4 sm:$0xff]  }
 0x148   : > { %10219 = vst [vmem:[#allocation18_spill] sm:$0xff] %v8463_v19  ;;  %10220 = vst [vmem:[#allocation19_spill] sm:$0xff] %v8465_v20  ;;  %6677 = vmatprep.mubr.msk.bf16.mxu0 %vm947_vm0, %v7472_v11  ;;  %6845 = vmatprep.mubr.msk.bf16.mxu1 %vm947_vm0, %v7474_v12  ;;  %v7483_v8 = vld [vmem:[%s8071_s10 + $0x5c0] ss:$8 sps:$4 sm:$0xff]   ;;  %v7484_v11 = vld [vmem:[%s8071_s10 + $0x254] ss:$8 sps:$4 sm:$0xff]  }
 0x149   : > { %v1232_v27 = vpop.f32.mrf.mxu0  ;;  %v2707_v28 = vpop.f32.mrf.mxu1  ;;  %v7486_v12 = vld [vmem:[%s8071_s10 + $0x5d4] ss:$8 sps:$4 sm:$0xff]  }
 0x14b   : > { %v8469_v29 = vpop.f32.mrf.mxu0  ;;  %v8471_v30 = vpop.f32.mrf.mxu1 }
 0x14c   : > { %10221 = vst [vmem:[#allocation20_spill] sm:$0xff] %v8469_v29  ;;  %10222 = vst [vmem:[#allocation21_spill] sm:$0xff] %v8471_v30  ;;  %v7512_v30 = vld [vmem:[%s8071_s10 + $0x290] ss:$8 sps:$4 sm:$0xff]  }
 0x14d   : > { %v1235_v43 = vpop.f32.mrf.mxu0  ;;  %v2710_v44 = vpop.f32.mrf.mxu1 }
 0x14e   : > { %v7488_v43 = vld [vmem:[%s8071_s10 + $0x250] ss:$8 sps:$4 sm:$0xff]  }
 0x14f   : > { %v8477_v47 = vpop.f32.mrf.mxu0  ;;  %1429 = vmatmul.mubr.bf16.gmra.mxu0 %v7476_v31  ;;  %v8479_v48 = vpop.f32.mrf.mxu1  ;;  %2904 = vmatmul.mubr.bf16.gmra.mxu1 %v7477_v32  ;;  %v7489_v44 = vld [vmem:[%s8071_s10 + $0x5d0] ss:$8 sps:$4 sm:$0xff]  }
 0x150   : > { %10223 = vst [vmem:[#allocation22_spill] sm:$0xff] %v8477_v47  ;;  %10224 = vst [vmem:[#allocation23_spill] sm:$0xff] %v8479_v48  ;;  %6678 = vmatprep.mubr.msk.bf16.mxu0 %vm947_vm0, %v7478_v39  ;;  %6846 = vmatprep.mubr.msk.bf16.mxu1 %vm947_vm0, %v7480_v40 }
 0x151   : > { %v1240_v55 = vpop.f32.mrf.mxu0  ;;  %v2715_v56 = vpop.f32.mrf.mxu1 }
 0x152   : > { %v7490_v55 = vld [vmem:[%s8071_s10 + $0x264] ss:$8 sps:$4 sm:$0xff]  }
 0x153   : > { %v8483_v59 = vpop.f32.mrf.mxu0  ;;  %v8485_v60 = vpop.f32.mrf.mxu1  ;;  %v7492_v56 = vld [vmem:[%s8071_s10 + $0x5e4] ss:$8 sps:$4 sm:$0xff]  }
 0x154   : > { %10225 = vst [vmem:[#allocation24_spill] sm:$0xff] %v8483_v59  ;;  %10226 = vst [vmem:[#allocation25_spill] sm:$0xff] %v8485_v60  ;;  %v7506_v60 = vld [vmem:[%s8071_s10 + $0x280] ss:$8 sps:$4 sm:$0xff]  }
 0x155   : > { %v1243_v15 = vpop.f32.mrf.mxu0  ;;  %v2718_v16 = vpop.f32.mrf.mxu1 }
 0x157   : > { %v8491_v27 = vpop.f32.mrf.mxu0  ;;  %1437 = vmatmul.mubr.bf16.gmra.mxu0 %v7482_v7  ;;  %v8493_v28 = vpop.f32.mrf.mxu1  ;;  %2912 = vmatmul.mubr.bf16.gmra.mxu1 %v7483_v8 }
 0x158   : > { %10227 = vst [vmem:[#allocation26_spill] sm:$0xff] %v8491_v27  ;;  %10228 = vst [vmem:[#allocation27_spill] sm:$0xff] %v8493_v28  ;;  %6679 = vmatprep.mubr.msk.bf16.mxu0 %vm947_vm0, %v7484_v11  ;;  %6847 = vmatprep.mubr.msk.bf16.mxu1 %vm947_vm0, %v7486_v12 }
 0x159   : > { %v1248_v31 = vpop.f32.mrf.mxu0  ;;  %v2723_v32 = vpop.f32.mrf.mxu1 }
 0x15b   : > { %v8497_v39 = vpop.f32.mrf.mxu0  ;;  %v8499_v40 = vpop.f32.mrf.mxu1 }
 0x15c   : > { %10229 = vst [vmem:[#allocation28_spill] sm:$0xff] %v8497_v39  ;;  %10230 = vst [vmem:[#allocation29_spill] sm:$0xff] %v8499_v40  ;;  %v7494_v40 = vld [vmem:[%s8071_s10 + $0x260] ss:$8 sps:$4 sm:$0xff]  }
 0x15d   : > { %v1251_v7 = vpop.f32.mrf.mxu0  ;;  %v2726_v8 = vpop.f32.mrf.mxu1 }
 0x15e   : > { %v7495_v7 = vld [vmem:[%s8071_s10 + $0x5e0] ss:$8 sps:$4 sm:$0xff]   ;;  %v7496_v8 = vld [vmem:[%s8071_s10 + $0x274] ss:$8 sps:$4 sm:$0xff]  }
 0x15f   : > { %v8505_v15 = vpop.f32.mrf.mxu0  ;;  %1445 = vmatmul.mubr.bf16.gmra.mxu0 %v7488_v43  ;;  %v8507_v11 = vpop.f32.mrf.mxu1  ;;  %2920 = vmatmul.mubr.bf16.gmra.mxu1 %v7489_v44  ;;  %v7498_v43 = vld [vmem:[%s8071_s10 + $0x5f4] ss:$8 sps:$4 sm:$0xff]  }
 0x160   : > { %10231 = vst [vmem:[#allocation30_spill] sm:$0xff] %v8505_v15  ;;  %10232 = vst [vmem:[#allocation31_spill] sm:$0xff] %v8507_v11  ;;  %6680 = vmatprep.mubr.msk.bf16.mxu0 %vm947_vm0, %v7490_v55  ;;  %6848 = vmatprep.mubr.msk.bf16.mxu1 %vm947_vm0, %v7492_v56 }
 0x161   : > { %v1256_v12 = vpop.f32.mrf.mxu0  ;;  %v2731_v16 = vpop.f32.mrf.mxu1 }
 0x163   : > { %v8511_v31 = vpop.f32.mrf.mxu0  ;;  %v8513_v32 = vpop.f32.mrf.mxu1 }
 0x164   : > { %10233 = vst [vmem:[#allocation32_spill] sm:$0xff] %v8511_v31  ;;  %10234 = vst [vmem:[#allocation33_spill] sm:$0xff] %v8513_v32  ;;  %v7500_v31 = vld [vmem:[%s8071_s10 + $0x270] ss:$8 sps:$4 sm:$0xff]  }
 0x165   : > { %v1259_v11 = vpop.f32.mrf.mxu0  ;;  %v2734_v44 = vpop.f32.mrf.mxu1 }
 0x166   : > { %v7501_v11 = vld [vmem:[%s8071_s10 + $0x5f0] ss:$8 sps:$4 sm:$0xff]   ;;  %v7502_v44 = vld [vmem:[%s8071_s10 + $0x284] ss:$8 sps:$4 sm:$0xff]  }
 0x167   : > { %v8519_v15 = vpop.f32.mrf.mxu0  ;;  %1453 = vmatmul.mubr.bf16.gmra.mxu0 %v7494_v40  ;;  %v8521_v55 = vpop.f32.mrf.mxu1  ;;  %2928 = vmatmul.mubr.bf16.gmra.mxu1 %v7495_v7  ;;  %v7504_v40 = vld [vmem:[%s8071_s10 + $0x604] ss:$8 sps:$4 sm:$0xff]  }
 0x168   : > { %6681 = vmatprep.mubr.msk.bf16.mxu0 %vm947_vm0, %v7496_v8  ;;  %6849 = vmatprep.mubr.msk.bf16.mxu1 %vm947_vm0, %v7498_v43 }
 0x169   : > { %v1264_v56 = vpop.f32.mrf.mxu0  ;;  %v2739_v12 = vpop.f32.mrf.mxu1 }
 0x16b   : > { %v8525_v16 = vpop.f32.mrf.mxu0  ;;  %v8527_v32 = vpop.f32.mrf.mxu1 }
 0x16d   : > { %v1267_v39 = vpop.f32.mrf.mxu0  ;;  %v2742_v7 = vpop.f32.mrf.mxu1 }
 0x16e   : > { %v7507_v39 = vld [vmem:[%s8071_s10 + $0x600] ss:$8 sps:$4 sm:$0xff]   ;;  %v7508_v7 = vld [vmem:[%s8071_s10 + $0x294] ss:$8 sps:$4 sm:$0xff]  }
 0x16f   : > { %v8533_v28 = vpop.f32.mrf.mxu0  ;;  %1461 = vmatmul.mubr.bf16.gmra.mxu0 %v7500_v31  ;;  %v8535_v8 = vpop.f32.mrf.mxu1  ;;  %2936 = vmatmul.mubr.bf16.gmra.mxu1 %v7501_v11  ;;  %v7510_v31 = vld [vmem:[%s8071_s10 + $0x614] ss:$8 sps:$4 sm:$0xff]  }
 0x170   : > { %6682 = vmatprep.mubr.msk.bf16.mxu0 %vm947_vm0, %v7502_v44  ;;  %6850 = vmatprep.mubr.msk.bf16.mxu1 %vm947_vm0, %v7504_v40 }
 0x171   : > { %v1272_v43 = vpop.f32.mrf.mxu0  ;;  %v2747_v56 = vpop.f32.mrf.mxu1 }
 0x173   : > { %v8539_v12 = vpop.f32.mrf.mxu0  ;;  %v8541_v27 = vpop.f32.mrf.mxu1 }
 0x175   : > { %v1275_v59 = vpop.f32.mrf.mxu0  ;;  %v2750_v11 = vpop.f32.mrf.mxu1 }
 0x176   : > { %v7513_v59 = vld [vmem:[%s8071_s10 + $0x610] ss:$8 sps:$4 sm:$0xff]   ;;  %v7514_v11 = vld [vmem:[%s8071_s10 + $0x2a4] ss:$8 sps:$4 sm:$0xff]  }
 0x177   : > { %v8547_v48 = vpop.f32.mrf.mxu0  ;;  %1469 = vmatmul.mubr.bf16.gmra.mxu0 %v7506_v60  ;;  %v8549_v44 = vpop.f32.mrf.mxu1  ;;  %2944 = vmatmul.mubr.bf16.gmra.mxu1 %v7507_v39  ;;  %v7516_v60 = vld [vmem:[%s8071_s10 + $0x624] ss:$8 sps:$4 sm:$0xff]  }
 0x178   : > { %6683 = vmatprep.mubr.msk.bf16.mxu0 %vm947_vm0, %v7508_v7  ;;  %6851 = vmatprep.mubr.msk.bf16.mxu1 %vm947_vm0, %v7510_v31 }
 0x179   : > { %v1280_v40 = vpop.f32.mrf.mxu0  ;;  %v2755_v43 = vpop.f32.mrf.mxu1 }
 0x17b   : > { %v8553_v56 = vpop.f32.mrf.mxu0  ;;  %v8555_v47 = vpop.f32.mrf.mxu1 }
 0x17d   : > { %v1283_v29 = vpop.f32.mrf.mxu0  ;;  %v2758_v39 = vpop.f32.mrf.mxu1 }
 0x17e   : > { %v7519_v29 = vld [vmem:[%s8071_s10 + $0x620] ss:$8 sps:$4 sm:$0xff]   ;;  %v7520_v39 = vld [vmem:[%s8071_s10 + $0x2b4] ss:$8 sps:$4 sm:$0xff]  }
 0x17f   : > { %v8561_v20 = vpop.f32.mrf.mxu0  ;;  %1477 = vmatmul.mubr.bf16.gmra.mxu0 %v7512_v30  ;;  %v8563_v7 = vpop.f32.mrf.mxu1  ;;  %2952 = vmatmul.mubr.bf16.gmra.mxu1 %v7513_v59  ;;  %v7522_v30 = vld [vmem:[%s8071_s10 + $0x634] ss:$8 sps:$4 sm:$0xff]  }
 0x180   : > { %6684 = vmatprep.mubr.msk.bf16.mxu0 %vm947_vm0, %v7514_v11  ;;  %6852 = vmatprep.mubr.msk.bf16.mxu1 %vm947_vm0, %v7516_v60 }
 0x181   : > { %v1288_v31 = vpop.f32.mrf.mxu0  ;;  %v2763_v40 = vpop.f32.mrf.mxu1 }
 0x183   : > { %v8567_v43 = vpop.f32.mrf.mxu0  ;;  %v8569_v19 = vpop.f32.mrf.mxu1 }
 0x185   : > { %v1291_v3 = vpop.f32.mrf.mxu0  ;;  %v2766_v59 = vpop.f32.mrf.mxu1 }
 0x186   : > { %v7525_v3 = vld [vmem:[%s8071_s10 + $0x630] ss:$8 sps:$4 sm:$0xff]   ;;  %v7526_v59 = vld [vmem:[%s8071_s10 + $0x2c4] ss:$8 sps:$4 sm:$0xff]  }
 0x187   : > { %v8575_v58 = vpop.f32.mrf.mxu0  ;;  %1485 = vmatmul.mubr.bf16.gmra.mxu0 %v7518_v4  ;;  %v8577_v11 = vpop.f32.mrf.mxu1  ;;  %2960 = vmatmul.mubr.bf16.gmra.mxu1 %v7519_v29  ;;  %v7528_v4 = vld [vmem:[%s8071_s10 + $0x644] ss:$8 sps:$4 sm:$0xff]  }
 0x188   : > { %6685 = vmatprep.mubr.msk.bf16.mxu0 %vm947_vm0, %v7520_v39  ;;  %6853 = vmatprep.mubr.msk.bf16.mxu1 %vm947_vm0, %v7522_v30 }
 0x189   : > { %v1296_v60 = vpop.f32.mrf.mxu0  ;;  %v2771_v31 = vpop.f32.mrf.mxu1 }
 0x18b   : > { %v8581_v40 = vpop.f32.mrf.mxu0  ;;  %v8583_v57 = vpop.f32.mrf.mxu1 }
 0x18d   : > { %v1299_v41 = vpop.f32.mrf.mxu0  ;;  %v2774_v29 = vpop.f32.mrf.mxu1 }
 0x18e   : > { %v7531_v41 = vld [vmem:[%s8071_s10 + $0x640] ss:$8 sps:$4 sm:$0xff]   ;;  %v7532_v29 = vld [vmem:[%s8071_s10 + $0x2d4] ss:$8 sps:$4 sm:$0xff]  }
 0x18f   : > { %v8589_v36 = vpop.f32.mrf.mxu0  ;;  %1493 = vmatmul.mubr.bf16.gmra.mxu0 %v7524_v42  ;;  %v8591_v39 = vpop.f32.mrf.mxu1  ;;  %2968 = vmatmul.mubr.bf16.gmra.mxu1 %v7525_v3  ;;  %v7534_v42 = vld [vmem:[%s8071_s10 + $0x654] ss:$8 sps:$4 sm:$0xff]  }
 0x190   : > { %6686 = vmatprep.mubr.msk.bf16.mxu0 %vm947_vm0, %v7526_v59  ;;  %6854 = vmatprep.mubr.msk.bf16.mxu1 %vm947_vm0, %v7528_v4 }
 0x191   : > { %v1304_v30 = vpop.f32.mrf.mxu0  ;;  %v2779_v60 = vpop.f32.mrf.mxu1 }
 0x193   : > { %v8595_v31 = vpop.f32.mrf.mxu0  ;;  %v8597_v35 = vpop.f32.mrf.mxu1 }
 0x195   : > { %v1307_v23 = vpop.f32.mrf.mxu0  ;;  %v2782_v3 = vpop.f32.mrf.mxu1 }
 0x196   : > { %v7537_v23 = vld [vmem:[%s8071_s10 + $0x650] ss:$8 sps:$4 sm:$0xff]   ;;  %v7538_v3 = vld [vmem:[%s8071_s10 + $0x2e4] ss:$8 sps:$4 sm:$0xff]  }
 0x197   : > { %v8603_v18 = vpop.f32.mrf.mxu0  ;;  %1501 = vmatmul.mubr.bf16.gmra.mxu0 %v7530_v24  ;;  %v8605_v59 = vpop.f32.mrf.mxu1  ;;  %2976 = vmatmul.mubr.bf16.gmra.mxu1 %v7531_v41  ;;  %v7540_v24 = vld [vmem:[%s8071_s10 + $0x664] ss:$8 sps:$4 sm:$0xff]  }
 0x198   : > { %10235 = vst [vmem:[#allocation34_spill] sm:$0xff] %v8605_v59  ;;  %6687 = vmatprep.mubr.msk.bf16.mxu0 %vm947_vm0, %v7532_v29  ;;  %6855 = vmatprep.mubr.msk.bf16.mxu1 %vm947_vm0, %v7534_v42  ;;  %v7579_v59 = vld [vmem:[%s8071_s10 + $0x6c0] ss:$8 sps:$4 sm:$0xff]  }
 0x199   : > { %v1312_v4 = vpop.f32.mrf.mxu0  ;;  %v2787_v30 = vpop.f32.mrf.mxu1 }
 0x19b   : > { %v8609_v60 = vpop.f32.mrf.mxu0  ;;  %v8611_v17 = vpop.f32.mrf.mxu1 }
 0x19c   : > { %10236 = vst [vmem:[#allocation35_spill] sm:$0xff] %v8609_v60  ;;  %10237 = vst [vmem:[#allocation36_spill] sm:$0xff] %v8611_v17  ;;  %v7542_v60 = vld [vmem:[%s8071_s10 + $0x2e0] ss:$8 sps:$4 sm:$0xff]  }
 0x19d   : > { %v1315_v5 = vpop.f32.mrf.mxu0  ;;  %v2790_v41 = vpop.f32.mrf.mxu1 }
 0x19e   : > { %v7543_v5 = vld [vmem:[%s8071_s10 + $0x660] ss:$8 sps:$4 sm:$0xff]   ;;  %v7544_v41 = vld [vmem:[%s8071_s10 + $0x2f4] ss:$8 sps:$4 sm:$0xff]  }
 0x19f   : > { %v8617_v0 = vpop.f32.mrf.mxu0  ;;  %1509 = vmatmul.mubr.bf16.gmra.mxu0 %v7536_v6  ;;  %v8619_v29 = vpop.f32.mrf.mxu1  ;;  %2984 = vmatmul.mubr.bf16.gmra.mxu1 %v7537_v23  ;;  %v7546_v6 = vld [vmem:[%s8071_s10 + $0x674] ss:$8 sps:$4 sm:$0xff]  }
 0x1a0   : > { %10238 = vst [vmem:[#allocation37_spill] sm:$0xff] %v8617_v0  ;;  %10239 = vst [vmem:[#allocation38_spill] sm:$0xff] %v8619_v29  ;;  %6688 = vmatprep.mubr.msk.bf16.mxu0 %vm947_vm0, %v7538_v3  ;;  %6856 = vmatprep.mubr.msk.bf16.mxu1 %vm947_vm0, %v7540_v24 }
 0x1a1   : > { %v1320_v42 = vpop.f32.mrf.mxu0  ;;  %v2795_v4 = vpop.f32.mrf.mxu1 }
 0x1a3   : > { %v8623_v30 = vpop.f32.mrf.mxu0  ;;  %v8625_v17 = vpop.f32.mrf.mxu1 }
 0x1a4   : > { %10240 = vst [vmem:[#allocation39_spill] sm:$0xff] %v8623_v30  ;;  %10241 = vst [vmem:[#allocation40_spill] sm:$0xff] %v8625_v17  ;;  %v7548_v30 = vld [vmem:[%s8071_s10 + $0x2f0] ss:$8 sps:$4 sm:$0xff]  }
 0x1a5   : > { %v1323_v29 = vpop.f32.mrf.mxu0  ;;  %v2798_v23 = vpop.f32.mrf.mxu1 }
 0x1a6   : > { %v7549_v29 = vld [vmem:[%s8071_s10 + $0x670] ss:$8 sps:$4 sm:$0xff]   ;;  %v7550_v23 = vld [vmem:[%s8071_s10 + $0x304] ss:$8 sps:$4 sm:$0xff]  }
 0x1a7   : > { %v8631_v0 = vpop.f32.mrf.mxu0  ;;  %1517 = vmatmul.mubr.bf16.gmra.mxu0 %v7542_v60  ;;  %v8633_v3 = vpop.f32.mrf.mxu1  ;;  %2992 = vmatmul.mubr.bf16.gmra.mxu1 %v7543_v5  ;;  %v7552_v60 = vld [vmem:[%s8071_s10 + $0x684] ss:$8 sps:$4 sm:$0xff]  }
 0x1a8   : > { %10242 = vst [vmem:[#allocation41_spill] sm:$0xff] %v8631_v0  ;;  %10243 = vst [vmem:[#allocation42_spill] sm:$0xff] %v8633_v3  ;;  %6689 = vmatprep.mubr.msk.bf16.mxu0 %vm947_vm0, %v7544_v41  ;;  %6857 = vmatprep.mubr.msk.bf16.mxu1 %vm947_vm0, %v7546_v6 }
 0x1a9   : > { %v1328_v24 = vpop.f32.mrf.mxu0  ;;  %v2803_v42 = vpop.f32.mrf.mxu1 }
 0x1ab   : > { %v8637_v4 = vpop.f32.mrf.mxu0  ;;  %v8639_v17 = vpop.f32.mrf.mxu1 }
 0x1ac   : > { %10244 = vst [vmem:[#allocation43_spill] sm:$0xff] %v8637_v4  ;;  %10245 = vst [vmem:[#allocation44_spill] sm:$0xff] %v8639_v17  ;;  %v7554_v4 = vld [vmem:[%s8071_s10 + $0x300] ss:$8 sps:$4 sm:$0xff]  }
 0x1ad   : > { %v1331_v3 = vpop.f32.mrf.mxu0  ;;  %v2806_v5 = vpop.f32.mrf.mxu1 }
 0x1ae   : > { %v7555_v3 = vld [vmem:[%s8071_s10 + $0x680] ss:$8 sps:$4 sm:$0xff]   ;;  %v7556_v5 = vld [vmem:[%s8071_s10 + $0x314] ss:$8 sps:$4 sm:$0xff]  }
 0x1af   : > { %v8645_v0 = vpop.f32.mrf.mxu0  ;;  %1525 = vmatmul.mubr.bf16.gmra.mxu0 %v7548_v30  ;;  %v8647_v41 = vpop.f32.mrf.mxu1  ;;  %3000 = vmatmul.mubr.bf16.gmra.mxu1 %v7549_v29  ;;  %v7558_v30 = vld [vmem:[%s8071_s10 + $0x694] ss:$8 sps:$4 sm:$0xff]  }
 0x1b0   : > { %10246 = vst [vmem:[#allocation45_spill] sm:$0xff] %v8645_v0  ;;  %10247 = vst [vmem:[#allocation46_spill] sm:$0xff] %v8647_v41  ;;  %6690 = vmatprep.mubr.msk.bf16.mxu0 %vm947_vm0, %v7550_v23  ;;  %6858 = vmatprep.mubr.msk.bf16.mxu1 %vm947_vm0, %v7552_v60 }
 0x1b1   : > { %v1336_v6 = vpop.f32.mrf.mxu0  ;;  %v2811_v24 = vpop.f32.mrf.mxu1 }
 0x1b3   : > { %v8651_v42 = vpop.f32.mrf.mxu0  ;;  %v8653_v17 = vpop.f32.mrf.mxu1 }
 0x1b4   : > { %10248 = vst [vmem:[#allocation47_spill] sm:$0xff] %v8651_v42  ;;  %10249 = vst [vmem:[#allocation48_spill] sm:$0xff] %v8653_v17  ;;  %v7560_v42 = vld [vmem:[%s8071_s10 + $0x310] ss:$8 sps:$4 sm:$0xff]  }
 0x1b5   : > { %v1339_v41 = vpop.f32.mrf.mxu0  ;;  %v2814_v29 = vpop.f32.mrf.mxu1 }
 0x1b6   : > { %v7561_v41 = vld [vmem:[%s8071_s10 + $0x690] ss:$8 sps:$4 sm:$0xff]   ;;  %v7562_v29 = vld [vmem:[%s8071_s10 + $0x324] ss:$8 sps:$4 sm:$0xff]  }
 0x1b7   : > { %v8659_v0 = vpop.f32.mrf.mxu0  ;;  %1533 = vmatmul.mubr.bf16.gmra.mxu0 %v7554_v4  ;;  %v8661_v23 = vpop.f32.mrf.mxu1  ;;  %3008 = vmatmul.mubr.bf16.gmra.mxu1 %v7555_v3  ;;  %v7564_v4 = vld [vmem:[%s8071_s10 + $0x6a4] ss:$8 sps:$4 sm:$0xff]  }
 0x1b8   : > { %10250 = vst [vmem:[#allocation49_spill] sm:$0xff] %v8659_v0  ;;  %10251 = vst [vmem:[#allocation50_spill] sm:$0xff] %v8661_v23  ;;  %6691 = vmatprep.mubr.msk.bf16.mxu0 %vm947_vm0, %v7556_v5  ;;  %6859 = vmatprep.mubr.msk.bf16.mxu1 %vm947_vm0, %v7558_v30 }
 0x1b9   : > { %v1344_v60 = vpop.f32.mrf.mxu0  ;;  %v2819_v6 = vpop.f32.mrf.mxu1 }
 0x1bb   : > { %v8665_v24 = vpop.f32.mrf.mxu0  ;;  %v8667_v17 = vpop.f32.mrf.mxu1 }
 0x1bc   : > { %10252 = vst [vmem:[#allocation51_spill] sm:$0xff] %v8665_v24  ;;  %10253 = vst [vmem:[#allocation52_spill] sm:$0xff] %v8667_v17  ;;  %v7566_v24 = vld [vmem:[%s8071_s10 + $0x320] ss:$8 sps:$4 sm:$0xff]  }
 0x1bd   : > { %v1347_v23 = vpop.f32.mrf.mxu0  ;;  %v2822_v3 = vpop.f32.mrf.mxu1 }
 0x1be   : > { %v7567_v23 = vld [vmem:[%s8071_s10 + $0x6a0] ss:$8 sps:$4 sm:$0xff]   ;;  %v7568_v3 = vld [vmem:[%s8071_s10 + $0x334] ss:$8 sps:$4 sm:$0xff]  }
 0x1bf   : > { %v8673_v0 = vpop.f32.mrf.mxu0  ;;  %1541 = vmatmul.mubr.bf16.gmra.mxu0 %v7560_v42  ;;  %v8675_v5 = vpop.f32.mrf.mxu1  ;;  %3016 = vmatmul.mubr.bf16.gmra.mxu1 %v7561_v41  ;;  %v7570_v42 = vld [vmem:[%s8071_s10 + $0x6b4] ss:$8 sps:$4 sm:$0xff]  }
 0x1c0   : > { %10254 = vst [vmem:[#allocation53_spill] sm:$0xff] %v8673_v0  ;;  %10255 = vst [vmem:[#allocation54_spill] sm:$0xff] %v8675_v5  ;;  %6692 = vmatprep.mubr.msk.bf16.mxu0 %vm947_vm0, %v7562_v29  ;;  %6860 = vmatprep.mubr.msk.bf16.mxu1 %vm947_vm0, %v7564_v4 }
 0x1c1   : > { %v1352_v30 = vpop.f32.mrf.mxu0  ;;  %v2827_v60 = vpop.f32.mrf.mxu1 }
 0x1c3   : > { %v8679_v6 = vpop.f32.mrf.mxu0  ;;  %v8681_v17 = vpop.f32.mrf.mxu1 }
 0x1c4   : > { %10256 = vst [vmem:[#allocation55_spill] sm:$0xff] %v8679_v6  ;;  %10257 = vst [vmem:[#allocation56_spill] sm:$0xff] %v8681_v17  ;;  %v7572_v6 = vld [vmem:[%s8071_s10 + $0x330] ss:$8 sps:$4 sm:$0xff]  }
 0x1c5   : > { %v1355_v5 = vpop.f32.mrf.mxu0  ;;  %v2830_v41 = vpop.f32.mrf.mxu1 }
 0x1c6   : > { %v7573_v5 = vld [vmem:[%s8071_s10 + $0x6b0] ss:$8 sps:$4 sm:$0xff]   ;;  %v7574_v41 = vld [vmem:[%s8071_s10 + $0x344] ss:$8 sps:$4 sm:$0xff]  }
 0x1c7   : > { %v8687_v0 = vpop.f32.mrf.mxu0  ;;  %1549 = vmatmul.mubr.bf16.gmra.mxu0 %v7566_v24  ;;  %v8689_v29 = vpop.f32.mrf.mxu1  ;;  %3024 = vmatmul.mubr.bf16.gmra.mxu1 %v7567_v23  ;;  %v7576_v24 = vld [vmem:[%s8071_s10 + $0x6c4] ss:$8 sps:$4 sm:$0xff]  }
 0x1c8   : > { %10258 = vst [vmem:[#allocation57_spill] sm:$0xff] %v8687_v0  ;;  %10259 = vst [vmem:[#allocation58_spill] sm:$0xff] %v8689_v29  ;;  %6693 = vmatprep.mubr.msk.bf16.mxu0 %vm947_vm0, %v7568_v3  ;;  %6861 = vmatprep.mubr.msk.bf16.mxu1 %vm947_vm0, %v7570_v42 }
 0x1c9   : > { %v1360_v4 = vpop.f32.mrf.mxu0  ;;  %v2835_v30 = vpop.f32.mrf.mxu1 }
 0x1cb   : > { %v8693_v60 = vpop.f32.mrf.mxu0  ;;  %v8695_v17 = vpop.f32.mrf.mxu1 }
 0x1cc   : > { %10260 = vst [vmem:[#allocation59_spill] sm:$0xff] %v8693_v60  ;;  %10261 = vst [vmem:[#allocation60_spill] sm:$0xff] %v8695_v17  ;;  %v7578_v60 = vld [vmem:[%s8071_s10 + $0x340] ss:$8 sps:$4 sm:$0xff]  }
 0x1cd   : > { %v1363_v29 = vpop.f32.mrf.mxu0  ;;  %v2838_v23 = vpop.f32.mrf.mxu1 }
 0x1ce   : > { %v7580_v29 = vld [vmem:[%s8071_s10 + $0x354] ss:$8 sps:$4 sm:$0xff]  }
 0x1cf   : > { %v8701_v0 = vpop.f32.mrf.mxu0  ;;  %1557 = vmatmul.mubr.bf16.gmra.mxu0 %v7572_v6  ;;  %v8703_v3 = vpop.f32.mrf.mxu1  ;;  %3032 = vmatmul.mubr.bf16.gmra.mxu1 %v7573_v5  ;;  %v7582_v23 = vld [vmem:[%s8071_s10 + $0x6d4] ss:$8 sps:$4 sm:$0xff]   ;;  %v1597_v6 = vmax.f32 %v8323_v49, %v8519_v15  ;;  %v3072_v5 = vmax.f32 %v8325_v50, %v8521_v55  ;;  %v1598_v50 = vmax.f32 %v8329_v53, %v8525_v16 }
 0x1d0   : > { %10262 = vst [vmem:[#allocation61_spill] sm:$0xff] %v8701_v0  ;;  %6694 = vmatprep.mubr.msk.bf16.mxu0 %vm947_vm0, %v7574_v41  ;;  %6862 = vmatprep.mubr.msk.bf16.mxu1 %vm947_vm0, %v7576_v24  ;;  %v3074_v53 = vmax.f32 %v8339_v62, %v8535_v8  ;;  %v1600_v62 = vmax.f32 %v8343_v1, %v8539_v12 }
 0x1d1   : > { %v1368_v42 = vpop.f32.mrf.mxu0  ;;  %v2843_v4 = vpop.f32.mrf.mxu1  ;;  %v3075_v8 = vmax.f32 %v8345_v2, %v8541_v27  ;;  %v3076_v1 = vmax.f32 %v8353_v10, %v8549_v44  ;;  %v1602_v10 = vmax.f32 %v8357_v13, %v8553_v56  ;;  %v3077_v44 = vmax.f32 %v8359_v14, %v8555_v47 }
 0x1d2   : > { %v3078_v13 = vmax.f32 %v8367_v22, %v8563_v7  ;;  %v1604_v22 = vmax.f32 %v8371_v25, %v8567_v43  ;;  %v3079_v7 = vmax.f32 %v8373_v26, %v8569_v19  ;;  %v3080_v25 = vmax.f32 %v8381_v34, %v8577_v11 }
 0x1d3   : > { %v8707_v30 = vpop.f32.mrf.mxu0  ;;  %v8709_v17 = vpop.f32.mrf.mxu1  ;;  %v1606_v34 = vmax.f32 %v8385_v37, %v8581_v40  ;;  %v3081_v11 = vmax.f32 %v8387_v38, %v8583_v57  ;;  %v3082_v37 = vmax.f32 %v8395_v46, %v8591_v39  ;;  %v1608_v46 = vmax.f32 %v8399_v51, %v8595_v31  ;;  %v10265_v51 = vld [vmem:[#allocation3_spill] sm:$0xff] }
 0x1d4   : > { %v3083_v39 = vmax.f32 %v8401_v52, %v8597_v35 }
 0x1d5   : > { %v1371_v63 = vpop.f32.mrf.mxu0  ;;  %v2846_v0 = vpop.f32.mrf.mxu1 }
 0x1d6   : > { %v3073_v0 = vmax.f32 %v8331_v54, %v8527_v32 }
 0x1d7   : > { %v1374_v41 = vpop.f32.mrf.mxu0  ;;  %1565 = vmatmul.mubr.bf16.gmra.mxu0 %v7578_v60  ;;  %v2849_v24 = vpop.f32.mrf.mxu1  ;;  %3040 = vmatmul.mubr.bf16.gmra.mxu1 %v7579_v59  ;;  %v7584_v59 = vld [vmem:[%s8071_s10 + $0x350] ss:$8 sps:$4 sm:$0xff]  }
 0x1d8   : > { %v8719_v42 = vmax.f32 %v1597_v6, %v1374_v41  ;;  %v8721_v4 = vmax.f32 %v3072_v5, %v2849_v24  ;;  %6695 = vmatprep.mubr.msk.bf16.mxu0 %vm947_vm0, %v7580_v29  ;;  %6863 = vmatprep.mubr.msk.bf16.mxu1 %vm947_vm0, %v7582_v23  ;;  %v7585_v60 = vld [vmem:[%s8071_s10 + $0x6d0] ss:$8 sps:$4 sm:$0xff]   ;;  %v7586_v41 = vld [vmem:[%s8071_s10 + $0x364] ss:$8 sps:$4 sm:$0xff]  }
 0x1d9   : > { %v1376_v49 = vpop.f32.mrf.mxu0  ;;  %v2851_v63 = vpop.f32.mrf.mxu1  ;;  %v7588_v29 = vld [vmem:[%s8071_s10 + $0x6e4] ss:$8 sps:$4 sm:$0xff]  }
 0x1da   : > { %v1599_v49 = vmax.f32 %v8337_v61, %v8533_v28 }
 0x1db   : > { %v1377_v15 = vpop.f32.mrf.mxu0  ;;  %v2852_v55 = vpop.f32.mrf.mxu1 }
 0x1dc   : > { %v8731_v6 = vmax.f32 %v1598_v50, %v1377_v15  ;;  %v8733_v5 = vmax.f32 %v3073_v0, %v2852_v55  ;;  %v7590_v15 = vld [vmem:[%s8071_s10 + $0x360] ss:$8 sps:$4 sm:$0xff]  }
 0x1dd   : > { %v1379_v24 = vpop.f32.mrf.mxu0  ;;  %v2854_v23 = vpop.f32.mrf.mxu1  ;;  %v7591_v55 = vld [vmem:[%s8071_s10 + $0x6e0] ss:$8 sps:$4 sm:$0xff]  }
 0x1de   : > { %v7592_v24 = vld [vmem:[%s8071_s10 + $0x374] ss:$8 sps:$4 sm:$0xff]  }
 0x1df   : > { %v1382_v54 = vpop.f32.mrf.mxu0  ;;  %1573 = vmatmul.mubr.bf16.gmra.mxu0 %v7584_v59  ;;  %v2857_v32 = vpop.f32.mrf.mxu1  ;;  %3048 = vmatmul.mubr.bf16.gmra.mxu1 %v7585_v60 }
 0x1e0   : > { %v8741_v16 = vmax.f32 %v1599_v49, %v1382_v54  ;;  %v8743_v63 = vmax.f32 %v3074_v53, %v2857_v32  ;;  %6696 = vmatprep.mubr.msk.bf16.mxu0 %vm947_vm0, %v7586_v41  ;;  %6864 = vmatprep.mubr.msk.bf16.mxu1 %vm947_vm0, %v7588_v29  ;;  %v7594_v41 = vld [vmem:[%s8071_s10 + $0x6f4] ss:$8 sps:$4 sm:$0xff]   ;;  %v1601_v49 = vmax.f32 %v8351_v9, %v8547_v48 }
 0x1e1   : > { %v1384_v61 = vpop.f32.mrf.mxu0  ;;  %v2859_v28 = vpop.f32.mrf.mxu1 }
 0x1e2   : > { %v7596_v61 = vld [vmem:[%s8071_s10 + $0x370] ss:$8 sps:$4 sm:$0xff]  }
 0x1e3   : > { %v1385_v50 = vpop.f32.mrf.mxu0  ;;  %v2860_v0 = vpop.f32.mrf.mxu1  ;;  %v7597_v28 = vld [vmem:[%s8071_s10 + $0x6f0] ss:$8 sps:$4 sm:$0xff]  }
 0x1e4   : > { %v8753_v59 = vmax.f32 %v1600_v62, %v1385_v50  ;;  %v8755_v60 = vmax.f32 %v3075_v8, %v2860_v0  ;;  %v7600_v50 = vld [vmem:[%s8071_s10 + $0x704] ss:$8 sps:$4 sm:$0xff]  }
 0x1e5   : > { %v1387_v23 = vpop.f32.mrf.mxu0  ;;  %v2862_v29 = vpop.f32.mrf.mxu1  ;;  %v7603_v0 = vld [vmem:[%s8071_s10 + $0xa84] ss:$8 sps:$4 sm:$0xff]  }
 0x1e7   : > { %v1390_v2 = vpop.f32.mrf.mxu0  ;;  %1581 = vmatmul.mubr.bf16.gmra.mxu0 %v7590_v15  ;;  %v2865_v27 = vpop.f32.mrf.mxu1  ;;  %3056 = vmatmul.mubr.bf16.gmra.mxu1 %v7591_v55 }
 0x1e8   : > { %v8763_v12 = vmax.f32 %v1601_v49, %v1390_v2  ;;  %v8765_v53 = vmax.f32 %v3076_v1, %v2865_v27  ;;  %6697 = vmatprep.mubr.msk.bf16.mxu0 %vm947_vm0, %v7592_v24  ;;  %6865 = vmatprep.mubr.msk.bf16.mxu1 %vm947_vm0, %v7594_v41  ;;  %v1603_v24 = vmax.f32 %v8365_v21, %v8561_v20  ;;  %v7598_v49 = vld [vmem:[%s8071_s10 + $0x700] ss:$8 sps:$4 sm:$0xff]  }
 0x1e9   : > { %v1392_v9 = vpop.f32.mrf.mxu0  ;;  %v2867_v48 = vpop.f32.mrf.mxu1  ;;  %v7601_v1 = vld [vmem:[%s8071_s10 + $0xa80] ss:$8 sps:$4 sm:$0xff]  }
 0x1ea   : > { %v7604_v9 = vld [vmem:[%s8071_s10 + $0x714] ss:$8 sps:$4 sm:$0xff]  }
 0x1eb   : > { %v1393_v54 = vpop.f32.mrf.mxu0  ;;  %v2868_v32 = vpop.f32.mrf.mxu1  ;;  %v7606_v48 = vld [vmem:[%s8071_s10 + $0xa94] ss:$8 sps:$4 sm:$0xff]  }
 0x1ec   : > { %v8775_v62 = vmax.f32 %v1602_v10, %v1393_v54  ;;  %v8777_v8 = vmax.f32 %v3077_v44, %v2868_v32  ;;  %v1605_v54 = vmax.f32 %v8379_v33, %v8575_v58 }
 0x1ed   : > { %v1395_v15 = vpop.f32.mrf.mxu0  ;;  %v2870_v55 = vpop.f32.mrf.mxu1 }
 0x1ef   : > { %v1398_v14 = vpop.f32.mrf.mxu0  ;;  %1589 = vmatmul.mubr.bf16.gmra.mxu0 %v7596_v61  ;;  %v2873_v47 = vpop.f32.mrf.mxu1  ;;  %3064 = vmatmul.mubr.bf16.gmra.mxu1 %v7597_v28 }
 0x1f0   : > { %v8785_v56 = vmax.f32 %v1603_v24, %v1398_v14  ;;  %v8787_v41 = vmax.f32 %v3078_v13, %v2873_v47  ;;  %6978 = vmatprep.mubr.msk.bf16.mxu0 %vm947_vm0, %v7600_v50  ;;  %7146 = vmatprep.mubr.msk.bf16.mxu1 %vm947_vm0, %v7603_v0  ;;  %v7608_v50 = vld [vmem:[%s8071_s10 + $0x710] ss:$8 sps:$4 sm:$0xff]   ;;  %v7610_v24 = vld [vmem:[%s8071_s10 + $0x724] ss:$8 sps:$4 sm:$0xff]  }
 0x1f1   : > { %v1400_v21 = vpop.f32.mrf.mxu0  ;;  %v2875_v20 = vpop.f32.mrf.mxu1  ;;  %v7609_v0 = vld [vmem:[%s8071_s10 + $0xa90] ss:$8 sps:$4 sm:$0xff]   ;;  %v7612_v13 = vld [vmem:[%s8071_s10 + $0xaa4] ss:$8 sps:$4 sm:$0xff]  }
 0x1f2   : > { %v1607_v21 = vmax.f32 %v8393_v45, %v8589_v36 }
 0x1f3   : > { %v1401_v23 = vpop.f32.mrf.mxu0  ;;  %v2876_v29 = vpop.f32.mrf.mxu1 }
 0x1f4   : > { %v8797_v2 = vmax.f32 %v1604_v22, %v1401_v23  ;;  %v8799_v27 = vmax.f32 %v3079_v7, %v2876_v29  ;;  %v7614_v23 = vld [vmem:[%s8071_s10 + $0x720] ss:$8 sps:$4 sm:$0xff]  }
 0x1f5   : > { %v1403_v10 = vpop.f32.mrf.mxu0  ;;  %v2878_v44 = vpop.f32.mrf.mxu1  ;;  %v7615_v29 = vld [vmem:[%s8071_s10 + $0xaa0] ss:$8 sps:$4 sm:$0xff]  }
 0x1f7   : > { %v1406_v26 = vpop.f32.mrf.mxu0  ;;  %v2881_v19 = vpop.f32.mrf.mxu1  ;;  %4113 = vmatmul.mubr.bf16.vlgmr.msra.gmra.mxu0 %v7598_v49  ;;  %5602 = vmatmul.mubr.bf16.vlgmr.msra.gmra.mxu1 %v7601_v1 }
 0x1f8   : > { %v8807_v43 = vmax.f32 %v1605_v54, %v1406_v26  ;;  %v8809_v32 = vmax.f32 %v3080_v25, %v2881_v19  ;;  %6979 = vmatprep.mubr.msk.bf16.mxu0 %vm947_vm0, %v7604_v9  ;;  %7147 = vmatprep.mubr.msk.bf16.mxu1 %vm947_vm0, %v7606_v48  ;;  %v7616_v9 = vld [vmem:[%s8071_s10 + $0x734] ss:$8 sps:$4 sm:$0xff]  }
 0x1f9   : > { %v1408_v33 = vpop.f32.mrf.mxu0  ;;  %v2883_v58 = vpop.f32.mrf.mxu1  ;;  %v7618_v48 = vld [vmem:[%s8071_s10 + $0xab4] ss:$8 sps:$4 sm:$0xff]  }
 0x1fa   : > { %v10263_v54 = vld [vmem:[#allocation2_spill] sm:$0xff] }
 0x1fb   : > { %v1409_v61 = vpop.f32.mrf.mxu0  ;;  %v2884_v28 = vpop.f32.mrf.mxu1  ;;  %v1609_v25 = vmax.f32 %v10263_v54, %v8603_v18  ;;  %v10264_v26 = vld [vmem:[#allocation34_spill] sm:$0xff] }
 0x1fc   : > { %v8819_v15 = vmax.f32 %v1606_v34, %v1409_v61  ;;  %v8821_v55 = vmax.f32 %v3081_v11, %v2884_v28  ;;  %v3084_v31 = vmax.f32 %v10265_v51, %v10264_v26  ;;  %v10266_v34 = vld [vmem:[#allocation35_spill] sm:$0xff]  ;;  %v10267_v11 = vld [vmem:[#allocation4_spill] sm:$0xff] }
 0x1fd   : > { %v1411_v14 = vpop.f32.mrf.mxu0  ;;  %v2886_v47 = vpop.f32.mrf.mxu1  ;;  %v1610_v61 = vmax.f32 %v10267_v11, %v10266_v34  ;;  %v10268_v28 = vld [vmem:[#allocation36_spill] sm:$0xff]  ;;  %v10274_v26 = vld [vmem:[#allocation39_spill] sm:$0xff] }
 0x1fe   : > { %v7620_v14 = vld [vmem:[%s8071_s10 + $0x730] ss:$8 sps:$4 sm:$0xff]   ;;  %v10275_v51 = vld [vmem:[#allocation8_spill] sm:$0xff] }
 0x1ff   : > { %v1414_v38 = vpop.f32.mrf.mxu0  ;;  %v2889_v57 = vpop.f32.mrf.mxu1  ;;  %4121 = vmatmul.mubr.bf16.gmra.mxu0 %v7608_v50  ;;  %5610 = vmatmul.mubr.bf16.gmra.mxu1 %v7609_v0  ;;  %v10269_v50 = vld [vmem:[#allocation5_spill] sm:$0xff]  ;;  %v7621_v47 = vld [vmem:[%s8071_s10 + $0xab0] ss:$8 sps:$4 sm:$0xff]  }
 0x200   : > { %v8829_v40 = vmax.f32 %v1607_v21, %v1414_v38  ;;  %v8831_v20 = vmax.f32 %v3082_v37, %v2889_v57  ;;  %6980 = vmatprep.mubr.msk.bf16.mxu0 %vm947_vm0, %v7610_v24  ;;  %7148 = vmatprep.mubr.msk.bf16.mxu1 %vm947_vm0, %v7612_v13  ;;  %v3085_v0 = vmax.f32 %v10269_v50, %v10268_v28  ;;  %v7622_v38 = vld [vmem:[%s8071_s10 + $0x744] ss:$8 sps:$4 sm:$0xff]   ;;  %v7626_v11 = vld [vmem:[%s8071_s10 + $0x740] ss:$8 sps:$4 sm:$0xff]  }
 0x201   : > { %v1416_v45 = vpop.f32.mrf.mxu0  ;;  %v2891_v36 = vpop.f32.mrf.mxu1  ;;  %v7624_v57 = vld [vmem:[%s8071_s10 + $0xac4] ss:$8 sps:$4 sm:$0xff]  }
 0x203   : > { %v1417_v22 = vpop.f32.mrf.mxu0  ;;  %v2892_v7 = vpop.f32.mrf.mxu1 }
 0x204   : > { %v8841_v49 = vmax.f32 %v1608_v46, %v1417_v22  ;;  %v8843_v1 = vmax.f32 %v3083_v39, %v2892_v7  ;;  %v10270_v46 = vld [vmem:[#allocation37_spill] sm:$0xff]  ;;  %v10271_v39 = vld [vmem:[#allocation6_spill] sm:$0xff] }
 0x205   : > { %v1419_v10 = vpop.f32.mrf.mxu0  ;;  %v2894_v44 = vpop.f32.mrf.mxu1  ;;  %v1611_v22 = vmax.f32 %v10271_v39, %v10270_v46  ;;  %v10272_v7 = vld [vmem:[#allocation38_spill] sm:$0xff] }
 0x207   : > { %v1422_v52 = vpop.f32.mrf.mxu0  ;;  %v2897_v35 = vpop.f32.mrf.mxu1  ;;  %4129 = vmatmul.mubr.bf16.gmra.mxu0 %v7614_v23  ;;  %5618 = vmatmul.mubr.bf16.gmra.mxu1 %v7615_v29  ;;  %v10273_v23 = vld [vmem:[#allocation7_spill] sm:$0xff] }
 0x208   : > { %v8851_v19 = vmax.f32 %v1609_v25, %v1422_v52  ;;  %v8853_v33 = vmax.f32 %v3084_v31, %v2897_v35  ;;  %6981 = vmatprep.mubr.msk.bf16.mxu0 %vm947_vm0, %v7616_v9  ;;  %7149 = vmatprep.mubr.msk.bf16.mxu1 %vm947_vm0, %v7618_v48  ;;  %v3086_v29 = vmax.f32 %v10273_v23, %v10272_v7  ;;  %v10276_v52 = vld [vmem:[#allocation40_spill] sm:$0xff]  ;;  %v10277_v35 = vld [vmem:[#allocation9_spill] sm:$0xff] }
 0x209   : > { %v1424_v18 = vpop.f32.mrf.mxu0  ;;  %v2899_v58 = vpop.f32.mrf.mxu1  ;;  %v1612_v31 = vmax.f32 %v10275_v51, %v10274_v26  ;;  %v10284_v26 = vld [vmem:[#allocation44_spill] sm:$0xff]  ;;  %v10285_v51 = vld [vmem:[#allocation13_spill] sm:$0xff] }
 0x20a   : > { %v3087_v18 = vmax.f32 %v10277_v35, %v10276_v52 }
 0x20b   : > { %v1425_v24 = vpop.f32.mrf.mxu0  ;;  %v2900_v13 = vpop.f32.mrf.mxu1 }
 0x20c   : > { %v8863_v21 = vmax.f32 %v1610_v61, %v1425_v24  ;;  %v8865_v37 = vmax.f32 %v3085_v0, %v2900_v13  ;;  %v7627_v61 = vld [vmem:[%s8071_s10 + $0xac0] ss:$8 sps:$4 sm:$0xff]   ;;  %v7628_v0 = vld [vmem:[%s8071_s10 + $0x754] ss:$8 sps:$4 sm:$0xff]  }
 0x20d   : > { %v1427_v45 = vpop.f32.mrf.mxu0  ;;  %v2902_v36 = vpop.f32.mrf.mxu1  ;;  %v7630_v24 = vld [vmem:[%s8071_s10 + $0xad4] ss:$8 sps:$4 sm:$0xff]  }
 0x20e   : > { %v10280_v45 = vld [vmem:[#allocation42_spill] sm:$0xff]  ;;  %v10281_v36 = vld [vmem:[#allocation11_spill] sm:$0xff] }
 0x20f   : > { %v1430_v9 = vpop.f32.mrf.mxu0  ;;  %v2905_v48 = vpop.f32.mrf.mxu1  ;;  %4137 = vmatmul.mubr.bf16.gmra.mxu0 %v7620_v14  ;;  %5626 = vmatmul.mubr.bf16.gmra.mxu1 %v7621_v47  ;;  %v10278_v47 = vld [vmem:[#allocation41_spill] sm:$0xff]  ;;  %v3088_v46 = vmax.f32 %v10281_v36, %v10280_v45  ;;  %v10289_v45 = vld [vmem:[#allocation15_spill] sm:$0xff] }
 0x210   : > { %v8873_v10 = vmax.f32 %v1611_v22, %v1430_v9  ;;  %v8875_v44 = vmax.f32 %v3086_v29, %v2905_v48  ;;  %6982 = vmatprep.mubr.msk.bf16.mxu0 %vm947_vm0, %v7622_v38  ;;  %7150 = vmatprep.mubr.msk.bf16.mxu1 %vm947_vm0, %v7624_v57  ;;  %v10279_v38 = vld [vmem:[#allocation10_spill] sm:$0xff]  ;;  %v10282_v48 = vld [vmem:[#allocation43_spill] sm:$0xff] }
 0x211   : > { %v1432_v54 = vpop.f32.mrf.mxu0  ;;  %v2907_v25 = vpop.f32.mrf.mxu1  ;;  %v1613_v57 = vmax.f32 %v10279_v38, %v10278_v47  ;;  %v10287_v47 = vld [vmem:[#allocation14_spill] sm:$0xff] }
 0x212   : > { %v10283_v54 = vld [vmem:[#allocation12_spill] sm:$0xff] }
 0x213   : > { %v1433_v58 = vpop.f32.mrf.mxu0  ;;  %v2908_v34 = vpop.f32.mrf.mxu1  ;;  %v1614_v25 = vmax.f32 %v10283_v54, %v10282_v48  ;;  %v10290_v54 = vld [vmem:[#allocation47_spill] sm:$0xff] }
 0x214   : > { %v8885_v28 = vmax.f32 %v1612_v31, %v1433_v58  ;;  %v8887_v50 = vmax.f32 %v3087_v18, %v2908_v34  ;;  %v3089_v31 = vmax.f32 %v10285_v51, %v10284_v26  ;;  %v7632_v18 = vld [vmem:[%s8071_s10 + $0x750] ss:$8 sps:$4 sm:$0xff]   ;;  %v10292_v51 = vld [vmem:[#allocation48_spill] sm:$0xff] }
 0x215   : > { %v1435_v13 = vpop.f32.mrf.mxu0  ;;  %v2910_v14 = vpop.f32.mrf.mxu1  ;;  %v7633_v58 = vld [vmem:[%s8071_s10 + $0xad0] ss:$8 sps:$4 sm:$0xff]  }
 0x216   : > { %v10286_v14 = vld [vmem:[#allocation45_spill] sm:$0xff] }
 0x217   : > { %v1438_v39 = vpop.f32.mrf.mxu0  ;;  %v2913_v22 = vpop.f32.mrf.mxu1  ;;  %4145 = vmatmul.mubr.bf16.gmra.mxu0 %v7626_v11  ;;  %5634 = vmatmul.mubr.bf16.gmra.mxu1 %v7627_v61  ;;  %v7634_v61 = vld [vmem:[%s8071_s10 + $0x764] ss:$8 sps:$4 sm:$0xff]   ;;  %v1615_v38 = vmax.f32 %v10287_v47, %v10286_v14  ;;  %v7640_v47 = vld [vmem:[%s8071_s10 + $0x774] ss:$8 sps:$4 sm:$0xff]  }
 0x218   : > { %v8895_v7 = vmax.f32 %v1613_v57, %v1438_v39  ;;  %v8897_v23 = vmax.f32 %v3088_v46, %v2913_v22  ;;  %6983 = vmatprep.mubr.msk.bf16.mxu0 %vm947_vm0, %v7628_v0  ;;  %7151 = vmatprep.mubr.msk.bf16.mxu1 %vm947_vm0, %v7630_v24  ;;  %v7636_v0 = vld [vmem:[%s8071_s10 + $0xae4] ss:$8 sps:$4 sm:$0xff]   ;;  %v10288_v57 = vld [vmem:[#allocation46_spill] sm:$0xff] }
 0x219   : > { %v1440_v29 = vpop.f32.mrf.mxu0  ;;  %v2915_v9 = vpop.f32.mrf.mxu1  ;;  %v3090_v36 = vmax.f32 %v10289_v45, %v10288_v57  ;;  %v10294_v57 = vld [vmem:[#allocation49_spill] sm:$0xff]  ;;  %v10295_v45 = vld [vmem:[#allocation18_spill] sm:$0xff] }
 0x21b   : > { %v1441_v52 = vpop.f32.mrf.mxu0  ;;  %v2916_v35 = vpop.f32.mrf.mxu1 }
 0x21c   : > { %v8907_v34 = vmax.f32 %v1614_v25, %v1441_v52  ;;  %v8909_v11 = vmax.f32 %v3089_v31, %v2916_v35  ;;  %v10291_v25 = vld [vmem:[#allocation16_spill] sm:$0xff]  ;;  %v10293_v31 = vld [vmem:[#allocation17_spill] sm:$0xff] }
 0x21d   : > { %v1443_v13 = vpop.f32.mrf.mxu0  ;;  %v2918_v24 = vpop.f32.mrf.mxu1  ;;  %v1616_v26 = vmax.f32 %v10291_v25, %v10290_v54  ;;  %v3091_v52 = vmax.f32 %v10293_v31, %v10292_v51 }
 0x21e   : > { %v7639_v13 = vld [vmem:[%s8071_s10 + $0xae0] ss:$8 sps:$4 sm:$0xff]  }
 0x21f   : > { %v1446_v46 = vpop.f32.mrf.mxu0  ;;  %v2921_v39 = vpop.f32.mrf.mxu1  ;;  %4153 = vmatmul.mubr.bf16.gmra.mxu0 %v7632_v18  ;;  %5642 = vmatmul.mubr.bf16.gmra.mxu1 %v7633_v58  ;;  %v7638_v58 = vld [vmem:[%s8071_s10 + $0x760] ss:$8 sps:$4 sm:$0xff]  }
 0x220   : > { %v8917_v22 = vmax.f32 %v1615_v38, %v1446_v46  ;;  %v8919_v29 = vmax.f32 %v3090_v36, %v2921_v39  ;;  %6984 = vmatprep.mubr.msk.bf16.mxu0 %vm947_vm0, %v7634_v61  ;;  %7152 = vmatprep.mubr.msk.bf16.mxu1 %vm947_vm0, %v7636_v0  ;;  %v7642_v61 = vld [vmem:[%s8071_s10 + $0xaf4] ss:$8 sps:$4 sm:$0xff]   ;;  %v1617_v36 = vmax.f32 %v10295_v45, %v10294_v57 }
 0x221   : > { %v1448_v9 = vpop.f32.mrf.mxu0  ;;  %v2923_v48 = vpop.f32.mrf.mxu1  ;;  %v10296_v46 = vld [vmem:[#allocation50_spill] sm:$0xff]  ;;  %v10297_v39 = vld [vmem:[#allocation19_spill] sm:$0xff] }
 0x222   : > { %v3092_v9 = vmax.f32 %v10297_v39, %v10296_v46  ;;  %v7645_v46 = vld [vmem:[%s8071_s10 + $0xaf0] ss:$8 sps:$4 sm:$0xff]  }
 0x223   : > { %v1449_v35 = vpop.f32.mrf.mxu0  ;;  %v2924_v18 = vpop.f32.mrf.mxu1 }
 0x224   : > { %v8929_v24 = vmax.f32 %v1616_v26, %v1449_v35  ;;  %v8931_v14 = vmax.f32 %v3091_v52, %v2924_v18  ;;  %v10299_v52 = vld [vmem:[#allocation51_spill] sm:$0xff]  ;;  %v10300_v35 = vld [vmem:[#allocation20_spill] sm:$0xff] }
 0x225   : > { %v1451_v38 = vpop.f32.mrf.mxu0  ;;  %v2926_v0 = vpop.f32.mrf.mxu1  ;;  %v1618_v18 = vmax.f32 %v10300_v35, %v10299_v52  ;;  %v10308_v52 = vld [vmem:[#allocation23_spill] sm:$0xff] }
 0x226   : > { %v10301_v38 = vld [vmem:[#allocation52_spill] sm:$0xff]  ;;  %v10302_v0 = vld [vmem:[#allocation21_spill] sm:$0xff] }
 0x227   : > { %v1454_v48 = vpop.f32.mrf.mxu0  ;;  %v2929_v54 = vpop.f32.mrf.mxu1  ;;  %4161 = vmatmul.mubr.bf16.gmra.mxu0 %v7638_v58  ;;  %5650 = vmatmul.mubr.bf16.gmra.mxu1 %v7639_v13  ;;  %v3093_v57 = vmax.f32 %v10302_v0, %v10301_v38  ;;  %v7644_v13 = vld [vmem:[%s8071_s10 + $0x770] ss:$8 sps:$4 sm:$0xff]  }
 0x228   : > { %v8939_v25 = vmax.f32 %v1617_v36, %v1454_v48  ;;  %v8941_v26 = vmax.f32 %v3092_v9, %v2929_v54  ;;  %6985 = vmatprep.mubr.msk.bf16.mxu0 %vm947_vm0, %v7640_v47  ;;  %7153 = vmatprep.mubr.msk.bf16.mxu1 %vm947_vm0, %v7642_v61  ;;  %v7646_v9 = vld [vmem:[%s8071_s10 + $0x784] ss:$8 sps:$4 sm:$0xff]  }
 0x229   : > { %v1456_v51 = vpop.f32.mrf.mxu0  ;;  %v2931_v31 = vpop.f32.mrf.mxu1  ;;  %v7648_v47 = vld [vmem:[%s8071_s10 + $0xb04] ss:$8 sps:$4 sm:$0xff]  }
 0x22a   : > { %10298 = vst [vmem:[#allocation2_spill] sm:$0xff] %v8941_v26  ;;  %v10305_v54 = vld [vmem:[#allocation53_spill] sm:$0xff]  ;;  %v10306_v51 = vld [vmem:[#allocation22_spill] sm:$0xff] }
 0x22b   : > { %v1457_v58 = vpop.f32.mrf.mxu0  ;;  %v2932_v45 = vpop.f32.mrf.mxu1  ;;  %v1619_v31 = vmax.f32 %v10306_v51, %v10305_v54  ;;  %v10307_v26 = vld [vmem:[#allocation54_spill] sm:$0xff]  ;;  %v10313_v54 = vld [vmem:[#allocation56_spill] sm:$0xff]  ;;  %v10314_v51 = vld [vmem:[#allocation25_spill] sm:$0xff] }
 0x22c   : > { %v8951_v36 = vmax.f32 %v1618_v18, %v1457_v58  ;;  %v8953_v39 = vmax.f32 %v3093_v57, %v2932_v45  ;;  %v3094_v35 = vmax.f32 %v10308_v52, %v10307_v26  ;;  %v3095_v52 = vmax.f32 %v10314_v51, %v10313_v54 }
 0x22d   : > { %v1459_v48 = vpop.f32.mrf.mxu0  ;;  %v2934_v61 = vpop.f32.mrf.mxu1 }
 0x22e   : > { %10303 = vst [vmem:[#allocation34_spill] sm:$0xff] %v8951_v36  ;;  %10304 = vst [vmem:[#allocation3_spill] sm:$0xff] %v8953_v39  ;;  %v10311_v48 = vld [vmem:[#allocation55_spill] sm:$0xff]  ;;  %v10312_v61 = vld [vmem:[#allocation24_spill] sm:$0xff] }
 0x22f   : > { %v1462_v38 = vpop.f32.mrf.mxu0  ;;  %v2937_v0 = vpop.f32.mrf.mxu1  ;;  %4169 = vmatmul.mubr.bf16.gmra.mxu0 %v7644_v13  ;;  %5658 = vmatmul.mubr.bf16.gmra.mxu1 %v7645_v46  ;;  %v1620_v26 = vmax.f32 %v10312_v61, %v10311_v48  ;;  %v7650_v46 = vld [vmem:[%s8071_s10 + $0x780] ss:$8 sps:$4 sm:$0xff]   ;;  %v10320_v48 = vld [vmem:[#allocation27_spill] sm:$0xff] }
 0x230   : > { %v8961_v18 = vmax.f32 %v1619_v31, %v1462_v38  ;;  %v8963_v57 = vmax.f32 %v3094_v35, %v2937_v0  ;;  %6986 = vmatprep.mubr.msk.bf16.mxu0 %vm947_vm0, %v7646_v9  ;;  %7154 = vmatprep.mubr.msk.bf16.mxu1 %vm947_vm0, %v7648_v47  ;;  %v7651_v36 = vld [vmem:[%s8071_s10 + $0xb00] ss:$8 sps:$4 sm:$0xff]   ;;  %v7652_v38 = vld [vmem:[%s8071_s10 + $0x794] ss:$8 sps:$4 sm:$0xff]  }
 0x231   : > { %v1464_v58 = vpop.f32.mrf.mxu0  ;;  %v2939_v45 = vpop.f32.mrf.mxu1  ;;  %v7654_v9 = vld [vmem:[%s8071_s10 + $0xb14] ss:$8 sps:$4 sm:$0xff]  }
 0x232   : > { %10309 = vst [vmem:[#allocation35_spill] sm:$0xff] %v8961_v18  ;;  %10310 = vst [vmem:[#allocation4_spill] sm:$0xff] %v8963_v57  ;;  %v10317_v58 = vld [vmem:[#allocation57_spill] sm:$0xff]  ;;  %v10318_v45 = vld [vmem:[#allocation26_spill] sm:$0xff] }
 0x233   : > { %v1465_v13 = vpop.f32.mrf.mxu0  ;;  %v2940_v39 = vpop.f32.mrf.mxu1  ;;  %v1621_v57 = vmax.f32 %v10318_v45, %v10317_v58  ;;  %v10319_v18 = vld [vmem:[#allocation58_spill] sm:$0xff]  ;;  %v10324_v58 = vld [vmem:[#allocation60_spill] sm:$0xff]  ;;  %v10325_v45 = vld [vmem:[#allocation29_spill] sm:$0xff] }
 0x234   : > { %v8973_v31 = vmax.f32 %v1620_v26, %v1465_v13  ;;  %v8975_v35 = vmax.f32 %v3095_v52, %v2940_v39  ;;  %v3096_v61 = vmax.f32 %v10320_v48, %v10319_v18  ;;  %v3097_v48 = vmax.f32 %v10325_v45, %v10324_v58 }
 0x235   : > { %v1467_v0 = vpop.f32.mrf.mxu0  ;;  %v2942_v47 = vpop.f32.mrf.mxu1 }
 0x236   : > { %10315 = vst [vmem:[#allocation36_spill] sm:$0xff] %v8973_v31  ;;  %10316 = vst [vmem:[#allocation5_spill] sm:$0xff] %v8975_v35  ;;  %v10322_v0 = vld [vmem:[#allocation59_spill] sm:$0xff]  ;;  %v10323_v47 = vld [vmem:[#allocation28_spill] sm:$0xff] }
 0x237   : > { %v1470_v54 = vpop.f32.mrf.mxu0  ;;  %v2945_v51 = vpop.f32.mrf.mxu1  ;;  %4177 = vmatmul.mubr.bf16.gmra.mxu0 %v7650_v46  ;;  %5666 = vmatmul.mubr.bf16.gmra.mxu1 %v7651_v36  ;;  %v1622_v18 = vmax.f32 %v10323_v47, %v10322_v0  ;;  %v7656_v36 = vld [vmem:[%s8071_s10 + $0x790] ss:$8 sps:$4 sm:$0xff]  }
 0x238   : > { %v8983_v39 = vmax.f32 %v1621_v57, %v1470_v54  ;;  %v8985_v26 = vmax.f32 %v3096_v61, %v2945_v51  ;;  %6987 = vmatprep.mubr.msk.bf16.mxu0 %vm947_vm0, %v7652_v38  ;;  %7155 = vmatprep.mubr.msk.bf16.mxu1 %vm947_vm0, %v7654_v9  ;;  %v7657_v31 = vld [vmem:[%s8071_s10 + $0xb10] ss:$8 sps:$4 sm:$0xff]   ;;  %v7658_v54 = vld [vmem:[%s8071_s10 + $0x7a4] ss:$8 sps:$4 sm:$0xff]  }
 0x239   : > { %v1472_v52 = vpop.f32.mrf.mxu0  ;;  %v2947_v13 = vpop.f32.mrf.mxu1  ;;  %v7660_v38 = vld [vmem:[%s8071_s10 + $0xb24] ss:$8 sps:$4 sm:$0xff]   ;;  %v10328_v0 = vld [vmem:[#allocation31_spill] sm:$0xff] }
 0x23a   : > { %10321 = vst [vmem:[#allocation37_spill] sm:$0xff] %v8985_v26  ;;  %v10326_v52 = vld [vmem:[#allocation61_spill] sm:$0xff]  ;;  %v10327_v13 = vld [vmem:[#allocation30_spill] sm:$0xff]  ;;  %v3098_v47 = vmax.f32 %v10328_v0, %v8703_v3 }
 0x23b   : > { %v1473_v46 = vpop.f32.mrf.mxu0  ;;  %v2948_v35 = vpop.f32.mrf.mxu1  ;;  %v1623_v26 = vmax.f32 %v10327_v13, %v10326_v52  ;;  %v7663_v0 = vld [vmem:[%s8071_s10 + $0xb20] ss:$8 sps:$4 sm:$0xff]  }
 0x23c   : > { %v8995_v57 = vmax.f32 %v1622_v18, %v1473_v46  ;;  %v8997_v61 = vmax.f32 %v3097_v48, %v2948_v35 }
 0x23d   : > { %v1475_v51 = vpop.f32.mrf.mxu0  ;;  %v2950_v9 = vpop.f32.mrf.mxu1 }
 0x23e   : > { %v10329_v51 = vld [vmem:[#allocation32_spill] sm:$0xff]  ;;  %v10330_v9 = vld [vmem:[#allocation33_spill] sm:$0xff] }
 0x23f   : > { %v1478_v58 = vpop.f32.mrf.mxu0  ;;  %v2953_v45 = vpop.f32.mrf.mxu1  ;;  %4185 = vmatmul.mubr.bf16.gmra.mxu0 %v7656_v36  ;;  %5674 = vmatmul.mubr.bf16.gmra.mxu1 %v7657_v31  ;;  %v1624_v3 = vmax.f32 %v10329_v51, %v8707_v30  ;;  %v3099_v52 = vmax.f32 %v10330_v9, %v8709_v17  ;;  %v7662_v31 = vld [vmem:[%s8071_s10 + $0x7a0] ss:$8 sps:$4 sm:$0xff]  }
 0x240   : > { %v9005_v35 = vmax.f32 %v1623_v26, %v1478_v58  ;;  %v9007_v18 = vmax.f32 %v3098_v47, %v2953_v45  ;;  %6988 = vmatprep.mubr.msk.bf16.mxu0 %vm947_vm0, %v7658_v54  ;;  %7156 = vmatprep.mubr.msk.bf16.mxu1 %vm947_vm0, %v7660_v38  ;;  %v7664_v58 = vld [vmem:[%s8071_s10 + $0x7b4] ss:$8 sps:$4 sm:$0xff]  }
 0x241   : > { %v1480_v48 = vpop.f32.mrf.mxu0  ;;  %v2955_v46 = vpop.f32.mrf.mxu1  ;;  %v7666_v54 = vld [vmem:[%s8071_s10 + $0xb34] ss:$8 sps:$4 sm:$0xff]  }
 0x243   : > { %v1481_v36 = vpop.f32.mrf.mxu0  ;;  %v2956_v13 = vpop.f32.mrf.mxu1 }
 0x244   : > { %v9017_v26 = vmax.f32 %v1624_v3, %v1481_v36  ;;  %v9019_v47 = vmax.f32 %v3099_v52, %v2956_v13  ;;  %v7668_v36 = vld [vmem:[%s8071_s10 + $0x7b0] ss:$8 sps:$4 sm:$0xff]  }
 0x245   : > { %v1483_v38 = vpop.f32.mrf.mxu0  ;;  %v2958_v45 = vpop.f32.mrf.mxu1  ;;  %v7669_v13 = vld [vmem:[%s8071_s10 + $0xb30] ss:$8 sps:$4 sm:$0xff]  }
 0x246   : > { %10331 = vst [vmem:[#allocation6_spill] sm:$0xff] %v9017_v26  ;;  %10332 = vst [vmem:[#allocation38_spill] sm:$0xff] %v9019_v47 }
 0x247   : > { %v1486_v48 = vpop.f32.mrf.mxu0  ;;  %v2961_v30 = vpop.f32.mrf.mxu1  ;;  %4193 = vmatmul.mubr.bf16.gmra.mxu0 %v7662_v31  ;;  %5682 = vmatmul.mubr.bf16.gmra.mxu1 %v7663_v0  ;;  %v7670_v31 = vld [vmem:[%s8071_s10 + $0x7c4] ss:$8 sps:$4 sm:$0xff]  }
 0x248   : > { %v1653_v17 = vmax.f32 %v8719_v42, %v1486_v48  ;;  %v3128_v46 = vmax.f32 %v8721_v4, %v2961_v30  ;;  %6989 = vmatprep.mubr.msk.bf16.mxu0 %vm947_vm0, %v7664_v58  ;;  %7157 = vmatprep.mubr.msk.bf16.mxu1 %vm947_vm0, %v7666_v54  ;;  %v7672_v0 = vld [vmem:[%s8071_s10 + $0xb44] ss:$8 sps:$4 sm:$0xff]  }
 0x249   : > { %v1488_v51 = vpop.f32.mrf.mxu0  ;;  %v2963_v3 = vpop.f32.mrf.mxu1 }
 0x24a   : > { %v1681_v4 = vsel %vm947_vm0, %v1653_v17, -inf  ;;  %v3156_v58 = vsel %vm947_vm0, %v3128_v46, -inf }
 0x24b   : > { %v1489_v9 = vpop.f32.mrf.mxu0  ;;  %v2964_v52 = vpop.f32.mrf.mxu1 }
 0x24c   : > { %v1654_v38 = vmax.f32 %v8731_v6, %v1489_v9  ;;  %v3129_v45 = vmax.f32 %v8733_v5, %v2964_v52 }
 0x24d   : > { %v1491_v47 = vpop.f32.mrf.mxu0  ;;  %v2966_v42 = vpop.f32.mrf.mxu1 }
 0x24e   : > { %v1682_v54 = vsel %vm947_vm0, %v1654_v38, -inf  ;;  %v3157_v48 = vsel %vm947_vm0, %v3129_v45, -inf }
 0x24f   : > { %v1683_v30 = vmax.f32 %v1681_v4, %v1682_v54  ;;  %v3158_v51 = vmax.f32 %v3156_v58, %v3157_v48  ;;  %v1494_v3 = vpop.f32.mrf.mxu0  ;;  %v2969_v26 = vpop.f32.mrf.mxu1  ;;  %4201 = vmatmul.mubr.bf16.gmra.mxu0 %v7668_v36  ;;  %5690 = vmatmul.mubr.bf16.gmra.mxu1 %v7669_v13  ;;  %v7674_v13 = vld [vmem:[%s8071_s10 + $0x7c0] ss:$8 sps:$4 sm:$0xff]   ;;  %v7678_v54 = vld [vmem:[%s8071_s10 + $0xb54] ss:$8 sps:$4 sm:$0xff]  }
 0x250   : > { %v1655_v6 = vmax.f32 %v8741_v16, %v1494_v3  ;;  %v3130_v5 = vmax.f32 %v8743_v63, %v2969_v26  ;;  %6990 = vmatprep.mubr.msk.bf16.mxu0 %vm947_vm0, %v7670_v31  ;;  %7158 = vmatprep.mubr.msk.bf16.mxu1 %vm947_vm0, %v7672_v0  ;;  %v7675_v4 = vld [vmem:[%s8071_s10 + $0xb40] ss:$8 sps:$4 sm:$0xff]   ;;  %v7676_v63 = vld [vmem:[%s8071_s10 + $0x7d4] ss:$8 sps:$4 sm:$0xff]  }
 0x251   : > { %v1684_v47 = vrot.slane %v1683_v30, 4  ;;  %v3159_v17 = vrot.slane %v3158_v51, 4  ;;  %v1496_v46 = vpop.f32.mrf.mxu0  ;;  %v2971_v9 = vpop.f32.mrf.mxu1 }
 0x252   : > { %v1690_v48 = vsel %vm947_vm0, %v1655_v6, -inf  ;;  %v3165_v3 = vsel %vm947_vm0, %v3130_v5, -inf }
 0x253   : > { %v1685_v52 = vmax.f32 %v1683_v30, %v1684_v47  ;;  %v3160_v38 = vmax.f32 %v3158_v51, %v3159_v17  ;;  %v1497_v45 = vpop.f32.mrf.mxu0  ;;  %v2972_v36 = vpop.f32.mrf.mxu1 }
 0x254   : > { %v1656_v42 = vmax.f32 %v8753_v59, %v1497_v45  ;;  %v3131_v16 = vmax.f32 %v8755_v60, %v2972_v36 }
 0x255   : > { %v1686_v26 = vrot.slane %v1685_v52, 2  ;;  %v3161_v31 = vrot.slane %v3160_v38, 2  ;;  %v1499_v58 = vpop.f32.mrf.mxu0  ;;  %v2974_v0 = vpop.f32.mrf.mxu1 }
 0x256   : > { %v1691_v30 = vsel %vm947_vm0, %v1656_v42, -inf  ;;  %v3166_v51 = vsel %vm947_vm0, %v3131_v16, -inf }
 0x257   : > { %v1687_v47 = vmax.f32 %v1685_v52, %v1686_v26  ;;  %v3162_v17 = vmax.f32 %v3160_v38, %v3161_v31  ;;  %v1692_v59 = vmax.f32 %v1690_v48, %v1691_v30  ;;  %v3167_v46 = vmax.f32 %v3165_v3, %v3166_v51  ;;  %v1502_v60 = vpop.f32.mrf.mxu0  ;;  %v2977_v9 = vpop.f32.mrf.mxu1  ;;  %4209 = vmatmul.mubr.bf16.gmra.mxu0 %v7674_v13  ;;  %v7681_v48 = vld [vmem:[%s8071_s10 + $0xb50] ss:$8 sps:$4 sm:$0xff]   ;;  %v7682_v3 = vld [vmem:[%s8071_s10 + $0x7e4] ss:$8 sps:$4 sm:$0xff]  }
 0x258   : > { %v1657_v45 = vmax.f32 %v8763_v12, %v1502_v60  ;;  %v3132_v36 = vmax.f32 %v8765_v53, %v2977_v9  ;;  %5698 = vmatmul.mubr.bf16.gmra.mxu1 %v7675_v4  ;;  %6991 = vmatprep.mubr.msk.bf16.mxu0 %vm947_vm0, %v7676_v63  ;;  %v7680_v63 = vld [vmem:[%s8071_s10 + $0x7d0] ss:$8 sps:$4 sm:$0xff]  }
 0x259   : > { %v1688_v6 = vrot.slane %v1687_v47, 1  ;;  %v3163_v5 = vrot.slane %v3162_v17, 1  ;;  %v1693_v42 = vrot.slane %v1692_v59, 4  ;;  %v3168_v52 = vrot.slane %v3167_v46, 4  ;;  %v1504_v38 = vpop.f32.mrf.mxu0  ;;  %v2979_v16 = vpop.f32.mrf.mxu1  ;;  %7159 = vmatprep.mubr.msk.bf16.mxu1 %vm947_vm0, %v7678_v54 }
 0x25b   : > { %v9055_v26 = vmax.f32 %v1687_v47, %v1688_v6  ;;  %v9057_v12 = vmax.f32 %v3162_v17, %v3163_v5  ;;  %v1694_v53 = vmax.f32 %v1692_v59, %v1693_v42  ;;  %v3169_v13 = vmax.f32 %v3167_v46, %v3168_v52  ;;  %v1505_v4 = vpop.f32.mrf.mxu0  ;;  %v2980_v31 = vpop.f32.mrf.mxu1  ;;  %v7684_v17 = vld [vmem:[%s8071_s10 + $0xb64] ss:$8 sps:$4 sm:$0xff]  }
 0x25c   : > { %v1658_v58 = vmax.f32 %v8775_v62, %v1505_v4  ;;  %v3133_v0 = vmax.f32 %v8777_v8, %v2980_v31  ;;  %v1699_v59 = vsel %vm947_vm0, %v1657_v45, -inf  ;;  %v3174_v46 = vsel %vm947_vm0, %v3132_v36, -inf }
 0x25d   : > { %10333 = vst [vmem:[#allocation7_spill] sm:$0xff] %v9055_v26  ;;  %10334 = vst [vmem:[#allocation39_spill] sm:$0xff] %v9057_v12  ;;  %v1695_v54 = vrot.slane %v1694_v53, 2  ;;  %v3170_v51 = vrot.slane %v3169_v13, 2  ;;  %v1507_v47 = vpop.f32.mrf.mxu0  ;;  %v2982_v60 = vpop.f32.mrf.mxu1  ;;  %v7830_v26 = vld [vmem:[%s8071_s10 + $0x960] ss:$8 sps:$4 sm:$0xff]  }
 0x25e   : > { %v1700_v9 = vsel %vm947_vm0, %v1658_v58, -inf  ;;  %v3175_v62 = vsel %vm947_vm0, %v3133_v0, -inf  ;;  %v7687_v60 = vld [vmem:[%s8071_s10 + $0xb60] ss:$8 sps:$4 sm:$0xff]  }
 0x25f   : > { %v1696_v6 = vmax.f32 %v1694_v53, %v1695_v54  ;;  %v3171_v8 = vmax.f32 %v3169_v13, %v3170_v51  ;;  %v1701_v5 = vmax.f32 %v1699_v59, %v1700_v9  ;;  %v3176_v42 = vmax.f32 %v3174_v46, %v3175_v62  ;;  %v1510_v52 = vpop.f32.mrf.mxu0  ;;  %v2985_v38 = vpop.f32.mrf.mxu1  ;;  %4217 = vmatmul.mubr.bf16.gmra.mxu0 %v7680_v63  ;;  %v7688_v59 = vld [vmem:[%s8071_s10 + $0x7f4] ss:$8 sps:$4 sm:$0xff]  }
 0x260   : > { %v1659_v16 = vmax.f32 %v8785_v56, %v1510_v52  ;;  %v3134_v4 = vmax.f32 %v8787_v41, %v2985_v38  ;;  %5706 = vmatmul.mubr.bf16.gmra.mxu1 %v7681_v48  ;;  %6992 = vmatprep.mubr.msk.bf16.mxu0 %vm947_vm0, %v7682_v3  ;;  %v7686_v3 = vld [vmem:[%s8071_s10 + $0x7e0] ss:$8 sps:$4 sm:$0xff]   ;;  %v7786_v46 = vld [vmem:[%s8071_s10 + $0xc74] ss:$8 sps:$4 sm:$0xff]  }
 0x261   : > { %v1697_v45 = vrot.slane %v1696_v6, 1  ;;  %v3172_v36 = vrot.slane %v3171_v8, 1  ;;  %v1702_v31 = vrot.slane %v1701_v5, 4  ;;  %v3177_v53 = vrot.slane %v3176_v42, 4  ;;  %v1512_v13 = vpop.f32.mrf.mxu0  ;;  %v2987_v58 = vpop.f32.mrf.mxu1  ;;  %7160 = vmatprep.mubr.msk.bf16.mxu1 %vm947_vm0, %v7684_v17 }
 0x263   : > { %v9075_v0 = vmax.f32 %v1696_v6, %v1697_v45  ;;  %v9077_v56 = vmax.f32 %v3171_v8, %v3172_v36  ;;  %v1703_v41 = vmax.f32 %v1701_v5, %v1702_v31  ;;  %v3178_v63 = vmax.f32 %v3176_v42, %v3177_v53  ;;  %v1513_v48 = vpop.f32.mrf.mxu0  ;;  %v2988_v54 = vpop.f32.mrf.mxu1  ;;  %v7690_v8 = vld [vmem:[%s8071_s10 + $0xb74] ss:$8 sps:$4 sm:$0xff]  }
 0x264   : > { %v1660_v51 = vmax.f32 %v8797_v2, %v1513_v48  ;;  %v3135_v47 = vmax.f32 %v8799_v27, %v2988_v54  ;;  %v1708_v5 = vsel %vm947_vm0, %v1659_v16, -inf  ;;  %v3183_v42 = vsel %vm947_vm0, %v3134_v4, -inf }
 0x265   : > { %10335 = vst [vmem:[#allocation8_spill] sm:$0xff] %v9075_v0  ;;  %10336 = vst [vmem:[#allocation40_spill] sm:$0xff] %v9077_v56  ;;  %v1704_v17 = vrot.slane %v1703_v41, 2  ;;  %v3179_v9 = vrot.slane %v3178_v63, 2  ;;  %v1515_v62 = vpop.f32.mrf.mxu0  ;;  %v2990_v6 = vpop.f32.mrf.mxu1  ;;  %v7826_v56 = vld [vmem:[%s8071_s10 + $0x964] ss:$8 sps:$4 sm:$0xff]  }
 0x266   : > { %v1709_v52 = vsel %vm947_vm0, %v1660_v51, -inf  ;;  %v3184_v2 = vsel %vm947_vm0, %v3135_v47, -inf  ;;  %v7693_v62 = vld [vmem:[%s8071_s10 + $0xb70] ss:$8 sps:$4 sm:$0xff]   ;;  %v7694_v6 = vld [vmem:[%s8071_s10 + $0x804] ss:$8 sps:$4 sm:$0xff]  }
 0x267   : > { %v1705_v38 = vmax.f32 %v1703_v41, %v1704_v17  ;;  %v3180_v27 = vmax.f32 %v3178_v63, %v3179_v9  ;;  %v1710_v45 = vmax.f32 %v1708_v5, %v1709_v52  ;;  %v3185_v36 = vmax.f32 %v3183_v42, %v3184_v2  ;;  %v1518_v31 = vpop.f32.mrf.mxu0  ;;  %v2993_v53 = vpop.f32.mrf.mxu1  ;;  %4225 = vmatmul.mubr.bf16.gmra.mxu0 %v7686_v3  ;;  %v7828_v0 = vld [vmem:[%s8071_s10 + $0xce4] ss:$8 sps:$4 sm:$0xff]  }
 0x268   : > { %v1661_v13 = vmax.f32 %v8807_v43, %v1518_v31  ;;  %v3136_v58 = vmax.f32 %v8809_v32, %v2993_v53  ;;  %5714 = vmatmul.mubr.bf16.gmra.mxu1 %v7687_v60  ;;  %6993 = vmatprep.mubr.msk.bf16.mxu0 %vm947_vm0, %v7688_v59  ;;  %v7692_v59 = vld [vmem:[%s8071_s10 + $0x7f0] ss:$8 sps:$4 sm:$0xff]  }
 0x269   : > { %v1706_v16 = vrot.slane %v1705_v38, 1  ;;  %v3181_v4 = vrot.slane %v3180_v27, 1  ;;  %v1711_v48 = vrot.slane %v1710_v45, 4  ;;  %v3186_v41 = vrot.slane %v3185_v36, 4  ;;  %v1520_v63 = vpop.f32.mrf.mxu0  ;;  %v2995_v54 = vpop.f32.mrf.mxu1  ;;  %7161 = vmatprep.mubr.msk.bf16.mxu1 %vm947_vm0, %v7690_v8 }
 0x26b   : > { %v9095_v51 = vmax.f32 %v1705_v38, %v1706_v16  ;;  %v9097_v43 = vmax.f32 %v3180_v27, %v3181_v4  ;;  %v1712_v32 = vmax.f32 %v1710_v45, %v1711_v48  ;;  %v3187_v3 = vmax.f32 %v3185_v36, %v3186_v41  ;;  %v1521_v47 = vpop.f32.mrf.mxu0  ;;  %v2996_v60 = vpop.f32.mrf.mxu1  ;;  %v7696_v38 = vld [vmem:[%s8071_s10 + $0xb84] ss:$8 sps:$4 sm:$0xff]  }
 0x26c   : > { %v1662_v17 = vmax.f32 %v8819_v15, %v1521_v47  ;;  %v3137_v9 = vmax.f32 %v8821_v55, %v2996_v60  ;;  %v1717_v27 = vsel %vm947_vm0, %v1661_v13, -inf  ;;  %v3192_v45 = vsel %vm947_vm0, %v3136_v58, -inf }
 0x26d   : > { %10337 = vst [vmem:[#allocation9_spill] sm:$0xff] %v9095_v51  ;;  %10338 = vst [vmem:[#allocation41_spill] sm:$0xff] %v9097_v43  ;;  %v1713_v8 = vrot.slane %v1712_v32, 2  ;;  %v3188_v42 = vrot.slane %v3187_v3, 2  ;;  %v1523_v52 = vpop.f32.mrf.mxu0  ;;  %v2998_v2 = vpop.f32.mrf.mxu1  ;;  %v7824_v51 = vld [vmem:[%s8071_s10 + $0x950] ss:$8 sps:$4 sm:$0xff]  }
 0x26e   : > { %v1718_v36 = vsel %vm947_vm0, %v1662_v17, -inf  ;;  %v3193_v15 = vsel %vm947_vm0, %v3137_v9, -inf  ;;  %v7700_v52 = vld [vmem:[%s8071_s10 + $0x814] ss:$8 sps:$4 sm:$0xff]  }
 0x26f   : > { %v1714_v31 = vmax.f32 %v1712_v32, %v1713_v8  ;;  %v3189_v55 = vmax.f32 %v3187_v3, %v3188_v42  ;;  %v1719_v53 = vmax.f32 %v1717_v27, %v1718_v36  ;;  %v3194_v16 = vmax.f32 %v3192_v45, %v3193_v15  ;;  %v1526_v4 = vpop.f32.mrf.mxu0  ;;  %v3001_v48 = vpop.f32.mrf.mxu1  ;;  %4233 = vmatmul.mubr.bf16.gmra.mxu0 %v7692_v59  ;;  %v7699_v42 = vld [vmem:[%s8071_s10 + $0xb80] ss:$8 sps:$4 sm:$0xff]   ;;  %v7702_v15 = vld [vmem:[%s8071_s10 + $0xb94] ss:$8 sps:$4 sm:$0xff]  }
 0x270   : > { %v1663_v41 = vmax.f32 %v8829_v40, %v1526_v4  ;;  %v3138_v63 = vmax.f32 %v8831_v20, %v3001_v48  ;;  %5722 = vmatmul.mubr.bf16.gmra.mxu1 %v7693_v62  ;;  %6994 = vmatprep.mubr.msk.bf16.mxu0 %vm947_vm0, %v7694_v6  ;;  %v7698_v62 = vld [vmem:[%s8071_s10 + $0x800] ss:$8 sps:$4 sm:$0xff]   ;;  %v7784_v2 = vld [vmem:[%s8071_s10 + $0x8f4] ss:$8 sps:$4 sm:$0xff]  }
 0x271   : > { %v1715_v13 = vrot.slane %v1714_v31, 1  ;;  %v3190_v58 = vrot.slane %v3189_v55, 1  ;;  %v1720_v54 = vrot.slane %v1719_v53, 4  ;;  %v3195_v32 = vrot.slane %v3194_v16, 4  ;;  %v1528_v3 = vpop.f32.mrf.mxu0  ;;  %v3003_v47 = vpop.f32.mrf.mxu1  ;;  %7162 = vmatprep.mubr.msk.bf16.mxu1 %vm947_vm0, %v7696_v38 }
 0x273   : > { %v9115_v60 = vmax.f32 %v1714_v31, %v1715_v13  ;;  %v9117_v40 = vmax.f32 %v3189_v55, %v3190_v58  ;;  %v1721_v20 = vmax.f32 %v1719_v53, %v1720_v54  ;;  %v3196_v59 = vmax.f32 %v3194_v16, %v3195_v32  ;;  %v1529_v17 = vpop.f32.mrf.mxu0  ;;  %v3004_v9 = vpop.f32.mrf.mxu1 }
 0x274   : > { %v1664_v6 = vmax.f32 %v8841_v49, %v1529_v17  ;;  %v3139_v8 = vmax.f32 %v8843_v1, %v3004_v9  ;;  %v1726_v31 = vsel %vm947_vm0, %v1663_v41, -inf  ;;  %v3201_v55 = vsel %vm947_vm0, %v3138_v63, -inf }
 0x275   : > { %10339 = vst [vmem:[#allocation10_spill] sm:$0xff] %v9115_v60  ;;  %10340 = vst [vmem:[#allocation42_spill] sm:$0xff] %v9117_v40  ;;  %v1722_v38 = vrot.slane %v1721_v20, 2  ;;  %v3197_v27 = vrot.slane %v3196_v59, 2  ;;  %v1531_v45 = vpop.f32.mrf.mxu0  ;;  %v3006_v36 = vpop.f32.mrf.mxu1  ;;  %v7820_v40 = vld [vmem:[%s8071_s10 + $0x954] ss:$8 sps:$4 sm:$0xff]  }
 0x276   : > { %v1727_v53 = vsel %vm947_vm0, %v1664_v6, -inf  ;;  %v3202_v49 = vsel %vm947_vm0, %v3139_v8, -inf  ;;  %v7704_v8 = vld [vmem:[%s8071_s10 + $0x810] ss:$8 sps:$4 sm:$0xff]  }
 0x277   : > { %v1723_v16 = vmax.f32 %v1721_v20, %v1722_v38  ;;  %v3198_v1 = vmax.f32 %v3196_v59, %v3197_v27  ;;  %v1728_v4 = vmax.f32 %v1726_v31, %v1727_v53  ;;  %v3203_v48 = vmax.f32 %v3201_v55, %v3202_v49  ;;  %v1534_v13 = vpop.f32.mrf.mxu0  ;;  %v3009_v58 = vpop.f32.mrf.mxu1  ;;  %4241 = vmatmul.mubr.bf16.gmra.mxu0 %v7698_v62  ;;  %v7705_v38 = vld [vmem:[%s8071_s10 + $0xb90] ss:$8 sps:$4 sm:$0xff]   ;;  %v7706_v27 = vld [vmem:[%s8071_s10 + $0x824] ss:$8 sps:$4 sm:$0xff]  }
 0x278   : > { %v1665_v54 = vmax.f32 %v8851_v19, %v1534_v13  ;;  %v3140_v32 = vmax.f32 %v8853_v33, %v3009_v58  ;;  %5730 = vmatmul.mubr.bf16.gmra.mxu1 %v7699_v42  ;;  %6995 = vmatprep.mubr.msk.bf16.mxu0 %vm947_vm0, %v7700_v52  ;;  %v7708_v53 = vld [vmem:[%s8071_s10 + $0xba4] ss:$8 sps:$4 sm:$0xff]  }
 0x279   : > { %v1724_v41 = vrot.slane %v1723_v16, 1  ;;  %v3199_v63 = vrot.slane %v3198_v1, 1  ;;  %v1729_v3 = vrot.slane %v1728_v4, 4  ;;  %v3204_v47 = vrot.slane %v3203_v48, 4  ;;  %v1536_v20 = vpop.f32.mrf.mxu0  ;;  %v3011_v59 = vpop.f32.mrf.mxu1  ;;  %7163 = vmatprep.mubr.msk.bf16.mxu1 %vm947_vm0, %v7702_v15 }
 0x27a   : > { %v1735_v49 = vsel %vm947_vm0, %v1665_v54, -inf }
 0x27b   : > { %v9135_v17 = vmax.f32 %v1723_v16, %v1724_v41  ;;  %v9137_v19 = vmax.f32 %v3198_v1, %v3199_v63  ;;  %v1730_v33 = vmax.f32 %v1728_v4, %v1729_v3  ;;  %v3205_v9 = vmax.f32 %v3203_v48, %v3204_v47  ;;  %v1537_v62 = vpop.f32.mrf.mxu0  ;;  %v3012_v6 = vpop.f32.mrf.mxu1 }
 0x27c   : > { %v1666_v42 = vmax.f32 %v8863_v21, %v1537_v62  ;;  %v3141_v52 = vmax.f32 %v8865_v37, %v3012_v6  ;;  %v3210_v16 = vsel %vm947_vm0, %v3140_v32, -inf }
 0x27d   : > { %10341 = vst [vmem:[#allocation11_spill] sm:$0xff] %v9135_v17  ;;  %10342 = vst [vmem:[#allocation43_spill] sm:$0xff] %v9137_v19  ;;  %v1731_v36 = vrot.slane %v1730_v33, 2  ;;  %v3206_v15 = vrot.slane %v3205_v9, 2  ;;  %v1539_v31 = vpop.f32.mrf.mxu0  ;;  %v3014_v55 = vpop.f32.mrf.mxu1  ;;  %v7816_v19 = vld [vmem:[%s8071_s10 + $0xcc4] ss:$8 sps:$4 sm:$0xff]  }
 0x27e   : > { %v1736_v1 = vsel %vm947_vm0, %v1666_v42, -inf  ;;  %v3211_v21 = vsel %vm947_vm0, %v3141_v52, -inf  ;;  %v7710_v42 = vld [vmem:[%s8071_s10 + $0x820] ss:$8 sps:$4 sm:$0xff]  }
 0x27f   : > { %v1732_v4 = vmax.f32 %v1730_v33, %v1731_v36  ;;  %v3207_v37 = vmax.f32 %v3205_v9, %v3206_v15  ;;  %v1737_v48 = vmax.f32 %v1735_v49, %v1736_v1  ;;  %v3212_v13 = vmax.f32 %v3210_v16, %v3211_v21  ;;  %v1542_v58 = vpop.f32.mrf.mxu0  ;;  %v3017_v41 = vpop.f32.mrf.mxu1  ;;  %4249 = vmatmul.mubr.bf16.gmra.mxu0 %v7704_v8  ;;  %v7712_v36 = vld [vmem:[%s8071_s10 + $0x834] ss:$8 sps:$4 sm:$0xff]   ;;  %v7780_v15 = vld [vmem:[%s8071_s10 + $0xc64] ss:$8 sps:$4 sm:$0xff]  }
 0x280   : > { %v1667_v63 = vmax.f32 %v8873_v10, %v1542_v58  ;;  %v3142_v3 = vmax.f32 %v8875_v44, %v3017_v41  ;;  %5738 = vmatmul.mubr.bf16.gmra.mxu1 %v7705_v38  ;;  %6996 = vmatprep.mubr.msk.bf16.mxu0 %vm947_vm0, %v7706_v27  ;;  %v7711_v27 = vld [vmem:[%s8071_s10 + $0xba0] ss:$8 sps:$4 sm:$0xff]   ;;  %v7714_v16 = vld [vmem:[%s8071_s10 + $0xbb4] ss:$8 sps:$4 sm:$0xff]  }
 0x281   : > { %v1733_v54 = vrot.slane %v1732_v4, 1  ;;  %v3208_v32 = vrot.slane %v3207_v37, 1  ;;  %v1738_v47 = vrot.slane %v1737_v48, 4  ;;  %v3213_v20 = vrot.slane %v3212_v13, 4  ;;  %v1544_v59 = vpop.f32.mrf.mxu0  ;;  %v3019_v33 = vpop.f32.mrf.mxu1  ;;  %7164 = vmatprep.mubr.msk.bf16.mxu1 %vm947_vm0, %v7708_v53 }
 0x282   : > { %v1744_v1 = vsel %vm947_vm0, %v1667_v63, -inf  ;;  %v3219_v21 = vsel %vm947_vm0, %v3142_v3, -inf }
 0x283   : > { %v9155_v9 = vmax.f32 %v1732_v4, %v1733_v54  ;;  %v9157_v10 = vmax.f32 %v3207_v37, %v3208_v32  ;;  %v1739_v44 = vmax.f32 %v1737_v48, %v1738_v47  ;;  %v3214_v62 = vmax.f32 %v3212_v13, %v3213_v20  ;;  %v1545_v6 = vpop.f32.mrf.mxu0  ;;  %v3020_v8 = vpop.f32.mrf.mxu1 }
 0x284   : > { %v1668_v52 = vmax.f32 %v8885_v28, %v1545_v6  ;;  %v3143_v38 = vmax.f32 %v8887_v50, %v3020_v8 }
 0x285   : > { %10343 = vst [vmem:[#allocation12_spill] sm:$0xff] %v9155_v9  ;;  %10344 = vst [vmem:[#allocation44_spill] sm:$0xff] %v9157_v10  ;;  %v1740_v31 = vrot.slane %v1739_v44, 2  ;;  %v3215_v55 = vrot.slane %v3214_v62, 2  ;;  %v1547_v53 = vpop.f32.mrf.mxu0  ;;  %v3022_v49 = vpop.f32.mrf.mxu1  ;;  %v7814_v10 = vld [vmem:[%s8071_s10 + $0x944] ss:$8 sps:$4 sm:$0xff]  }
 0x286   : > { %v1745_v4 = vsel %vm947_vm0, %v1668_v52, -inf  ;;  %v3220_v28 = vsel %vm947_vm0, %v3143_v38, -inf }
 0x287   : > { %v1741_v37 = vmax.f32 %v1739_v44, %v1740_v31  ;;  %v3216_v50 = vmax.f32 %v3214_v62, %v3215_v55  ;;  %v1746_v48 = vmax.f32 %v1744_v1, %v1745_v4  ;;  %v3221_v13 = vmax.f32 %v3219_v21, %v3220_v28  ;;  %v1550_v58 = vpop.f32.mrf.mxu0  ;;  %v3025_v41 = vpop.f32.mrf.mxu1  ;;  %4257 = vmatmul.mubr.bf16.gmra.mxu0 %v7710_v42  ;;  %v7716_v42 = vld [vmem:[%s8071_s10 + $0x830] ss:$8 sps:$4 sm:$0xff]   ;;  %v7720_v1 = vld [vmem:[%s8071_s10 + $0xbc4] ss:$8 sps:$4 sm:$0xff]  }
 0x288   : > { %v1669_v54 = vmax.f32 %v8895_v7, %v1550_v58  ;;  %v3144_v32 = vmax.f32 %v8897_v23, %v3025_v41  ;;  %5746 = vmatmul.mubr.bf16.gmra.mxu1 %v7711_v27  ;;  %6997 = vmatprep.mubr.msk.bf16.mxu0 %vm947_vm0, %v7712_v36  ;;  %v7717_v27 = vld [vmem:[%s8071_s10 + $0xbb0] ss:$8 sps:$4 sm:$0xff]   ;;  %v7718_v36 = vld [vmem:[%s8071_s10 + $0x844] ss:$8 sps:$4 sm:$0xff]  }
 0x289   : > { %v1742_v63 = vrot.slane %v1741_v37, 1  ;;  %v3217_v3 = vrot.slane %v3216_v50, 1  ;;  %v1747_v47 = vrot.slane %v1746_v48, 4  ;;  %v3222_v20 = vrot.slane %v3221_v13, 4  ;;  %v1552_v59 = vpop.f32.mrf.mxu0  ;;  %v3027_v33 = vpop.f32.mrf.mxu1  ;;  %7165 = vmatprep.mubr.msk.bf16.mxu1 %vm947_vm0, %v7714_v16 }
 0x28a   : > { %v1753_v21 = vsel %vm947_vm0, %v1669_v54, -inf  ;;  %v3228_v4 = vsel %vm947_vm0, %v3144_v32, -inf }
 0x28b   : > { %v9175_v44 = vmax.f32 %v1741_v37, %v1742_v63  ;;  %v9177_v7 = vmax.f32 %v3216_v50, %v3217_v3  ;;  %v1748_v23 = vmax.f32 %v1746_v48, %v1747_v47  ;;  %v3223_v62 = vmax.f32 %v3221_v13, %v3222_v20  ;;  %v1553_v6 = vpop.f32.mrf.mxu0  ;;  %v3028_v8 = vpop.f32.mrf.mxu1 }
 0x28c   : > { %v1670_v52 = vmax.f32 %v8907_v34, %v1553_v6  ;;  %v3145_v38 = vmax.f32 %v8909_v11, %v3028_v8  ;;  %v7722_v8 = vld [vmem:[%s8071_s10 + $0x840] ss:$8 sps:$4 sm:$0xff]  }
 0x28d   : > { %10345 = vst [vmem:[#allocation13_spill] sm:$0xff] %v9175_v44  ;;  %10346 = vst [vmem:[#allocation45_spill] sm:$0xff] %v9177_v7  ;;  %v1749_v55 = vrot.slane %v1748_v23, 2  ;;  %v3224_v53 = vrot.slane %v3223_v62, 2  ;;  %v1555_v49 = vpop.f32.mrf.mxu0  ;;  %v3030_v16 = vpop.f32.mrf.mxu1  ;;  %v7810_v7 = vld [vmem:[%s8071_s10 + $0xcb4] ss:$8 sps:$4 sm:$0xff]  }
 0x28e   : > { %v1754_v28 = vsel %vm947_vm0, %v1670_v52, -inf  ;;  %v3229_v34 = vsel %vm947_vm0, %v3145_v38, -inf  ;;  %v7723_v38 = vld [vmem:[%s8071_s10 + $0xbc0] ss:$8 sps:$4 sm:$0xff]  }
 0x28f   : > { %v1750_v37 = vmax.f32 %v1748_v23, %v1749_v55  ;;  %v3225_v11 = vmax.f32 %v3223_v62, %v3224_v53  ;;  %v1755_v50 = vmax.f32 %v1753_v21, %v1754_v28  ;;  %v3230_v48 = vmax.f32 %v3228_v4, %v3229_v34  ;;  %v1558_v13 = vpop.f32.mrf.mxu0  ;;  %v3033_v58 = vpop.f32.mrf.mxu1  ;;  %4265 = vmatmul.mubr.bf16.gmra.mxu0 %v7716_v42 }
 0x290   : > { %v1671_v41 = vmax.f32 %v8917_v22, %v1558_v13  ;;  %v3146_v63 = vmax.f32 %v8919_v29, %v3033_v58  ;;  %5754 = vmatmul.mubr.bf16.gmra.mxu1 %v7717_v27  ;;  %6998 = vmatprep.mubr.msk.bf16.mxu0 %vm947_vm0, %v7718_v36  ;;  %v7724_v27 = vld [vmem:[%s8071_s10 + $0x854] ss:$8 sps:$4 sm:$0xff]   ;;  %v7778_v36 = vld [vmem:[%s8071_s10 + $0x8e4] ss:$8 sps:$4 sm:$0xff]  }
 0x291   : > { %v1751_v54 = vrot.slane %v1750_v37, 1  ;;  %v3226_v32 = vrot.slane %v3225_v11, 1  ;;  %v1756_v3 = vrot.slane %v1755_v50, 4  ;;  %v3231_v47 = vrot.slane %v3230_v48, 4  ;;  %v1560_v20 = vpop.f32.mrf.mxu0  ;;  %v3035_v59 = vpop.f32.mrf.mxu1  ;;  %7166 = vmatprep.mubr.msk.bf16.mxu1 %vm947_vm0, %v7720_v1  ;;  %v7726_v1 = vld [vmem:[%s8071_s10 + $0xbd4] ss:$8 sps:$4 sm:$0xff]  }
 0x292   : > { %v1762_v21 = vsel %vm947_vm0, %v1671_v41, -inf  ;;  %v3237_v4 = vsel %vm947_vm0, %v3146_v63, -inf  ;;  %v10349_v58 = vld [vmem:[#allocation2_spill] sm:$0xff] }
 0x293   : > { %v9195_v33 = vmax.f32 %v1750_v37, %v1751_v54  ;;  %v9197_v22 = vmax.f32 %v3225_v11, %v3226_v32  ;;  %v1757_v29 = vmax.f32 %v1755_v50, %v1756_v3  ;;  %v3232_v23 = vmax.f32 %v3230_v48, %v3231_v47  ;;  %v1561_v62 = vpop.f32.mrf.mxu0  ;;  %v3036_v6 = vpop.f32.mrf.mxu1 }
 0x294   : > { %v1672_v42 = vmax.f32 %v8929_v24, %v1561_v62  ;;  %v3147_v52 = vmax.f32 %v8931_v14, %v3036_v6 }
 0x295   : > { %10347 = vst [vmem:[#allocation14_spill] sm:$0xff] %v9195_v33  ;;  %10348 = vst [vmem:[#allocation46_spill] sm:$0xff] %v9197_v22  ;;  %v1758_v55 = vrot.slane %v1757_v29, 2  ;;  %v3233_v53 = vrot.slane %v3232_v23, 2  ;;  %v1563_v49 = vpop.f32.mrf.mxu0  ;;  %v3038_v16 = vpop.f32.mrf.mxu1  ;;  %v7808_v22 = vld [vmem:[%s8071_s10 + $0x934] ss:$8 sps:$4 sm:$0xff]  }
 0x296   : > { %v1763_v28 = vsel %vm947_vm0, %v1672_v42, -inf  ;;  %v3238_v24 = vsel %vm947_vm0, %v3147_v52, -inf  ;;  %v10352_v42 = vld [vmem:[#allocation34_spill] sm:$0xff] }
 0x297   : > { %v1759_v34 = vmax.f32 %v1757_v29, %v1758_v55  ;;  %v3234_v14 = vmax.f32 %v3232_v23, %v3233_v53  ;;  %v1764_v37 = vmax.f32 %v1762_v21, %v1763_v28  ;;  %v3239_v11 = vmax.f32 %v3237_v4, %v3238_v24  ;;  %v1566_v50 = vpop.f32.mrf.mxu0  ;;  %v3041_v48 = vpop.f32.mrf.mxu1  ;;  %4273 = vmatmul.mubr.bf16.gmra.mxu0 %v7722_v8  ;;  %v7728_v8 = vld [vmem:[%s8071_s10 + $0x850] ss:$8 sps:$4 sm:$0xff]   ;;  %v7730_v53 = vld [vmem:[%s8071_s10 + $0x864] ss:$8 sps:$4 sm:$0xff]  }
 0x298   : > { %v1673_v13 = vmax.f32 %v8939_v25, %v1566_v50  ;;  %v3148_v54 = vmax.f32 %v10349_v58, %v3041_v48  ;;  %5762 = vmatmul.mubr.bf16.gmra.mxu1 %v7723_v38  ;;  %6999 = vmatprep.mubr.msk.bf16.mxu0 %vm947_vm0, %v7724_v27  ;;  %v10353_v38 = vld [vmem:[#allocation3_spill] sm:$0xff]  ;;  %v7732_v28 = vld [vmem:[%s8071_s10 + $0xbe4] ss:$8 sps:$4 sm:$0xff]  }
 0x299   : > { %v1760_v41 = vrot.slane %v1759_v34, 1  ;;  %v3235_v63 = vrot.slane %v3234_v14, 1  ;;  %v1765_v32 = vrot.slane %v1764_v37, 4  ;;  %v3240_v3 = vrot.slane %v3239_v11, 4  ;;  %v1568_v47 = vpop.f32.mrf.mxu0  ;;  %v3043_v20 = vpop.f32.mrf.mxu1  ;;  %7167 = vmatprep.mubr.msk.bf16.mxu1 %vm947_vm0, %v7726_v1  ;;  %v7729_v55 = vld [vmem:[%s8071_s10 + $0xbd0] ss:$8 sps:$4 sm:$0xff]  }
 0x29a   : > { %v1771_v24 = vsel %vm947_vm0, %v1673_v13, -inf  ;;  %v10355_v47 = vld [vmem:[#allocation4_spill] sm:$0xff] }
 0x29b   : > { %v9215_v59 = vmax.f32 %v1759_v34, %v1760_v41  ;;  %v9217_v25 = vmax.f32 %v3234_v14, %v3235_v63  ;;  %v1766_v29 = vmax.f32 %v1764_v37, %v1765_v32  ;;  %v3241_v23 = vmax.f32 %v3239_v11, %v3240_v3  ;;  %v1569_v62 = vpop.f32.mrf.mxu0  ;;  %v3044_v6 = vpop.f32.mrf.mxu1  ;;  %v10354_v32 = vld [vmem:[#allocation35_spill] sm:$0xff] }
 0x29c   : > { %v1674_v52 = vmax.f32 %v10352_v42, %v1569_v62  ;;  %v3149_v27 = vmax.f32 %v10353_v38, %v3044_v6  ;;  %v3246_v34 = vsel %vm947_vm0, %v3148_v54, -inf }
 0x29d   : > { %10350 = vst [vmem:[#allocation15_spill] sm:$0xff] %v9215_v59  ;;  %10351 = vst [vmem:[#allocation47_spill] sm:$0xff] %v9217_v25  ;;  %v1767_v16 = vrot.slane %v1766_v29, 2  ;;  %v3242_v1 = vrot.slane %v3241_v23, 2  ;;  %v1571_v21 = vpop.f32.mrf.mxu0  ;;  %v3046_v4 = vpop.f32.mrf.mxu1  ;;  %v7804_v25 = vld [vmem:[%s8071_s10 + $0xca4] ss:$8 sps:$4 sm:$0xff]  }
 0x29e   : > { %v1772_v14 = vsel %vm947_vm0, %v1674_v52, -inf  ;;  %v3247_v37 = vsel %vm947_vm0, %v3149_v27, -inf  ;;  %v10359_v21 = vld [vmem:[#allocation5_spill] sm:$0xff] }
 0x29f   : > { %v1768_v11 = vmax.f32 %v1766_v29, %v1767_v16  ;;  %v3243_v50 = vmax.f32 %v3241_v23, %v3242_v1  ;;  %v1773_v48 = vmax.f32 %v1771_v24, %v1772_v14  ;;  %v3248_v58 = vmax.f32 %v3246_v34, %v3247_v37  ;;  %v1574_v41 = vpop.f32.mrf.mxu0  ;;  %v3049_v63 = vpop.f32.mrf.mxu1  ;;  %4281 = vmatmul.mubr.bf16.gmra.mxu0 %v7728_v8  ;;  %v10358_v16 = vld [vmem:[#allocation36_spill] sm:$0xff]  ;;  %v7736_v34 = vld [vmem:[%s8071_s10 + $0x874] ss:$8 sps:$4 sm:$0xff]  }
 0x2a0   : > { %v1675_v3 = vmax.f32 %v10354_v32, %v1574_v41  ;;  %v3150_v20 = vmax.f32 %v10355_v47, %v3049_v63  ;;  %5770 = vmatmul.mubr.bf16.gmra.mxu1 %v7729_v55  ;;  %7000 = vmatprep.mubr.msk.bf16.mxu0 %vm947_vm0, %v7730_v53  ;;  %v7734_v53 = vld [vmem:[%s8071_s10 + $0x860] ss:$8 sps:$4 sm:$0xff]   ;;  %v7774_v14 = vld [vmem:[%s8071_s10 + $0xc54] ss:$8 sps:$4 sm:$0xff]  }
 0x2a1   : > { %v1769_v13 = vrot.slane %v1768_v11, 1  ;;  %v3244_v54 = vrot.slane %v3243_v50, 1  ;;  %v1774_v62 = vrot.slane %v1773_v48, 4  ;;  %v3249_v29 = vrot.slane %v3248_v58, 4  ;;  %v1576_v23 = vpop.f32.mrf.mxu0  ;;  %v3051_v6 = vpop.f32.mrf.mxu1  ;;  %7168 = vmatprep.mubr.msk.bf16.mxu1 %vm947_vm0, %v7732_v28  ;;  %v7735_v24 = vld [vmem:[%s8071_s10 + $0xbe0] ss:$8 sps:$4 sm:$0xff]  }
 0x2a3   : > { %v9235_v42 = vmax.f32 %v1768_v11, %v1769_v13  ;;  %v9237_v8 = vmax.f32 %v3243_v50, %v3244_v54  ;;  %v1775_v52 = vmax.f32 %v1773_v48, %v1774_v62  ;;  %v3250_v38 = vmax.f32 %v3248_v58, %v3249_v29  ;;  %v1577_v27 = vpop.f32.mrf.mxu0  ;;  %v3052_v55 = vpop.f32.mrf.mxu1  ;;  %v7738_v50 = vld [vmem:[%s8071_s10 + $0xbf4] ss:$8 sps:$4 sm:$0xff]  }
 0x2a4   : > { %v1676_v1 = vmax.f32 %v10358_v16, %v1577_v27  ;;  %v3151_v4 = vmax.f32 %v10359_v21, %v3052_v55  ;;  %v1780_v48 = vsel %vm947_vm0, %v1675_v3, -inf  ;;  %v3255_v58 = vsel %vm947_vm0, %v3150_v20, -inf  ;;  %v10360_v27 = vld [vmem:[#allocation37_spill] sm:$0xff] }
 0x2a5   : > { %10356 = vst [vmem:[#allocation16_spill] sm:$0xff] %v9235_v42  ;;  %10357 = vst [vmem:[#allocation48_spill] sm:$0xff] %v9237_v8  ;;  %v1776_v28 = vrot.slane %v1775_v52, 2  ;;  %v3251_v37 = vrot.slane %v3250_v38, 2  ;;  %v1579_v11 = vpop.f32.mrf.mxu0  ;;  %v3054_v41 = vpop.f32.mrf.mxu1  ;;  %v7802_v8 = vld [vmem:[%s8071_s10 + $0x924] ss:$8 sps:$4 sm:$0xff]  }
 0x2a6   : > { %v1781_v63 = vsel %vm947_vm0, %v1676_v1, -inf  ;;  %v3256_v32 = vsel %vm947_vm0, %v3151_v4, -inf  ;;  %v7741_v41 = vld [vmem:[%s8071_s10 + $0xbf0] ss:$8 sps:$4 sm:$0xff]  }
 0x2a7   : > { %v1777_v47 = vmax.f32 %v1775_v52, %v1776_v28  ;;  %v3252_v13 = vmax.f32 %v3250_v38, %v3251_v37  ;;  %v1782_v54 = vmax.f32 %v1780_v48, %v1781_v63  ;;  %v3257_v62 = vmax.f32 %v3255_v58, %v3256_v32  ;;  %v1582_v29 = vpop.f32.mrf.mxu0  ;;  %v3057_v23 = vpop.f32.mrf.mxu1  ;;  %4289 = vmatmul.mubr.bf16.gmra.mxu0 %v7734_v53  ;;  %v7742_v48 = vld [vmem:[%s8071_s10 + $0x884] ss:$8 sps:$4 sm:$0xff]  }
 0x2a8   : > { %v1677_v6 = vmax.f32 %v8983_v39, %v1582_v29  ;;  %v3152_v55 = vmax.f32 %v10360_v27, %v3057_v23  ;;  %5778 = vmatmul.mubr.bf16.gmra.mxu1 %v7735_v24  ;;  %7001 = vmatprep.mubr.msk.bf16.mxu0 %vm947_vm0, %v7736_v34  ;;  %v7740_v34 = vld [vmem:[%s8071_s10 + $0x870] ss:$8 sps:$4 sm:$0xff]  }
 0x2a9   : > { %v1778_v3 = vrot.slane %v1777_v47, 1  ;;  %v3253_v20 = vrot.slane %v3252_v13, 1  ;;  %v1783_v16 = vrot.slane %v1782_v54, 4  ;;  %v3258_v52 = vrot.slane %v3257_v62, 4  ;;  %v1584_v38 = vpop.f32.mrf.mxu0  ;;  %v3059_v1 = vpop.f32.mrf.mxu1  ;;  %7169 = vmatprep.mubr.msk.bf16.mxu1 %vm947_vm0, %v7738_v50 }
 0x2ab   : > { %v9255_v21 = vmax.f32 %v1777_v47, %v1778_v3  ;;  %v9257_v39 = vmax.f32 %v3252_v13, %v3253_v20  ;;  %v1784_v53 = vmax.f32 %v1782_v54, %v1783_v16  ;;  %v3259_v4 = vmax.f32 %v3257_v62, %v3258_v52  ;;  %v1585_v24 = vpop.f32.mrf.mxu0  ;;  %v3060_v28 = vpop.f32.mrf.mxu1  ;;  %v7744_v13 = vld [vmem:[%s8071_s10 + $0xc04] ss:$8 sps:$4 sm:$0xff]  }
 0x2ac   : > { %v1678_v37 = vmax.f32 %v8995_v57, %v1585_v24  ;;  %v3153_v11 = vmax.f32 %v8997_v61, %v3060_v28  ;;  %v1789_v54 = vsel %vm947_vm0, %v1677_v6, -inf  ;;  %v3264_v62 = vsel %vm947_vm0, %v3152_v55, -inf }
 0x2ad   : > { %10361 = vst [vmem:[#allocation17_spill] sm:$0xff] %v9255_v21  ;;  %10362 = vst [vmem:[#allocation49_spill] sm:$0xff] %v9257_v39  ;;  %v1785_v50 = vrot.slane %v1784_v53, 2  ;;  %v3260_v63 = vrot.slane %v3259_v4, 2  ;;  %v1587_v32 = vpop.f32.mrf.mxu0  ;;  %v3062_v47 = vpop.f32.mrf.mxu1  ;;  %v7798_v39 = vld [vmem:[%s8071_s10 + $0xc94] ss:$8 sps:$4 sm:$0xff]  }
 0x2ae   : > { %v1790_v29 = vsel %vm947_vm0, %v1678_v37, -inf  ;;  %v3265_v57 = vsel %vm947_vm0, %v3153_v11, -inf  ;;  %v7747_v47 = vld [vmem:[%s8071_s10 + $0xc00] ss:$8 sps:$4 sm:$0xff]  }
 0x2af   : > { %v1786_v23 = vmax.f32 %v1784_v53, %v1785_v50  ;;  %v3261_v61 = vmax.f32 %v3259_v4, %v3260_v63  ;;  %v1791_v27 = vmax.f32 %v1789_v54, %v1790_v29  ;;  %v3266_v3 = vmax.f32 %v3264_v62, %v3265_v57  ;;  %v1590_v20 = vpop.f32.mrf.mxu0  ;;  %v3065_v16 = vpop.f32.mrf.mxu1  ;;  %4297 = vmatmul.mubr.bf16.gmra.mxu0 %v7740_v34  ;;  %v10366_v63 = vld [vmem:[#allocation38_spill] sm:$0xff] }
 0x2b0   : > { %v1679_v52 = vmax.f32 %v9005_v35, %v1590_v20  ;;  %v3154_v38 = vmax.f32 %v9007_v18, %v3065_v16  ;;  %5786 = vmatmul.mubr.bf16.gmra.mxu1 %v7741_v41  ;;  %7002 = vmatprep.mubr.msk.bf16.mxu0 %vm947_vm0, %v7742_v48  ;;  %v7746_v41 = vld [vmem:[%s8071_s10 + $0x880] ss:$8 sps:$4 sm:$0xff]   ;;  %v10365_v48 = vld [vmem:[#allocation6_spill] sm:$0xff] }
 0x2b1   : > { %v1787_v6 = vrot.slane %v1786_v23, 1  ;;  %v3262_v55 = vrot.slane %v3261_v61, 1  ;;  %v1792_v1 = vrot.slane %v1791_v27, 4  ;;  %v3267_v53 = vrot.slane %v3266_v3, 4  ;;  %v1592_v4 = vpop.f32.mrf.mxu0  ;;  %v3067_v24 = vpop.f32.mrf.mxu1  ;;  %7170 = vmatprep.mubr.msk.bf16.mxu1 %vm947_vm0, %v7744_v13  ;;  %v7748_v54 = vld [vmem:[%s8071_s10 + $0x894] ss:$8 sps:$4 sm:$0xff]  }
 0x2b2   : > { %v7772_v62 = vld [vmem:[%s8071_s10 + $0x8d4] ss:$8 sps:$4 sm:$0xff]  }
 0x2b3   : > { %v9275_v28 = vmax.f32 %v1786_v23, %v1787_v6  ;;  %v9277_v35 = vmax.f32 %v3261_v61, %v3262_v55  ;;  %v1793_v18 = vmax.f32 %v1791_v27, %v1792_v1  ;;  %v3268_v34 = vmax.f32 %v3266_v3, %v3267_v53  ;;  %v1593_v37 = vpop.f32.mrf.mxu0  ;;  %v3068_v11 = vpop.f32.mrf.mxu1  ;;  %v7750_v61 = vld [vmem:[%s8071_s10 + $0xc14] ss:$8 sps:$4 sm:$0xff]  }
 0x2b4   : > { %v1680_v50 = vmax.f32 %v10365_v48, %v1593_v37  ;;  %v3155_v32 = vmax.f32 %v10366_v63, %v3068_v11  ;;  %v1798_v27 = vsel %vm947_vm0, %v1679_v52, -inf  ;;  %v3273_v3 = vsel %vm947_vm0, %v3154_v38, -inf }
 0x2b5   : > { %10363 = vst [vmem:[#allocation18_spill] sm:$0xff] %v9275_v28  ;;  %10364 = vst [vmem:[#allocation50_spill] sm:$0xff] %v9277_v35  ;;  %v1794_v13 = vrot.slane %v1793_v18, 2  ;;  %v3269_v29 = vrot.slane %v3268_v34, 2  ;;  %v1595_v57 = vpop.f32.mrf.mxu0  ;;  %v3070_v23 = vpop.f32.mrf.mxu1  ;;  %v7796_v35 = vld [vmem:[%s8071_s10 + $0x914] ss:$8 sps:$4 sm:$0xff]  }
 0x2b6   : > { %v1799_v20 = vsel %vm947_vm0, %v1680_v50, -inf  ;;  %v3274_v16 = vsel %vm947_vm0, %v3155_v32, -inf }
 0x2b7   : > { %v1795_v6 = vmax.f32 %v1793_v18, %v1794_v13  ;;  %v3270_v55 = vmax.f32 %v3268_v34, %v3269_v29  ;;  %v1800_v1 = vmax.f32 %v1798_v27, %v1799_v20  ;;  %v3275_v53 = vmax.f32 %v3273_v3, %v3274_v16  ;;  %v9291_v4 = vpop.f32.mrf.mxu0  ;;  %4305 = vmatmul.mubr.bf16.gmra.mxu0 %v7746_v41  ;;  %v9293_v24 = vpop.f32.mrf.mxu1  ;;  %v7753_v13 = vld [vmem:[%s8071_s10 + $0xc10] ss:$8 sps:$4 sm:$0xff]   ;;  %v7754_v29 = vld [vmem:[%s8071_s10 + $0x8a4] ss:$8 sps:$4 sm:$0xff]  }
 0x2b8   : > { %5794 = vmatmul.mubr.bf16.gmra.mxu1 %v7747_v47  ;;  %7003 = vmatprep.mubr.msk.bf16.mxu0 %vm947_vm0, %v7748_v54  ;;  %v7752_v54 = vld [vmem:[%s8071_s10 + $0x890] ss:$8 sps:$4 sm:$0xff]   ;;  %v7756_v20 = vld [vmem:[%s8071_s10 + $0xc24] ss:$8 sps:$4 sm:$0xff]  }
 0x2b9   : > { %v1796_v52 = vrot.slane %v1795_v6, 1  ;;  %v3271_v38 = vrot.slane %v3270_v55, 1  ;;  %v1801_v37 = vrot.slane %v1800_v1, 4  ;;  %v3276_v11 = vrot.slane %v3275_v53, 4  ;;  %v4116_v48 = vpop.f32.mrf.mxu0  ;;  %v5605_v18 = vpop.f32.mrf.mxu1  ;;  %7171 = vmatprep.mubr.msk.bf16.mxu1 %vm947_vm0, %v7750_v61 }
 0x2bb   : > { %v9297_v34 = vmax.f32 %v1795_v6, %v1796_v52  ;;  %v9299_v41 = vmax.f32 %v3270_v55, %v3271_v38  ;;  %v1802_v50 = vmax.f32 %v1800_v1, %v1801_v37  ;;  %v3277_v63 = vmax.f32 %v3275_v53, %v3276_v11  ;;  %v9301_v32 = vpop.f32.mrf.mxu0  ;;  %v9303_v47 = vpop.f32.mrf.mxu1 }
 0x2bd   : > { %10367 = vst [vmem:[#allocation19_spill] sm:$0xff] %v9297_v34  ;;  %10368 = vst [vmem:[#allocation51_spill] sm:$0xff] %v9299_v41  ;;  %v1803_v23 = vrot.slane %v1802_v50, 2  ;;  %v3278_v27 = vrot.slane %v3277_v63, 2  ;;  %v4119_v3 = vpop.f32.mrf.mxu0  ;;  %v5608_v61 = vpop.f32.mrf.mxu1  ;;  %v7792_v41 = vld [vmem:[%s8071_s10 + $0xc84] ss:$8 sps:$4 sm:$0xff]  }
 0x2be   : > { %v7762_v3 = vld [vmem:[%s8071_s10 + $0xc34] ss:$8 sps:$4 sm:$0xff]  }
 0x2bf   : > { %v1804_v16 = vmax.f32 %v1802_v50, %v1803_v23  ;;  %v3279_v6 = vmax.f32 %v3277_v63, %v3278_v27  ;;  %v9311_v55 = vpop.f32.mrf.mxu0  ;;  %4313 = vmatmul.mubr.bf16.gmra.mxu0 %v7752_v54  ;;  %v9313_v1 = vpop.f32.mrf.mxu1  ;;  %v7758_v63 = vld [vmem:[%s8071_s10 + $0x8a0] ss:$8 sps:$4 sm:$0xff]  }
 0x2c0   : > { %5802 = vmatmul.mubr.bf16.gmra.mxu1 %v7753_v13  ;;  %7004 = vmatprep.mubr.msk.bf16.mxu0 %vm947_vm0, %v7754_v29  ;;  %v7759_v54 = vld [vmem:[%s8071_s10 + $0xc20] ss:$8 sps:$4 sm:$0xff]   ;;  %v7760_v13 = vld [vmem:[%s8071_s10 + $0x8b4] ss:$8 sps:$4 sm:$0xff]   ;;  %v7768_v29 = vld [vmem:[%s8071_s10 + $0xc44] ss:$8 sps:$4 sm:$0xff]  }
 0x2c1   : > { %v1805_v53 = vrot.slane %v1804_v16, 1  ;;  %v3280_v52 = vrot.slane %v3279_v6, 1  ;;  %v4124_v38 = vpop.f32.mrf.mxu0  ;;  %v5613_v37 = vpop.f32.mrf.mxu1  ;;  %7172 = vmatprep.mubr.msk.bf16.mxu1 %vm947_vm0, %v7756_v20 }
 0x2c2   : > { %v7764_v38 = vld [vmem:[%s8071_s10 + $0x8b0] ss:$8 sps:$4 sm:$0xff]  }
 0x2c3   : > { %v9317_v11 = vmax.f32 %v1804_v16, %v1805_v53  ;;  %v9319_v48 = vmax.f32 %v3279_v6, %v3280_v52  ;;  %v9321_v18 = vpop.f32.mrf.mxu0  ;;  %v9323_v50 = vpop.f32.mrf.mxu1  ;;  %v7765_v37 = vld [vmem:[%s8071_s10 + $0xc30] ss:$8 sps:$4 sm:$0xff]  }
 0x2c5   : > { %10369 = vst [vmem:[#allocation20_spill] sm:$0xff] %v9317_v11  ;;  %10370 = vst [vmem:[#allocation52_spill] sm:$0xff] %v9319_v48  ;;  %v4127_v23 = vpop.f32.mrf.mxu0  ;;  %v5616_v27 = vpop.f32.mrf.mxu1  ;;  %v7790_v48 = vld [vmem:[%s8071_s10 + $0x904] ss:$8 sps:$4 sm:$0xff]  }
 0x2c6   : > { %v7766_v23 = vld [vmem:[%s8071_s10 + $0x8c4] ss:$8 sps:$4 sm:$0xff]  }
 0x2c7   : > { %v9331_v61 = vpop.f32.mrf.mxu0  ;;  %4321 = vmatmul.mubr.bf16.gmra.mxu0 %v7758_v63  ;;  %v9333_v20 = vpop.f32.mrf.mxu1 }
 0x2c8   : > { %5810 = vmatmul.mubr.bf16.gmra.mxu1 %v7759_v54  ;;  %7005 = vmatprep.mubr.msk.bf16.mxu0 %vm947_vm0, %v7760_v13 }
 0x2c9   : > { %v4132_v16 = vpop.f32.mrf.mxu0  ;;  %v5621_v6 = vpop.f32.mrf.mxu1  ;;  %7173 = vmatprep.mubr.msk.bf16.mxu1 %vm947_vm0, %v7762_v3 }
 0x2cb   : > { %v9337_v53 = vpop.f32.mrf.mxu0  ;;  %v9339_v52 = vpop.f32.mrf.mxu1 }
 0x2cd   : > { %v4135_v63 = vpop.f32.mrf.mxu0  ;;  %v5624_v27 = vpop.f32.mrf.mxu1 }
 0x2ce   : > { %v7770_v63 = vld [vmem:[%s8071_s10 + $0x8c0] ss:$8 sps:$4 sm:$0xff]  }
 0x2cf   : > { %v9345_v54 = vpop.f32.mrf.mxu0  ;;  %4329 = vmatmul.mubr.bf16.gmra.mxu0 %v7764_v38  ;;  %v9347_v13 = vpop.f32.mrf.mxu1  ;;  %v7771_v27 = vld [vmem:[%s8071_s10 + $0xc40] ss:$8 sps:$4 sm:$0xff]  }
 0x2d0   : > { %5818 = vmatmul.mubr.bf16.gmra.mxu1 %v7765_v37  ;;  %7006 = vmatprep.mubr.msk.bf16.mxu0 %vm947_vm0, %v7766_v23 }
 0x2d1   : > { %v4140_v3 = vpop.f32.mrf.mxu0  ;;  %v5629_v16 = vpop.f32.mrf.mxu1  ;;  %7174 = vmatprep.mubr.msk.bf16.mxu1 %vm947_vm0, %v7768_v29 }
 0x2d3   : > { %v9351_v6 = vpop.f32.mrf.mxu0  ;;  %v9353_v57 = vpop.f32.mrf.mxu1 }
 0x2d5   : > { %v4143_v38 = vpop.f32.mrf.mxu0  ;;  %v5632_v58 = vpop.f32.mrf.mxu1 }
 0x2d6   : > { %v7776_v38 = vld [vmem:[%s8071_s10 + $0x8d0] ss:$8 sps:$4 sm:$0xff]  }
 0x2d7   : > { %v9359_v37 = vpop.f32.mrf.mxu0  ;;  %4337 = vmatmul.mubr.bf16.gmra.mxu0 %v7770_v63  ;;  %v9361_v23 = vpop.f32.mrf.mxu1  ;;  %v7777_v58 = vld [vmem:[%s8071_s10 + $0xc50] ss:$8 sps:$4 sm:$0xff]  }
 0x2d8   : > { %5826 = vmatmul.mubr.bf16.gmra.mxu1 %v7771_v27  ;;  %7007 = vmatprep.mubr.msk.bf16.mxu0 %vm947_vm0, %v7772_v62 }
 0x2d9   : > { %v4148_v29 = vpop.f32.mrf.mxu0  ;;  %v5637_v3 = vpop.f32.mrf.mxu1  ;;  %7175 = vmatprep.mubr.msk.bf16.mxu1 %vm947_vm0, %v7774_v14 }
 0x2db   : > { %v9365_v16 = vpop.f32.mrf.mxu0  ;;  %v9367_v49 = vpop.f32.mrf.mxu1 }
 0x2dd   : > { %v4151_v63 = vpop.f32.mrf.mxu0  ;;  %v5640_v31 = vpop.f32.mrf.mxu1 }
 0x2de   : > { %v7782_v63 = vld [vmem:[%s8071_s10 + $0x8e0] ss:$8 sps:$4 sm:$0xff]  }
 0x2df   : > { %v9373_v27 = vpop.f32.mrf.mxu0  ;;  %4345 = vmatmul.mubr.bf16.gmra.mxu0 %v7776_v38  ;;  %v9375_v62 = vpop.f32.mrf.mxu1  ;;  %v7783_v31 = vld [vmem:[%s8071_s10 + $0xc60] ss:$8 sps:$4 sm:$0xff]  }
 0x2e0   : > { %5834 = vmatmul.mubr.bf16.gmra.mxu1 %v7777_v58  ;;  %7008 = vmatprep.mubr.msk.bf16.mxu0 %vm947_vm0, %v7778_v36 }
 0x2e1   : > { %v4156_v14 = vpop.f32.mrf.mxu0  ;;  %v5645_v29 = vpop.f32.mrf.mxu1  ;;  %7176 = vmatprep.mubr.msk.bf16.mxu1 %vm947_vm0, %v7780_v15 }
 0x2e3   : > { %v9379_v3 = vpop.f32.mrf.mxu0  ;;  %v9381_v45 = vpop.f32.mrf.mxu1 }
 0x2e5   : > { %v4159_v38 = vpop.f32.mrf.mxu0  ;;  %v5648_v5 = vpop.f32.mrf.mxu1 }
 0x2e6   : > { %v7788_v38 = vld [vmem:[%s8071_s10 + $0x8f0] ss:$8 sps:$4 sm:$0xff]  }
 0x2e7   : > { %v9387_v58 = vpop.f32.mrf.mxu0  ;;  %4353 = vmatmul.mubr.bf16.gmra.mxu0 %v7782_v63  ;;  %v9389_v36 = vpop.f32.mrf.mxu1  ;;  %v7789_v5 = vld [vmem:[%s8071_s10 + $0xc70] ss:$8 sps:$4 sm:$0xff]  }
 0x2e8   : > { %10371 = vst [vmem:[#allocation21_spill] sm:$0xff] %v9387_v58  ;;  %10372 = vst [vmem:[#allocation53_spill] sm:$0xff] %v9389_v36  ;;  %5842 = vmatmul.mubr.bf16.gmra.mxu1 %v7783_v31  ;;  %7009 = vmatprep.mubr.msk.bf16.mxu0 %vm947_vm0, %v7784_v2  ;;  %v7918_v58 = vld [vmem:[%s8071_s10 + $0xdd4] ss:$8 sps:$4 sm:$0xff]  }
 0x2e9   : > { %v4164_v15 = vpop.f32.mrf.mxu0  ;;  %v5653_v14 = vpop.f32.mrf.mxu1  ;;  %7177 = vmatprep.mubr.msk.bf16.mxu1 %vm947_vm0, %v7786_v46 }
 0x2eb   : > { %v9393_v29 = vpop.f32.mrf.mxu0  ;;  %v9395_v30 = vpop.f32.mrf.mxu1 }
 0x2ec   : > { %10373 = vst [vmem:[#allocation22_spill] sm:$0xff] %v9393_v29  ;;  %10374 = vst [vmem:[#allocation54_spill] sm:$0xff] %v9395_v30  ;;  %v7873_v30 = vld [vmem:[%s8071_s10 + $0xd50] ss:$8 sps:$4 sm:$0xff]   ;;  %v7876_v29 = vld [vmem:[%s8071_s10 + $0xd64] ss:$8 sps:$4 sm:$0xff]  }
 0x2ed   : > { %v4167_v63 = vpop.f32.mrf.mxu0  ;;  %v5656_v11 = vpop.f32.mrf.mxu1 }
 0x2ee   : > { %v7794_v63 = vld [vmem:[%s8071_s10 + $0x900] ss:$8 sps:$4 sm:$0xff]  }
 0x2ef   : > { %v9401_v31 = vpop.f32.mrf.mxu0  ;;  %4361 = vmatmul.mubr.bf16.gmra.mxu0 %v7788_v38  ;;  %v9403_v2 = vpop.f32.mrf.mxu1  ;;  %v7795_v11 = vld [vmem:[%s8071_s10 + $0xc80] ss:$8 sps:$4 sm:$0xff]  }
 0x2f0   : > { %10375 = vst [vmem:[#allocation23_spill] sm:$0xff] %v9401_v31  ;;  %10376 = vst [vmem:[#allocation55_spill] sm:$0xff] %v9403_v2  ;;  %5850 = vmatmul.mubr.bf16.gmra.mxu1 %v7789_v5  ;;  %7010 = vmatprep.mubr.msk.bf16.mxu0 %vm947_vm0, %v7790_v48  ;;  %v7872_v31 = vld [vmem:[%s8071_s10 + $0x9d0] ss:$8 sps:$4 sm:$0xff]  }
 0x2f1   : > { %v4172_v46 = vpop.f32.mrf.mxu0  ;;  %v5661_v15 = vpop.f32.mrf.mxu1  ;;  %7178 = vmatprep.mubr.msk.bf16.mxu1 %vm947_vm0, %v7792_v41 }
 0x2f3   : > { %v9407_v14 = vpop.f32.mrf.mxu0  ;;  %v9409_v34 = vpop.f32.mrf.mxu1 }
 0x2f4   : > { %10377 = vst [vmem:[#allocation24_spill] sm:$0xff] %v9407_v14  ;;  %10378 = vst [vmem:[#allocation56_spill] sm:$0xff] %v9409_v34  ;;  %v7867_v34 = vld [vmem:[%s8071_s10 + $0xd40] ss:$8 sps:$4 sm:$0xff]   ;;  %v7870_v14 = vld [vmem:[%s8071_s10 + $0xd54] ss:$8 sps:$4 sm:$0xff]  }
 0x2f5   : > { %v4175_v38 = vpop.f32.mrf.mxu0  ;;  %v5664_v28 = vpop.f32.mrf.mxu1 }
 0x2f6   : > { %v7800_v38 = vld [vmem:[%s8071_s10 + $0x910] ss:$8 sps:$4 sm:$0xff]  }
 0x2f7   : > { %v9415_v5 = vpop.f32.mrf.mxu0  ;;  %4369 = vmatmul.mubr.bf16.gmra.mxu0 %v7794_v63  ;;  %v9417_v48 = vpop.f32.mrf.mxu1  ;;  %v7801_v28 = vld [vmem:[%s8071_s10 + $0xc90] ss:$8 sps:$4 sm:$0xff]  }
 0x2f8   : > { %10379 = vst [vmem:[#allocation25_spill] sm:$0xff] %v9415_v5  ;;  %10380 = vst [vmem:[#allocation57_spill] sm:$0xff] %v9417_v48  ;;  %5858 = vmatmul.mubr.bf16.gmra.mxu1 %v7795_v11  ;;  %7011 = vmatprep.mubr.msk.bf16.mxu0 %vm947_vm0, %v7796_v35  ;;  %v7866_v5 = vld [vmem:[%s8071_s10 + $0x9c0] ss:$8 sps:$4 sm:$0xff]  }
 0x2f9   : > { %v4180_v41 = vpop.f32.mrf.mxu0  ;;  %v5669_v46 = vpop.f32.mrf.mxu1  ;;  %7179 = vmatprep.mubr.msk.bf16.mxu1 %vm947_vm0, %v7798_v39 }
 0x2fb   : > { %v9421_v15 = vpop.f32.mrf.mxu0  ;;  %v9423_v21 = vpop.f32.mrf.mxu1 }
 0x2fc   : > { %10381 = vst [vmem:[#allocation26_spill] sm:$0xff] %v9421_v15  ;;  %10382 = vst [vmem:[#allocation58_spill] sm:$0xff] %v9423_v21  ;;  %v7861_v21 = vld [vmem:[%s8071_s10 + $0xd30] ss:$8 sps:$4 sm:$0xff]   ;;  %v7864_v15 = vld [vmem:[%s8071_s10 + $0xd44] ss:$8 sps:$4 sm:$0xff]  }
 0x2fd   : > { %v4183_v63 = vpop.f32.mrf.mxu0  ;;  %v5672_v42 = vpop.f32.mrf.mxu1 }
 0x2fe   : > { %v7806_v63 = vld [vmem:[%s8071_s10 + $0x920] ss:$8 sps:$4 sm:$0xff]  }
 0x2ff   : > { %v9429_v11 = vpop.f32.mrf.mxu0  ;;  %4377 = vmatmul.mubr.bf16.gmra.mxu0 %v7800_v38  ;;  %v9431_v35 = vpop.f32.mrf.mxu1  ;;  %v7807_v42 = vld [vmem:[%s8071_s10 + $0xca0] ss:$8 sps:$4 sm:$0xff]  }
 0x300   : > { %10383 = vst [vmem:[#allocation27_spill] sm:$0xff] %v9429_v11  ;;  %10384 = vst [vmem:[#allocation59_spill] sm:$0xff] %v9431_v35  ;;  %5866 = vmatmul.mubr.bf16.gmra.mxu1 %v7801_v28  ;;  %7012 = vmatprep.mubr.msk.bf16.mxu0 %vm947_vm0, %v7802_v8  ;;  %v7860_v11 = vld [vmem:[%s8071_s10 + $0x9b0] ss:$8 sps:$4 sm:$0xff]  }
 0x301   : > { %v4188_v39 = vpop.f32.mrf.mxu0  ;;  %v5677_v41 = vpop.f32.mrf.mxu1  ;;  %7180 = vmatprep.mubr.msk.bf16.mxu1 %vm947_vm0, %v7804_v25 }
 0x303   : > { %v9435_v46 = vpop.f32.mrf.mxu0  ;;  %v9437_v59 = vpop.f32.mrf.mxu1 }
 0x304   : > { %10385 = vst [vmem:[#allocation28_spill] sm:$0xff] %v9435_v46  ;;  %10386 = vst [vmem:[#allocation60_spill] sm:$0xff] %v9437_v59  ;;  %v7855_v59 = vld [vmem:[%s8071_s10 + $0xd20] ss:$8 sps:$4 sm:$0xff]   ;;  %v7858_v46 = vld [vmem:[%s8071_s10 + $0xd34] ss:$8 sps:$4 sm:$0xff]  }
 0x305   : > { %v4191_v38 = vpop.f32.mrf.mxu0  ;;  %v5680_v33 = vpop.f32.mrf.mxu1 }
 0x306   : > { %v7812_v38 = vld [vmem:[%s8071_s10 + $0x930] ss:$8 sps:$4 sm:$0xff]  }
 0x307   : > { %v9443_v28 = vpop.f32.mrf.mxu0  ;;  %4385 = vmatmul.mubr.bf16.gmra.mxu0 %v7806_v63  ;;  %v9445_v8 = vpop.f32.mrf.mxu1  ;;  %v7813_v33 = vld [vmem:[%s8071_s10 + $0xcb0] ss:$8 sps:$4 sm:$0xff]  }
 0x308   : > { %10387 = vst [vmem:[#allocation29_spill] sm:$0xff] %v9443_v28  ;;  %10388 = vst [vmem:[#allocation61_spill] sm:$0xff] %v9445_v8  ;;  %5874 = vmatmul.mubr.bf16.gmra.mxu1 %v7807_v42  ;;  %7013 = vmatprep.mubr.msk.bf16.mxu0 %vm947_vm0, %v7808_v22  ;;  %v7854_v28 = vld [vmem:[%s8071_s10 + $0x9a0] ss:$8 sps:$4 sm:$0xff]  }
 0x309   : > { %v4196_v25 = vpop.f32.mrf.mxu0  ;;  %v5685_v39 = vpop.f32.mrf.mxu1  ;;  %7181 = vmatprep.mubr.msk.bf16.mxu1 %vm947_vm0, %v7810_v7 }
 0x30b   : > { %v9449_v41 = vpop.f32.mrf.mxu0  ;;  %v9451_v44 = vpop.f32.mrf.mxu1 }
 0x30c   : > { %10389 = vst [vmem:[#allocation30_spill] sm:$0xff] %v9449_v41  ;;  %10390 = vst [vmem:[#allocation31_spill] sm:$0xff] %v9451_v44  ;;  %v7849_v44 = vld [vmem:[%s8071_s10 + $0xd10] ss:$8 sps:$4 sm:$0xff]   ;;  %v7852_v41 = vld [vmem:[%s8071_s10 + $0xd24] ss:$8 sps:$4 sm:$0xff]  }
 0x30d   : > { %v4199_v63 = vpop.f32.mrf.mxu0  ;;  %v5688_v9 = vpop.f32.mrf.mxu1 }
 0x30e   : > { %v7818_v9 = vld [vmem:[%s8071_s10 + $0x940] ss:$8 sps:$4 sm:$0xff]  }
 0x30f   : > { %v9457_v42 = vpop.f32.mrf.mxu0  ;;  %4393 = vmatmul.mubr.bf16.gmra.mxu0 %v7812_v38  ;;  %v9459_v22 = vpop.f32.mrf.mxu1  ;;  %v7819_v63 = vld [vmem:[%s8071_s10 + $0xcc0] ss:$8 sps:$4 sm:$0xff]  }
 0x310   : > { %10391 = vst [vmem:[#allocation32_spill] sm:$0xff] %v9457_v42  ;;  %10392 = vst [vmem:[#allocation33_spill] sm:$0xff] %v9459_v22  ;;  %5882 = vmatmul.mubr.bf16.gmra.mxu1 %v7813_v33  ;;  %7014 = vmatprep.mubr.msk.bf16.mxu0 %vm947_vm0, %v7814_v10  ;;  %v7822_v33 = vld [vmem:[%s8071_s10 + $0xcd4] ss:$8 sps:$4 sm:$0xff]   ;;  %v7848_v42 = vld [vmem:[%s8071_s10 + $0x990] ss:$8 sps:$4 sm:$0xff]  }
 0x311   : > { %v4204_v7 = vpop.f32.mrf.mxu0  ;;  %v5693_v25 = vpop.f32.mrf.mxu1  ;;  %7182 = vmatprep.mubr.msk.bf16.mxu1 %vm947_vm0, %v7816_v19 }
 0x313   : > { %v9463_v39 = vpop.f32.mrf.mxu0  ;;  %v9465_v17 = vpop.f32.mrf.mxu1 }
 0x314   : > { %10393 = vst [vmem:[#allocation2_spill] sm:$0xff] %v9463_v39  ;;  %10394 = vst [vmem:[#allocation34_spill] sm:$0xff] %v9465_v17  ;;  %v7843_v17 = vld [vmem:[%s8071_s10 + $0xd00] ss:$8 sps:$4 sm:$0xff]   ;;  %v7846_v39 = vld [vmem:[%s8071_s10 + $0xd14] ss:$8 sps:$4 sm:$0xff]  }
 0x315   : > { %v4207_v38 = vpop.f32.mrf.mxu0  ;;  %v5696_v60 = vpop.f32.mrf.mxu1 }
 0x316   : > { %v7825_v60 = vld [vmem:[%s8071_s10 + $0xcd0] ss:$8 sps:$4 sm:$0xff]  }
 0x317   : > { %v9471_v43 = vpop.f32.mrf.mxu0  ;;  %4401 = vmatmul.mubr.bf16.gmra.mxu0 %v7818_v9 }
 0x318   : > { %10395 = vst [vmem:[#allocation3_spill] sm:$0xff] %v9471_v43  ;;  %v9473_v10 = vpop.f32.mrf.mxu1  ;;  %5890 = vmatmul.mubr.bf16.gmra.mxu1 %v7819_v63  ;;  %7015 = vmatprep.mubr.msk.bf16.mxu0 %vm947_vm0, %v7820_v40  ;;  %v7842_v43 = vld [vmem:[%s8071_s10 + $0x980] ss:$8 sps:$4 sm:$0xff]  }
 0x319   : > { %10396 = vst [vmem:[#allocation35_spill] sm:$0xff] %v9473_v10  ;;  %v4212_v19 = vpop.f32.mrf.mxu0  ;;  %7183 = vmatprep.mubr.msk.bf16.mxu1 %vm947_vm0, %v7822_v33 }
 0x31a   : > { %v5701_v7 = vpop.f32.mrf.mxu1 }
 0x31b   : > { %v9477_v25 = vpop.f32.mrf.mxu0 }
 0x31c   : > { %10397 = vst [vmem:[#allocation4_spill] sm:$0xff] %v9477_v25  ;;  %v9480_v38 = vpop.f32.mrf.mxu1  ;;  %v7840_v25 = vld [vmem:[%s8071_s10 + $0xd04] ss:$8 sps:$4 sm:$0xff]  }
 0x31d   : > { %10398 = vst [vmem:[#allocation36_spill] sm:$0xff] %v9480_v38  ;;  %v4215_v9 = vpop.f32.mrf.mxu0  ;;  %v7831_v38 = vld [vmem:[%s8071_s10 + $0xce0] ss:$8 sps:$4 sm:$0xff]  }
 0x31e   : > { %v5704_v63 = vpop.f32.mrf.mxu1 }
 0x31f   : > { %v9485_v12 = vpop.f32.mrf.mxu0  ;;  %4409 = vmatmul.mubr.bf16.gmra.mxu0 %v7824_v51  ;;  %v7832_v63 = vld [vmem:[%s8071_s10 + $0x974] ss:$8 sps:$4 sm:$0xff]  }
 0x320   : > { %10399 = vst [vmem:[#allocation5_spill] sm:$0xff] %v9485_v12  ;;  %v9487_v40 = vpop.f32.mrf.mxu1  ;;  %5898 = vmatmul.mubr.bf16.gmra.mxu1 %v7825_v60  ;;  %7016 = vmatprep.mubr.msk.bf16.mxu0 %vm947_vm0, %v7826_v56  ;;  %v7834_v12 = vld [vmem:[%s8071_s10 + $0xcf4] ss:$8 sps:$4 sm:$0xff]  }
 0x321   : > { %10400 = vst [vmem:[#allocation37_spill] sm:$0xff] %v9487_v40  ;;  %v4220_v33 = vpop.f32.mrf.mxu0  ;;  %7184 = vmatprep.mubr.msk.bf16.mxu1 %vm947_vm0, %v7828_v0 }
 0x322   : > { %v5709_v19 = vpop.f32.mrf.mxu1 }
 0x323   : > { %v9491_v7 = vpop.f32.mrf.mxu0 }
 0x324   : > { %10401 = vst [vmem:[#allocation6_spill] sm:$0xff] %v9491_v7  ;;  %v9494_v9 = vpop.f32.mrf.mxu1  ;;  %v7837_v7 = vld [vmem:[%s8071_s10 + $0xcf0] ss:$8 sps:$4 sm:$0xff]  }
 0x325   : > { %10402 = vst [vmem:[#allocation38_spill] sm:$0xff] %v9494_v9  ;;  %v4223_v51 = vpop.f32.mrf.mxu0  ;;  %v7836_v9 = vld [vmem:[%s8071_s10 + $0x970] ss:$8 sps:$4 sm:$0xff]  }
 0x326   : > { %v5712_v60 = vpop.f32.mrf.mxu1 }
 0x327   : > { %v9499_v40 = vpop.f32.mrf.mxu0  ;;  %4417 = vmatmul.mubr.bf16.gmra.mxu0 %v7830_v26  ;;  %v7838_v60 = vld [vmem:[%s8071_s10 + $0x984] ss:$8 sps:$4 sm:$0xff]  }
 0x328   : > { %v9501_v56 = vpop.f32.mrf.mxu1  ;;  %5906 = vmatmul.mubr.bf16.gmra.mxu1 %v7831_v38  ;;  %7017 = vmatprep.mubr.msk.bf16.mxu0 %vm947_vm0, %v7832_v63 }
 0x329   : > { %v4228_v0 = vpop.f32.mrf.mxu0  ;;  %7185 = vmatprep.mubr.msk.bf16.mxu1 %vm947_vm0, %v7834_v12 }
 0x32a   : > { %v5717_v33 = vpop.f32.mrf.mxu1 }
 0x32b   : > { %v9505_v19 = vpop.f32.mrf.mxu0 }
 0x32c   : > { %v9508_v51 = vpop.f32.mrf.mxu1 }
 0x32d   : > { %v4231_v26 = vpop.f32.mrf.mxu0 }
 0x32e   : > { %v5720_v38 = vpop.f32.mrf.mxu1 }
 0x32f   : > { %v9513_v10 = vpop.f32.mrf.mxu0  ;;  %4425 = vmatmul.mubr.bf16.gmra.mxu0 %v7836_v9  ;;  %v7844_v38 = vld [vmem:[%s8071_s10 + $0x994] ss:$8 sps:$4 sm:$0xff]  }
 0x330   : > { %v9515_v63 = vpop.f32.mrf.mxu1  ;;  %5914 = vmatmul.mubr.bf16.gmra.mxu1 %v7837_v7  ;;  %7018 = vmatprep.mubr.msk.bf16.mxu0 %vm947_vm0, %v7838_v60 }
 0x331   : > { %v4236_v12 = vpop.f32.mrf.mxu0  ;;  %7186 = vmatprep.mubr.msk.bf16.mxu1 %vm947_vm0, %v7840_v25 }
 0x332   : > { %v5725_v0 = vpop.f32.mrf.mxu1 }
 0x333   : > { %v9519_v33 = vpop.f32.mrf.mxu0 }
 0x334   : > { %v9522_v26 = vpop.f32.mrf.mxu1 }
 0x335   : > { %v4239_v9 = vpop.f32.mrf.mxu0 }
 0x336   : > { %v5728_v7 = vpop.f32.mrf.mxu1 }
 0x337   : > { %v9527_v22 = vpop.f32.mrf.mxu0  ;;  %4433 = vmatmul.mubr.bf16.gmra.mxu0 %v7842_v43  ;;  %v7850_v7 = vld [vmem:[%s8071_s10 + $0x9a4] ss:$8 sps:$4 sm:$0xff]  }
 0x338   : > { %v9529_v60 = vpop.f32.mrf.mxu1  ;;  %5922 = vmatmul.mubr.bf16.gmra.mxu1 %v7843_v17  ;;  %7019 = vmatprep.mubr.msk.bf16.mxu0 %vm947_vm0, %v7844_v38 }
 0x339   : > { %v4244_v25 = vpop.f32.mrf.mxu0  ;;  %7187 = vmatprep.mubr.msk.bf16.mxu1 %vm947_vm0, %v7846_v39 }
 0x33a   : > { %v5733_v12 = vpop.f32.mrf.mxu1 }
 0x33b   : > { %v9533_v0 = vpop.f32.mrf.mxu0 }
 0x33c   : > { %v9536_v9 = vpop.f32.mrf.mxu1 }
 0x33d   : > { %v4247_v43 = vpop.f32.mrf.mxu0 }
 0x33e   : > { %v5736_v17 = vpop.f32.mrf.mxu1 }
 0x33f   : > { %v9541_v8 = vpop.f32.mrf.mxu0  ;;  %4441 = vmatmul.mubr.bf16.gmra.mxu0 %v7848_v42  ;;  %v7856_v17 = vld [vmem:[%s8071_s10 + $0x9b4] ss:$8 sps:$4 sm:$0xff]  }
 0x340   : > { %v9543_v38 = vpop.f32.mrf.mxu1  ;;  %5930 = vmatmul.mubr.bf16.gmra.mxu1 %v7849_v44  ;;  %7020 = vmatprep.mubr.msk.bf16.mxu0 %vm947_vm0, %v7850_v7 }
 0x341   : > { %v4252_v39 = vpop.f32.mrf.mxu0  ;;  %7188 = vmatprep.mubr.msk.bf16.mxu1 %vm947_vm0, %v7852_v41 }
 0x342   : > { %v5741_v25 = vpop.f32.mrf.mxu1 }
 0x343   : > { %v9547_v12 = vpop.f32.mrf.mxu0 }
 0x344   : > { %v9550_v43 = vpop.f32.mrf.mxu1 }
 0x345   : > { %v4255_v42 = vpop.f32.mrf.mxu0 }
 0x346   : > { %v5744_v44 = vpop.f32.mrf.mxu1 }
 0x347   : > { %v9555_v35 = vpop.f32.mrf.mxu0  ;;  %4449 = vmatmul.mubr.bf16.gmra.mxu0 %v7854_v28  ;;  %v7862_v44 = vld [vmem:[%s8071_s10 + $0x9c4] ss:$8 sps:$4 sm:$0xff]  }
 0x348   : > { %v9557_v7 = vpop.f32.mrf.mxu1  ;;  %5938 = vmatmul.mubr.bf16.gmra.mxu1 %v7855_v59  ;;  %7021 = vmatprep.mubr.msk.bf16.mxu0 %vm947_vm0, %v7856_v17 }
 0x349   : > { %v4260_v41 = vpop.f32.mrf.mxu0  ;;  %7189 = vmatprep.mubr.msk.bf16.mxu1 %vm947_vm0, %v7858_v46 }
 0x34a   : > { %v5749_v39 = vpop.f32.mrf.mxu1 }
 0x34b   : > { %v9561_v25 = vpop.f32.mrf.mxu0 }
 0x34c   : > { %v9564_v42 = vpop.f32.mrf.mxu1 }
 0x34d   : > { %v4263_v28 = vpop.f32.mrf.mxu0 }
 0x34e   : > { %v5752_v59 = vpop.f32.mrf.mxu1 }
 0x34f   : > { %v9569_v48 = vpop.f32.mrf.mxu0  ;;  %4457 = vmatmul.mubr.bf16.gmra.mxu0 %v7860_v11  ;;  %v7868_v59 = vld [vmem:[%s8071_s10 + $0x9d4] ss:$8 sps:$4 sm:$0xff]  }
 0x350   : > { %v9571_v17 = vpop.f32.mrf.mxu1  ;;  %5946 = vmatmul.mubr.bf16.gmra.mxu1 %v7861_v21  ;;  %7022 = vmatprep.mubr.msk.bf16.mxu0 %vm947_vm0, %v7862_v44 }
 0x351   : > { %v4268_v46 = vpop.f32.mrf.mxu0  ;;  %7190 = vmatprep.mubr.msk.bf16.mxu1 %vm947_vm0, %v7864_v15 }
 0x352   : > { %v5757_v41 = vpop.f32.mrf.mxu1 }
 0x353   : > { %v9575_v39 = vpop.f32.mrf.mxu0 }
 0x354   : > { %v9578_v28 = vpop.f32.mrf.mxu1 }
 0x355   : > { %v4271_v11 = vpop.f32.mrf.mxu0 }
 0x356   : > { %v5760_v21 = vpop.f32.mrf.mxu1 }
 0x357   : > { %v9583_v2 = vpop.f32.mrf.mxu0  ;;  %4465 = vmatmul.mubr.bf16.gmra.mxu0 %v7866_v5  ;;  %v7874_v21 = vld [vmem:[%s8071_s10 + $0x9e4] ss:$8 sps:$4 sm:$0xff]  }
 0x358   : > { %v9585_v44 = vpop.f32.mrf.mxu1  ;;  %5954 = vmatmul.mubr.bf16.gmra.mxu1 %v7867_v34  ;;  %7023 = vmatprep.mubr.msk.bf16.mxu0 %vm947_vm0, %v7868_v59 }
 0x359   : > { %10403 = vst [vmem:[#allocation62_spill] sm:$0xff] %v9585_v44  ;;  %v4276_v15 = vpop.f32.mrf.mxu0  ;;  %7191 = vmatprep.mubr.msk.bf16.mxu1 %vm947_vm0, %v7870_v14  ;;  %v7916_v44 = vld [vmem:[%s8071_s10 + $0xa54] ss:$8 sps:$4 sm:$0xff]  }
 0x35a   : > { %v5765_v46 = vpop.f32.mrf.mxu1 }
 0x35b   : > { %v9589_v41 = vpop.f32.mrf.mxu0 }
 0x35c   : > { %10404 = vst [vmem:[#allocation63_spill] sm:$0xff] %v9589_v41  ;;  %v9592_v11 = vpop.f32.mrf.mxu1  ;;  %v7879_v41 = vld [vmem:[%s8071_s10 + $0xd60] ss:$8 sps:$4 sm:$0xff]  }
 0x35d   : > { %10405 = vst [vmem:[#allocation64_spill] sm:$0xff] %v9592_v11  ;;  %v4279_v5 = vpop.f32.mrf.mxu0  ;;  %v7878_v11 = vld [vmem:[%s8071_s10 + $0x9e0] ss:$8 sps:$4 sm:$0xff]  }
 0x35e   : > { %v5768_v34 = vpop.f32.mrf.mxu1 }
 0x35f   : > { %v9597_v36 = vpop.f32.mrf.mxu0  ;;  %4473 = vmatmul.mubr.bf16.gmra.mxu0 %v7872_v31  ;;  %v7880_v34 = vld [vmem:[%s8071_s10 + $0x9f4] ss:$8 sps:$4 sm:$0xff]  }
 0x360   : > { %10406 = vst [vmem:[#allocation65_spill] sm:$0xff] %v9597_v36  ;;  %v9599_v59 = vpop.f32.mrf.mxu1  ;;  %5962 = vmatmul.mubr.bf16.gmra.mxu1 %v7873_v30  ;;  %7024 = vmatprep.mubr.msk.bf16.mxu0 %vm947_vm0, %v7874_v21  ;;  %v7882_v36 = vld [vmem:[%s8071_s10 + $0xd74] ss:$8 sps:$4 sm:$0xff]  }
 0x361   : > { %10407 = vst [vmem:[#allocation66_spill] sm:$0xff] %v9599_v59  ;;  %v4284_v14 = vpop.f32.mrf.mxu0  ;;  %7192 = vmatprep.mubr.msk.bf16.mxu1 %vm947_vm0, %v7876_v29 }
 0x362   : > { %v5773_v15 = vpop.f32.mrf.mxu1 }
 0x363   : > { %v9603_v46 = vpop.f32.mrf.mxu0 }
 0x364   : > { %10408 = vst [vmem:[#allocation67_spill] sm:$0xff] %v9603_v46  ;;  %v9606_v5 = vpop.f32.mrf.mxu1  ;;  %v7885_v46 = vld [vmem:[%s8071_s10 + $0xd70] ss:$8 sps:$4 sm:$0xff]  }
 0x365   : > { %10409 = vst [vmem:[#allocation68_spill] sm:$0xff] %v9606_v5  ;;  %v4287_v31 = vpop.f32.mrf.mxu0  ;;  %v7884_v5 = vld [vmem:[%s8071_s10 + $0x9f0] ss:$8 sps:$4 sm:$0xff]  }
 0x366   : > { %v5776_v30 = vpop.f32.mrf.mxu1 }
 0x367   : > { %v9611_v59 = vpop.f32.mrf.mxu0  ;;  %4481 = vmatmul.mubr.bf16.gmra.mxu0 %v7878_v11  ;;  %v7886_v30 = vld [vmem:[%s8071_s10 + $0xa04] ss:$8 sps:$4 sm:$0xff]  }
 0x368   : > { %10410 = vst [vmem:[#allocation69_spill] sm:$0xff] %v9611_v59  ;;  %v9613_v21 = vpop.f32.mrf.mxu1  ;;  %5970 = vmatmul.mubr.bf16.gmra.mxu1 %v7879_v41  ;;  %7025 = vmatprep.mubr.msk.bf16.mxu0 %vm947_vm0, %v7880_v34  ;;  %v7888_v59 = vld [vmem:[%s8071_s10 + $0xd84] ss:$8 sps:$4 sm:$0xff]  }
 0x369   : > { %10411 = vst [vmem:[#allocation70_spill] sm:$0xff] %v9613_v21  ;;  %v4292_v29 = vpop.f32.mrf.mxu0  ;;  %7193 = vmatprep.mubr.msk.bf16.mxu1 %vm947_vm0, %v7882_v36 }
 0x36a   : > { %v5781_v14 = vpop.f32.mrf.mxu1 }
 0x36b   : > { %v9617_v15 = vpop.f32.mrf.mxu0 }
 0x36c   : > { %10412 = vst [vmem:[#allocation71_spill] sm:$0xff] %v9617_v15  ;;  %v9620_v31 = vpop.f32.mrf.mxu1  ;;  %v7891_v15 = vld [vmem:[%s8071_s10 + $0xd80] ss:$8 sps:$4 sm:$0xff]  }
 0x36d   : > { %10413 = vst [vmem:[#allocation72_spill] sm:$0xff] %v9620_v31  ;;  %v4295_v11 = vpop.f32.mrf.mxu0  ;;  %v7890_v31 = vld [vmem:[%s8071_s10 + $0xa00] ss:$8 sps:$4 sm:$0xff]  }
 0x36e   : > { %v5784_v41 = vpop.f32.mrf.mxu1 }
 0x36f   : > { %v9625_v21 = vpop.f32.mrf.mxu0  ;;  %4489 = vmatmul.mubr.bf16.gmra.mxu0 %v7884_v5  ;;  %v7892_v41 = vld [vmem:[%s8071_s10 + $0xa14] ss:$8 sps:$4 sm:$0xff]  }
 0x370   : > { %10414 = vst [vmem:[#allocation73_spill] sm:$0xff] %v9625_v21  ;;  %v9627_v34 = vpop.f32.mrf.mxu1  ;;  %5978 = vmatmul.mubr.bf16.gmra.mxu1 %v7885_v46  ;;  %7026 = vmatprep.mubr.msk.bf16.mxu0 %vm947_vm0, %v7886_v30  ;;  %v7894_v21 = vld [vmem:[%s8071_s10 + $0xd94] ss:$8 sps:$4 sm:$0xff]  }
 0x371   : > { %10415 = vst [vmem:[#allocation74_spill] sm:$0xff] %v9627_v34  ;;  %v4300_v36 = vpop.f32.mrf.mxu0  ;;  %7194 = vmatprep.mubr.msk.bf16.mxu1 %vm947_vm0, %v7888_v59 }
 0x372   : > { %v5789_v29 = vpop.f32.mrf.mxu1 }
 0x373   : > { %v9631_v14 = vpop.f32.mrf.mxu0 }
 0x374   : > { %10416 = vst [vmem:[#allocation75_spill] sm:$0xff] %v9631_v14  ;;  %v9634_v11 = vpop.f32.mrf.mxu1  ;;  %v7897_v14 = vld [vmem:[%s8071_s10 + $0xd90] ss:$8 sps:$4 sm:$0xff]  }
 0x375   : > { %10417 = vst [vmem:[#allocation76_spill] sm:$0xff] %v9634_v11  ;;  %v4303_v5 = vpop.f32.mrf.mxu0  ;;  %v7896_v11 = vld [vmem:[%s8071_s10 + $0xa10] ss:$8 sps:$4 sm:$0xff]  }
 0x376   : > { %v5792_v46 = vpop.f32.mrf.mxu1 }
 0x377   : > { %v9639_v34 = vpop.f32.mrf.mxu0  ;;  %4497 = vmatmul.mubr.bf16.gmra.mxu0 %v7890_v31  ;;  %v7898_v46 = vld [vmem:[%s8071_s10 + $0xa24] ss:$8 sps:$4 sm:$0xff]  }
 0x378   : > { %10418 = vst [vmem:[#allocation77_spill] sm:$0xff] %v9639_v34  ;;  %v9641_v30 = vpop.f32.mrf.mxu1  ;;  %5986 = vmatmul.mubr.bf16.gmra.mxu1 %v7891_v15  ;;  %7027 = vmatprep.mubr.msk.bf16.mxu0 %vm947_vm0, %v7892_v41  ;;  %v7900_v34 = vld [vmem:[%s8071_s10 + $0xda4] ss:$8 sps:$4 sm:$0xff]  }
 0x379   : > { %10419 = vst [vmem:[#allocation78_spill] sm:$0xff] %v9641_v30  ;;  %v4308_v59 = vpop.f32.mrf.mxu0  ;;  %7195 = vmatprep.mubr.msk.bf16.mxu1 %vm947_vm0, %v7894_v21 }
 0x37a   : > { %v5797_v36 = vpop.f32.mrf.mxu1 }
 0x37b   : > { %v9645_v29 = vpop.f32.mrf.mxu0 }
 0x37c   : > { %10420 = vst [vmem:[#allocation79_spill] sm:$0xff] %v9645_v29  ;;  %v9648_v5 = vpop.f32.mrf.mxu1  ;;  %v7903_v29 = vld [vmem:[%s8071_s10 + $0xda0] ss:$8 sps:$4 sm:$0xff]  }
 0x37d   : > { %10421 = vst [vmem:[#allocation80_spill] sm:$0xff] %v9648_v5  ;;  %v4311_v31 = vpop.f32.mrf.mxu0  ;;  %v7902_v5 = vld [vmem:[%s8071_s10 + $0xa20] ss:$8 sps:$4 sm:$0xff]  }
 0x37e   : > { %v5800_v15 = vpop.f32.mrf.mxu1 }
 0x37f   : > { %v9653_v30 = vpop.f32.mrf.mxu0  ;;  %4505 = vmatmul.mubr.bf16.gmra.mxu0 %v7896_v11  ;;  %v7904_v15 = vld [vmem:[%s8071_s10 + $0xa34] ss:$8 sps:$4 sm:$0xff]  }
 0x380   : > { %10422 = vst [vmem:[#allocation81_spill] sm:$0xff] %v9653_v30  ;;  %v9655_v41 = vpop.f32.mrf.mxu1  ;;  %5994 = vmatmul.mubr.bf16.gmra.mxu1 %v7897_v14  ;;  %7028 = vmatprep.mubr.msk.bf16.mxu0 %vm947_vm0, %v7898_v46  ;;  %v7906_v30 = vld [vmem:[%s8071_s10 + $0xdb4] ss:$8 sps:$4 sm:$0xff]  }
 0x381   : > { %10423 = vst [vmem:[#allocation82_spill] sm:$0xff] %v9655_v41  ;;  %v4316_v21 = vpop.f32.mrf.mxu0  ;;  %7196 = vmatprep.mubr.msk.bf16.mxu1 %vm947_vm0, %v7900_v34 }
 0x382   : > { %v5805_v59 = vpop.f32.mrf.mxu1 }
 0x383   : > { %v9659_v36 = vpop.f32.mrf.mxu0 }
 0x384   : > { %10424 = vst [vmem:[#allocation83_spill] sm:$0xff] %v9659_v36  ;;  %v9662_v31 = vpop.f32.mrf.mxu1  ;;  %v7909_v36 = vld [vmem:[%s8071_s10 + $0xdb0] ss:$8 sps:$4 sm:$0xff]  }
 0x385   : > { %10425 = vst [vmem:[#allocation84_spill] sm:$0xff] %v9662_v31  ;;  %v4319_v11 = vpop.f32.mrf.mxu0  ;;  %v7908_v31 = vld [vmem:[%s8071_s10 + $0xa30] ss:$8 sps:$4 sm:$0xff]  }
 0x386   : > { %v5808_v14 = vpop.f32.mrf.mxu1 }
 0x387   : > { %v9667_v41 = vpop.f32.mrf.mxu0  ;;  %4513 = vmatmul.mubr.bf16.gmra.mxu0 %v7902_v5  ;;  %v7910_v14 = vld [vmem:[%s8071_s10 + $0xa44] ss:$8 sps:$4 sm:$0xff]  }
 0x388   : > { %10426 = vst [vmem:[#allocation85_spill] sm:$0xff] %v9667_v41  ;;  %v9669_v46 = vpop.f32.mrf.mxu1  ;;  %6002 = vmatmul.mubr.bf16.gmra.mxu1 %v7903_v29  ;;  %7029 = vmatprep.mubr.msk.bf16.mxu0 %vm947_vm0, %v7904_v15  ;;  %v7912_v41 = vld [vmem:[%s8071_s10 + $0xdc4] ss:$8 sps:$4 sm:$0xff]  }
 0x389   : > { %10427 = vst [vmem:[#allocation86_spill] sm:$0xff] %v9669_v46  ;;  %v4324_v34 = vpop.f32.mrf.mxu0  ;;  %7197 = vmatprep.mubr.msk.bf16.mxu1 %vm947_vm0, %v7906_v30 }
 0x38a   : > { %v5813_v21 = vpop.f32.mrf.mxu1 }
 0x38b   : > { %v9673_v59 = vpop.f32.mrf.mxu0 }
 0x38c   : > { %10428 = vst [vmem:[#allocation87_spill] sm:$0xff] %v9673_v59  ;;  %v9676_v11 = vpop.f32.mrf.mxu1 }
 0x38d   : > { %10429 = vst [vmem:[#allocation88_spill] sm:$0xff] %v9676_v11  ;;  %v4327_v5 = vpop.f32.mrf.mxu0  ;;  %v7914_v11 = vld [vmem:[%s8071_s10 + $0xa40] ss:$8 sps:$4 sm:$0xff]  }
 0x38e   : > { %v5816_v29 = vpop.f32.mrf.mxu1  ;;  %v7915_v5 = vld [vmem:[%s8071_s10 + $0xdc0] ss:$8 sps:$4 sm:$0xff]  }
 0x38f   : > { %v9681_v46 = vpop.f32.mrf.mxu0  ;;  %4521 = vmatmul.mubr.bf16.gmra.mxu0 %v7908_v31  ;;  %v4561_v31 = vmax.f32 %v9291_v4, %v9499_v40  ;;  %v4562_v4 = vmax.f32 %v9301_v32, %v9505_v19  ;;  %v6051_v40 = vmax.f32 %v9303_v47, %v9508_v51  ;;  %v6052_v19 = vmax.f32 %v9313_v1, %v9515_v63 }
 0x390   : > { %v9683_v15 = vpop.f32.mrf.mxu1  ;;  %6010 = vmatmul.mubr.bf16.gmra.mxu1 %v7909_v36  ;;  %7030 = vmatprep.mubr.msk.bf16.mxu0 %vm947_vm0, %v7910_v14  ;;  %v6050_v14 = vmax.f32 %v9293_v24, %v9501_v56 }
 0x391   : > { %v4332_v30 = vpop.f32.mrf.mxu0  ;;  %7198 = vmatprep.mubr.msk.bf16.mxu1 %vm947_vm0, %v7912_v41 }
 0x392   : > { %v5821_v34 = vpop.f32.mrf.mxu1 }
 0x393   : > { %v9687_v21 = vpop.f32.mrf.mxu0 }
 0x394   : > { %v9690_v59 = vpop.f32.mrf.mxu1 }
 0x395   : > { %10430 = vst [vmem:[#allocation89_spill] sm:$0xff] %v9690_v59  ;;  %v4335_v29 = vpop.f32.mrf.mxu0 }
 0x396   : > { %v5824_v36 = vpop.f32.mrf.mxu1 }
 0x397   : > { %v4338_v30 = vpop.f32.mrf.mxu0  ;;  %4529 = vmatmul.mubr.bf16.gmra.mxu0 %v7914_v11  ;;  %v7920_v11 = vld [vmem:[%s8071_s10 + $0xa50] ss:$8 sps:$4 sm:$0xff]  }
 0x398   : > { %v9699_v41 = vmax.f32 %v4561_v31, %v4338_v30  ;;  %v5827_v34 = vpop.f32.mrf.mxu1  ;;  %6018 = vmatmul.mubr.bf16.gmra.mxu1 %v7915_v5  ;;  %7031 = vmatprep.mubr.msk.bf16.mxu0 %vm947_vm0, %v7916_v44  ;;  %v7921_v36 = vld [vmem:[%s8071_s10 + $0xdd0] ss:$8 sps:$4 sm:$0xff]   ;;  %v7922_v30 = vld [vmem:[%s8071_s10 + $0xa64] ss:$8 sps:$4 sm:$0xff]  }
 0x399   : > { %v9702_v29 = vmax.f32 %v6050_v14, %v5827_v34  ;;  %v4340_v59 = vpop.f32.mrf.mxu0  ;;  %7199 = vmatprep.mubr.msk.bf16.mxu1 %vm947_vm0, %v7918_v58  ;;  %v4563_v58 = vmax.f32 %v9311_v55, %v9513_v10  ;;  %v4564_v55 = vmax.f32 %v9321_v18, %v9519_v33  ;;  %v6053_v10 = vmax.f32 %v9323_v50, %v9522_v26 }
 0x39a   : > { %v5829_v24 = vpop.f32.mrf.mxu1  ;;  %v7924_v59 = vld [vmem:[%s8071_s10 + $0xde4] ss:$8 sps:$4 sm:$0xff]   ;;  %v6054_v33 = vmax.f32 %v9333_v20, %v9529_v60  ;;  %v6055_v20 = vmax.f32 %v9339_v52, %v9536_v9 }
 0x39b   : > { %v4341_v56 = vpop.f32.mrf.mxu0 }
 0x39c   : > { %v9710_v31 = vmax.f32 %v4562_v4, %v4341_v56  ;;  %v5830_v5 = vpop.f32.mrf.mxu1 }
 0x39d   : > { %v9714_v44 = vmax.f32 %v6051_v40, %v5830_v5  ;;  %v4343_v14 = vpop.f32.mrf.mxu0  ;;  %v7926_v40 = vld [vmem:[%s8071_s10 + $0xa60] ss:$8 sps:$4 sm:$0xff]  }
 0x39e   : > { %v5832_v32 = vpop.f32.mrf.mxu1  ;;  %v7927_v5 = vld [vmem:[%s8071_s10 + $0xde0] ss:$8 sps:$4 sm:$0xff]  }
 0x39f   : > { %v4346_v47 = vpop.f32.mrf.mxu0  ;;  %4537 = vmatmul.mubr.bf16.gmra.mxu0 %v7920_v11 }
 0x3a0   : > { %v9721_v51 = vmax.f32 %v4563_v58, %v4346_v47  ;;  %v5835_v34 = vpop.f32.mrf.mxu1  ;;  %6026 = vmatmul.mubr.bf16.gmra.mxu1 %v7921_v36  ;;  %7032 = vmatprep.mubr.msk.bf16.mxu0 %vm947_vm0, %v7922_v30  ;;  %v7928_v36 = vld [vmem:[%s8071_s10 + $0xa74] ss:$8 sps:$4 sm:$0xff]  }
 0x3a1   : > { %v9724_v4 = vmax.f32 %v6052_v19, %v5835_v34  ;;  %v4348_v24 = vpop.f32.mrf.mxu0  ;;  %7200 = vmatprep.mubr.msk.bf16.mxu1 %vm947_vm0, %v7924_v59  ;;  %v7930_v58 = vld [vmem:[%s8071_s10 + $0xdf4] ss:$8 sps:$4 sm:$0xff]   ;;  %v4565_v59 = vmax.f32 %v9331_v61, %v9527_v22  ;;  %v4566_v61 = vmax.f32 %v9337_v53, %v9533_v0  ;;  %v7932_v34 = vld [vmem:[%s8071_s10 + $0xa70] ss:$8 sps:$4 sm:$0xff]   ;;  %v6056_v53 = vmax.f32 %v9347_v13, %v9543_v38 }
 0x3a2   : > { %v5837_v1 = vpop.f32.mrf.mxu1 }
 0x3a3   : > { %v4349_v63 = vpop.f32.mrf.mxu0  ;;  %v7933_v1 = vld [vmem:[%s8071_s10 + $0xdf0] ss:$8 sps:$4 sm:$0xff]   ;;  %s7208_s10 = smul.u32 14, %s10562_s16 }
 0x3a4   : > { %v9732_v56 = vmax.f32 %v4564_v55, %v4349_v63  ;;  %v5838_v11 = vpop.f32.mrf.mxu1 }
 0x3a5   : > { %v9736_v30 = vmax.f32 %v6053_v10, %v5838_v11  ;;  %v4351_v14 = vpop.f32.mrf.mxu0  ;;  %s248_s11 = sadd.s32 %s7208_s10, %s10564_s15 }
 0x3a6   : > { %v5840_v18 = vpop.f32.mrf.mxu1  ;;  %v4568_v14 = vmax.f32 %v9351_v6, %v9547_v12  ;;  %s249_s14 = scalar_lea.vmem %s10174_s4, %s248_s11 }
 0x3a7   : > { %v4354_v50 = vpop.f32.mrf.mxu0  ;;  %4545 = vmatmul.mubr.bf16.gmra.mxu0 %v7926_v40  ;;  %v4567_v40 = vmax.f32 %v9345_v54, %v9541_v8  ;;  %v6057_v54 = vmax.f32 %v9353_v57, %v9550_v43  ;;  %v4570_v43 = vmax.f32 %v9365_v16, %v9561_v25 }
 0x3a8   : > { %v9743_v26 = vmax.f32 %v4565_v59, %v4354_v50  ;;  %v5843_v32 = vpop.f32.mrf.mxu1  ;;  %6034 = vmatmul.mubr.bf16.gmra.mxu1 %v7927_v5  ;;  %7033 = vmatprep.mubr.msk.bf16.mxu0 %vm947_vm0, %v7928_v36 }
 0x3a9   : > { %v9746_v19 = vmax.f32 %v6054_v33, %v5843_v32  ;;  %v4356_v47 = vpop.f32.mrf.mxu0  ;;  %7201 = vmatprep.mubr.msk.bf16.mxu1 %vm947_vm0, %v7930_v58  ;;  %v4569_v33 = vmax.f32 %v9359_v37, %v9555_v35  ;;  %v6058_v32 = vmax.f32 %v9361_v23, %v9557_v7  ;;  %v4571_v7 = vmax.f32 %v9373_v27, %v9569_v48 }
 0x3aa   : > { %v5845_v22 = vpop.f32.mrf.mxu1 }
 0x3ab   : > { %v4357_v60 = vpop.f32.mrf.mxu0 }
 0x3ac   : > { %v9754_v24 = vmax.f32 %v4566_v61, %v4357_v60  ;;  %v5846_v55 = vpop.f32.mrf.mxu1 }
 0x3ad   : > { %v9757_v10 = vmax.f32 %v6055_v20, %v5846_v55  ;;  %v4359_v63 = vpop.f32.mrf.mxu0  ;;  %v6059_v20 = vmax.f32 %v9367_v49, %v9564_v42  ;;  %v4572_v42 = vmax.f32 %v9379_v3, %v9575_v39 }
 0x3ae   : > { %v5848_v11 = vpop.f32.mrf.mxu1 }
 0x3af   : > { %v4362_v0 = vpop.f32.mrf.mxu0  ;;  %4553 = vmatmul.mubr.bf16.gmra.mxu0 %v7932_v34 }
 0x3b0   : > { %v9763_v5 = vmax.f32 %v4567_v40, %v4362_v0  ;;  %v5851_v52 = vpop.f32.mrf.mxu1  ;;  %6042 = vmatmul.mubr.bf16.gmra.mxu1 %v7933_v1  ;;  %v6060_v1 = vmax.f32 %v9375_v62, %v9571_v17  ;;  %v10431_v17 = vld [vmem:[#allocation21_spill] sm:$0xff] }
 0x3b1   : > { %v9765_v9 = vmax.f32 %v6056_v53, %v5851_v52  ;;  %v4364_v36 = vpop.f32.mrf.mxu0  ;;  %v6061_v53 = vmax.f32 %v9381_v45, %v9578_v28  ;;  %v10434_v28 = vld [vmem:[#allocation63_spill] sm:$0xff] }
 0x3b2   : > { %v5853_v58 = vpop.f32.mrf.mxu1  ;;  %v4573_v36 = vmax.f32 %v10431_v17, %v9583_v2 }
 0x3b3   : > { %v4365_v8 = vpop.f32.mrf.mxu0  ;;  %v10432_v58 = vld [vmem:[#allocation62_spill] sm:$0xff] }
 0x3b4   : > { %v9771_v59 = vmax.f32 %v4568_v14, %v4365_v8  ;;  %v5854_v13 = vpop.f32.mrf.mxu1 }
 0x3b5   : > { %v9773_v38 = vmax.f32 %v6057_v54, %v5854_v13  ;;  %v4367_v18 = vpop.f32.mrf.mxu0  ;;  %v10433_v54 = vld [vmem:[#allocation53_spill] sm:$0xff] }
 0x3b6   : > { %v5856_v50 = vpop.f32.mrf.mxu1  ;;  %v6062_v8 = vmax.f32 %v10433_v54, %v10432_v58  ;;  %v10445_v58 = vld [vmem:[#allocation56_spill] sm:$0xff] }
 0x3b7   : > { %v4370_v47 = vpop.f32.mrf.mxu0 }
 0x3b8   : > { %v9779_v6 = vmax.f32 %v4569_v33, %v4370_v47  ;;  %v5859_v12 = vpop.f32.mrf.mxu1  ;;  %v10435_v33 = vld [vmem:[#allocation22_spill] sm:$0xff]  ;;  %v10436_v47 = vld [vmem:[#allocation64_spill] sm:$0xff] }
 0x3b9   : > { %v9781_v61 = vmax.f32 %v6058_v32, %v5859_v12  ;;  %v4372_v57 = vpop.f32.mrf.mxu0  ;;  %v4574_v50 = vmax.f32 %v10435_v33, %v10434_v28  ;;  %v10437_v12 = vld [vmem:[#allocation54_spill] sm:$0xff]  ;;  %v10446_v33 = vld [vmem:[#allocation69_spill] sm:$0xff] }
 0x3ba   : > { %v5861_v22 = vpop.f32.mrf.mxu1  ;;  %v6063_v57 = vmax.f32 %v10437_v12, %v10436_v47  ;;  %v10448_v12 = vld [vmem:[#allocation70_spill] sm:$0xff] }
 0x3bb   : > { %v4373_v60 = vpop.f32.mrf.mxu0 }
 0x3bc   : > { %v9787_v37 = vmax.f32 %v4570_v43, %v4373_v60  ;;  %v5862_v35 = vpop.f32.mrf.mxu1 }
 0x3bd   : > { %v9789_v34 = vmax.f32 %v6059_v20, %v5862_v35  ;;  %v4375_v23 = vpop.f32.mrf.mxu0  ;;  %v10438_v35 = vld [vmem:[#allocation65_spill] sm:$0xff] }
 0x3be   : > { %v5864_v55 = vpop.f32.mrf.mxu1  ;;  %v10439_v23 = vld [vmem:[#allocation23_spill] sm:$0xff] }
 0x3bf   : > { %v4378_v63 = vpop.f32.mrf.mxu0 }
 0x3c0   : > { %v9795_v16 = vmax.f32 %v4571_v7, %v4378_v63  ;;  %v5867_v25 = vpop.f32.mrf.mxu1  ;;  %v4575_v7 = vmax.f32 %v10439_v23, %v10438_v35  ;;  %v10441_v63 = vld [vmem:[#allocation55_spill] sm:$0xff] }
 0x3c1   : > { %v9797_v40 = vmax.f32 %v6060_v1, %v5867_v25  ;;  %v4380_v49 = vpop.f32.mrf.mxu0  ;;  %v10440_v1 = vld [vmem:[#allocation66_spill] sm:$0xff] }
 0x3c2   : > { %v5869_v11 = vpop.f32.mrf.mxu1  ;;  %v6064_v25 = vmax.f32 %v10441_v63, %v10440_v1  ;;  %v10451_v1 = vld [vmem:[#allocation26_spill] sm:$0xff] }
 0x3c3   : > { %v4381_v0 = vpop.f32.mrf.mxu0 }
 0x3c4   : > { %v9803_v27 = vmax.f32 %v4572_v42, %v4381_v0  ;;  %v5870_v48 = vpop.f32.mrf.mxu1 }
 0x3c5   : > { %v9805_v52 = vmax.f32 %v6061_v53, %v5870_v48  ;;  %v4383_v62 = vpop.f32.mrf.mxu0  ;;  %v10442_v48 = vld [vmem:[#allocation67_spill] sm:$0xff] }
 0x3c6   : > { %v5872_v14 = vpop.f32.mrf.mxu1  ;;  %v10443_v62 = vld [vmem:[#allocation24_spill] sm:$0xff] }
 0x3c7   : > { %v4386_v13 = vpop.f32.mrf.mxu0  ;;  %v4576_v17 = vmax.f32 %v10443_v62, %v10442_v48  ;;  %v10444_v14 = vld [vmem:[#allocation68_spill] sm:$0xff] }
 0x3c8   : > { %v9811_v3 = vmax.f32 %v4573_v36, %v4386_v13  ;;  %v5875_v39 = vpop.f32.mrf.mxu1  ;;  %v6065_v54 = vmax.f32 %v10445_v58, %v10444_v14  ;;  %v10454_v58 = vld [vmem:[#allocation73_spill] sm:$0xff] }
 0x3c9   : > { %v9813_v18 = vmax.f32 %v6062_v8, %v5875_v39  ;;  %v4388_v45 = vpop.f32.mrf.mxu0 }
 0x3ca   : > { %v5877_v32 = vpop.f32.mrf.mxu1 }
 0x3cb   : > { %v4389_v43 = vpop.f32.mrf.mxu0 }
 0x3cc   : > { %v9819_v2 = vmax.f32 %v4574_v50, %v4389_v43  ;;  %v5878_v22 = vpop.f32.mrf.mxu1  ;;  %v10447_v50 = vld [vmem:[#allocation25_spill] sm:$0xff] }
 0x3cd   : > { %v9821_v20 = vmax.f32 %v6063_v57, %v5878_v22  ;;  %v4391_v60 = vpop.f32.mrf.mxu0  ;;  %v4577_v32 = vmax.f32 %v10447_v50, %v10446_v33  ;;  %v10449_v57 = vld [vmem:[#allocation57_spill] sm:$0xff]  ;;  %v10457_v33 = vld [vmem:[#allocation59_spill] sm:$0xff] }
 0x3ce   : > { %v5880_v55 = vpop.f32.mrf.mxu1  ;;  %v6066_v43 = vmax.f32 %v10449_v57, %v10448_v12 }
 0x3cf   : > { %v4394_v49 = vpop.f32.mrf.mxu0  ;;  %v10450_v55 = vld [vmem:[#allocation71_spill] sm:$0xff] }
 0x3d0   : > { %v9827_v42 = vmax.f32 %v4575_v7, %v4394_v49  ;;  %v5883_v11 = vpop.f32.mrf.mxu1  ;;  %v4578_v63 = vmax.f32 %v10451_v1, %v10450_v55  ;;  %v10452_v49 = vld [vmem:[#allocation72_spill] sm:$0xff] }
 0x3d1   : > { %v9829_v53 = vmax.f32 %v6064_v25, %v5883_v11  ;;  %v4396_v0 = vpop.f32.mrf.mxu0  ;;  %v10453_v11 = vld [vmem:[#allocation58_spill] sm:$0xff]  ;;  %v10460_v1 = vld [vmem:[#allocation76_spill] sm:$0xff] }
 0x3d2   : > { %v5885_v36 = vpop.f32.mrf.mxu1  ;;  %v6067_v0 = vmax.f32 %v10453_v11, %v10452_v49 }
 0x3d3   : > { %v4397_v8 = vpop.f32.mrf.mxu0 }
 0x3d4   : > { %v9835_v13 = vmax.f32 %v4576_v17, %v4397_v8  ;;  %v5886_v39 = vpop.f32.mrf.mxu1 }
 0x3d5   : > { %v9837_v45 = vmax.f32 %v6065_v54, %v5886_v39  ;;  %v4399_v28 = vpop.f32.mrf.mxu0  ;;  %v10455_v54 = vld [vmem:[#allocation27_spill] sm:$0xff] }
 0x3d6   : > { %v5888_v47 = vpop.f32.mrf.mxu1  ;;  %v4579_v8 = vmax.f32 %v10455_v54, %v10454_v58  ;;  %v10456_v28 = vld [vmem:[#allocation74_spill] sm:$0xff]  ;;  %v10463_v58 = vld [vmem:[#allocation29_spill] sm:$0xff] }
 0x3d7   : > { %v4402_v22 = vpop.f32.mrf.mxu0  ;;  %v6068_v50 = vmax.f32 %v10457_v33, %v10456_v28  ;;  %v10465_v28 = vld [vmem:[#allocation61_spill] sm:$0xff] }
 0x3d8   : > { %v9843_v60 = vmax.f32 %v4577_v32, %v4402_v22  ;;  %v5891_v35 = vpop.f32.mrf.mxu1  ;;  %v10458_v22 = vld [vmem:[#allocation75_spill] sm:$0xff] }
 0x3d9   : > { %v9845_v23 = vmax.f32 %v6066_v43, %v5891_v35  ;;  %v4404_v7 = vpop.f32.mrf.mxu0  ;;  %v10459_v35 = vld [vmem:[#allocation28_spill] sm:$0xff] }
 0x3da   : > { %v5893_v25 = vpop.f32.mrf.mxu1  ;;  %v4580_v7 = vmax.f32 %v10459_v35, %v10458_v22  ;;  %v10467_v35 = vld [vmem:[#allocation79_spill] sm:$0xff] }
 0x3db   : > { %v4405_v48 = vpop.f32.mrf.mxu0 }
 0x3dc   : > { %v9851_v62 = vmax.f32 %v4578_v63, %v4405_v48  ;;  %v5894_v17 = vpop.f32.mrf.mxu1  ;;  %v10461_v63 = vld [vmem:[#allocation60_spill] sm:$0xff] }
 0x3dd   : > { %v9853_v36 = vmax.f32 %v6067_v0, %v5894_v17  ;;  %v4407_v14 = vpop.f32.mrf.mxu0  ;;  %v6069_v25 = vmax.f32 %v10461_v63, %v10460_v1  ;;  %v10469_v63 = vld [vmem:[#allocation80_spill] sm:$0xff] }
 0x3de   : > { %v5896_v39 = vpop.f32.mrf.mxu1  ;;  %v10462_v14 = vld [vmem:[#allocation77_spill] sm:$0xff] }
 0x3df   : > { %v4410_v32 = vpop.f32.mrf.mxu0  ;;  %v4581_v54 = vmax.f32 %v10463_v58, %v10462_v14  ;;  %v10464_v39 = vld [vmem:[#allocation78_spill] sm:$0xff] }
 0x3e0   : > { %v9859_v47 = vmax.f32 %v4579_v8, %v4410_v32  ;;  %v5899_v12 = vpop.f32.mrf.mxu1  ;;  %v6070_v33 = vmax.f32 %v10465_v28, %v10464_v39  ;;  %v10474_v39 = vld [vmem:[#allocation32_spill] sm:$0xff] }
 0x3e1   : > { %v9861_v57 = vmax.f32 %v6068_v50, %v5899_v12  ;;  %v4412_v43 = vpop.f32.mrf.mxu0 }
 0x3e2   : > { %v5901_v55 = vpop.f32.mrf.mxu1 }
 0x3e3   : > { %v4413_v49 = vpop.f32.mrf.mxu0 }
 0x3e4   : > { %v9867_v11 = vmax.f32 %v4580_v7, %v4413_v49  ;;  %v5902_v0 = vpop.f32.mrf.mxu1  ;;  %v10468_v7 = vld [vmem:[#allocation30_spill] sm:$0xff] }
 0x3e5   : > { %v9869_v48 = vmax.f32 %v6069_v25, %v5902_v0  ;;  %v4415_v17 = vpop.f32.mrf.mxu0  ;;  %v4582_v55 = vmax.f32 %v10468_v7, %v10467_v35  ;;  %v10470_v25 = vld [vmem:[#allocation31_spill] sm:$0xff] }
 0x3e6   : > { %v5904_v8 = vpop.f32.mrf.mxu1  ;;  %v6071_v49 = vmax.f32 %v10470_v25, %v10469_v63  ;;  %v10480_v25 = vld [vmem:[#allocation2_spill] sm:$0xff] }
 0x3e7   : > { %v4418_v50 = vpop.f32.mrf.mxu0 }
 0x3e8   : > { %v9875_v32 = vmax.f32 %v4581_v54, %v4418_v50  ;;  %v5907_v12 = vpop.f32.mrf.mxu1  ;;  %v10473_v54 = vld [vmem:[#allocation81_spill] sm:$0xff]  ;;  %v10475_v50 = vld [vmem:[#allocation82_spill] sm:$0xff] }
 0x3e9   : > { %v9877_v43 = vmax.f32 %v6070_v33, %v5907_v12  ;;  %v4420_v22 = vpop.f32.mrf.mxu0  ;;  %v4583_v28 = vmax.f32 %v10474_v39, %v10473_v54  ;;  %v10476_v12 = vld [vmem:[#allocation33_spill] sm:$0xff] }
 0x3ea   : > { %v5909_v1 = vpop.f32.mrf.mxu1  ;;  %v6072_v22 = vmax.f32 %v10476_v12, %v10475_v50 }
 0x3eb   : > { %10466 = vst [vmem:[#allocation21_spill] sm:$0xff] %v9877_v43  ;;  %v4421_v0 = vpop.f32.mrf.mxu0 }
 0x3ec   : > { %v9883_v17 = vmax.f32 %v4582_v55, %v4421_v0  ;;  %v5910_v14 = vpop.f32.mrf.mxu1  ;;  %v10479_v55 = vld [vmem:[#allocation83_spill] sm:$0xff] }
 0x3ed   : > { %v9885_v58 = vmax.f32 %v6071_v49, %v5910_v14  ;;  %v4423_v8 = vpop.f32.mrf.mxu0  ;;  %v4584_v0 = vmax.f32 %v10480_v25, %v10479_v55  ;;  %v10481_v14 = vld [vmem:[#allocation84_spill] sm:$0xff] }
 0x3ee   : > { %10471 = vst [vmem:[#allocation62_spill] sm:$0xff] %v9883_v17  ;;  %v5912_v33 = vpop.f32.mrf.mxu1  ;;  %v10482_v8 = vld [vmem:[#allocation34_spill] sm:$0xff] }
 0x3ef   : > { %10472 = vst [vmem:[#allocation53_spill] sm:$0xff] %v9885_v58  ;;  %v4426_v43 = vpop.f32.mrf.mxu0  ;;  %v6073_v58 = vmax.f32 %v10482_v8, %v10481_v14 }
 0x3f0   : > { %v9891_v35 = vmax.f32 %v4583_v28, %v4426_v43  ;;  %v5915_v7 = vpop.f32.mrf.mxu1  ;;  %v10485_v43 = vld [vmem:[#allocation85_spill] sm:$0xff]  ;;  %v10486_v28 = vld [vmem:[#allocation3_spill] sm:$0xff] }
 0x3f1   : > { %v9893_v1 = vmax.f32 %v6072_v22, %v5915_v7  ;;  %v4428_v63 = vpop.f32.mrf.mxu0  ;;  %v4585_v12 = vmax.f32 %v10486_v28, %v10485_v43  ;;  %v10487_v7 = vld [vmem:[#allocation86_spill] sm:$0xff] }
 0x3f2   : > { %10477 = vst [vmem:[#allocation63_spill] sm:$0xff] %v9891_v35  ;;  %v5917_v49 = vpop.f32.mrf.mxu1  ;;  %v10488_v63 = vld [vmem:[#allocation35_spill] sm:$0xff] }
 0x3f3   : > { %10478 = vst [vmem:[#allocation22_spill] sm:$0xff] %v9893_v1  ;;  %v4429_v17 = vpop.f32.mrf.mxu0  ;;  %v6074_v1 = vmax.f32 %v10488_v63, %v10487_v7  ;;  %v10495_v63 = vld [vmem:[#allocation37_spill] sm:$0xff] }
 0x3f4   : > { %v9899_v54 = vmax.f32 %v4584_v0, %v4429_v17  ;;  %v5918_v39 = vpop.f32.mrf.mxu1  ;;  %v10489_v17 = vld [vmem:[#allocation87_spill] sm:$0xff]  ;;  %v10490_v0 = vld [vmem:[#allocation4_spill] sm:$0xff] }
 0x3f5   : > { %v9901_v33 = vmax.f32 %v6073_v58, %v5918_v39  ;;  %v4431_v50 = vpop.f32.mrf.mxu0  ;;  %v4586_v8 = vmax.f32 %v10490_v0, %v10489_v17  ;;  %v10491_v39 = vld [vmem:[#allocation88_spill] sm:$0xff] }
 0x3f6   : > { %10483 = vst [vmem:[#allocation64_spill] sm:$0xff] %v9899_v54  ;;  %v5920_v22 = vpop.f32.mrf.mxu1  ;;  %v10492_v50 = vld [vmem:[#allocation36_spill] sm:$0xff] }
 0x3f7   : > { %10484 = vst [vmem:[#allocation54_spill] sm:$0xff] %v9901_v33  ;;  %v4434_v35 = vpop.f32.mrf.mxu0  ;;  %v6075_v33 = vmax.f32 %v10492_v50, %v10491_v39  ;;  %v10497_v50 = vld [vmem:[#allocation89_spill] sm:$0xff] }
 0x3f8   : > { %v9907_v55 = vmax.f32 %v4585_v12, %v4434_v35  ;;  %v5923_v25 = vpop.f32.mrf.mxu1  ;;  %v10494_v35 = vld [vmem:[#allocation5_spill] sm:$0xff] }
 0x3f9   : > { %v9909_v49 = vmax.f32 %v6074_v1, %v5923_v25  ;;  %v4436_v14 = vpop.f32.mrf.mxu0  ;;  %v4587_v12 = vmax.f32 %v10494_v35, %v9681_v46  ;;  %v6076_v25 = vmax.f32 %v10495_v63, %v9683_v15 }
 0x3fa   : > { %v5925_v58 = vpop.f32.mrf.mxu1 }
 0x3fb   : > { %v4437_v54 = vpop.f32.mrf.mxu0 }
 0x3fc   : > { %v9915_v43 = vmax.f32 %v4586_v8, %v4437_v54  ;;  %v5926_v28 = vpop.f32.mrf.mxu1  ;;  %v10496_v54 = vld [vmem:[#allocation6_spill] sm:$0xff] }
 0x3fd   : > { %v9917_v22 = vmax.f32 %v6075_v33, %v5926_v28  ;;  %v4439_v7 = vpop.f32.mrf.mxu0  ;;  %v4588_v8 = vmax.f32 %v10496_v54, %v9687_v21  ;;  %v10498_v28 = vld [vmem:[#allocation38_spill] sm:$0xff] }
 0x3fe   : > { %v5928_v1 = vpop.f32.mrf.mxu1  ;;  %v6077_v7 = vmax.f32 %v10498_v28, %v10497_v50 }
 0x3ff   : > { %10493 = vst [vmem:[#allocation65_spill] sm:$0xff] %v9917_v22  ;;  %v4442_v14 = vpop.f32.mrf.mxu0 }
 0x400   : > { %v9923_v17 = vmax.f32 %v4587_v12, %v4442_v14  ;;  %v5931_v0 = vpop.f32.mrf.mxu1 }
 0x401   : > { %v9925_v58 = vmax.f32 %v6076_v25, %v5931_v0  ;;  %v4444_v39 = vpop.f32.mrf.mxu0 }
 0x402   : > { %v5933_v33 = vpop.f32.mrf.mxu1 }
 0x403   : > { %v4445_v22 = vpop.f32.mrf.mxu0 }
 0x404   : > { %v9931_v46 = vmax.f32 %v4588_v8, %v4445_v22  ;;  %v5934_v35 = vpop.f32.mrf.mxu1 }
 0x405   : > { %v9933_v1 = vmax.f32 %v6077_v7, %v5934_v35  ;;  %v4447_v15 = vpop.f32.mrf.mxu0 }
 0x406   : > { %v5936_v12 = vpop.f32.mrf.mxu1 }
 0x407   : > { %10499 = vst [vmem:[#allocation23_spill] sm:$0xff] %v9933_v1  ;;  %v4450_v63 = vpop.f32.mrf.mxu0 }
 0x408   : > { %v4617_v25 = vmax.f32 %v9699_v41, %v4450_v63  ;;  %v5939_v14 = vpop.f32.mrf.mxu1 }
 0x409   : > { %v6106_v0 = vmax.f32 %v9702_v29, %v5939_v14  ;;  %v4452_v39 = vpop.f32.mrf.mxu0 }
 0x40a   : > { %v5941_v21 = vpop.f32.mrf.mxu1  ;;  %v4645_v28 = vsel %vm947_vm0, %v4617_v25, -inf }
 0x40b   : > { %v4453_v54 = vpop.f32.mrf.mxu0  ;;  %v6134_v15 = vsel %vm947_vm0, %v6106_v0, -inf }
 0x40c   : > { %v4618_v33 = vmax.f32 %v9710_v31, %v4453_v54  ;;  %v5942_v50 = vpop.f32.mrf.mxu1 }
 0x40d   : > { %v6107_v22 = vmax.f32 %v9714_v44, %v5942_v50  ;;  %v4455_v8 = vpop.f32.mrf.mxu0 }
 0x40e   : > { %v4646_v7 = vsel %vm947_vm0, %v4618_v33, -inf  ;;  %v5944_v35 = vpop.f32.mrf.mxu1 }
 0x40f   : > { %v4647_v41 = vmax.f32 %v4645_v28, %v4646_v7  ;;  %v6135_v12 = vsel %vm947_vm0, %v6107_v22, -inf  ;;  %v4458_v29 = vpop.f32.mrf.mxu0 }
 0x410   : > { %v6136_v63 = vmax.f32 %v6134_v15, %v6135_v12  ;;  %v4619_v14 = vmax.f32 %v9721_v51, %v4458_v29  ;;  %v5947_v39 = vpop.f32.mrf.mxu1 }
 0x411   : > { %v4648_v31 = vrot.slane %v4647_v41, 4  ;;  %v6108_v21 = vmax.f32 %v9724_v4, %v5947_v39  ;;  %v4460_v44 = vpop.f32.mrf.mxu0 }
 0x412   : > { %v6137_v54 = vrot.slane %v6136_v63, 4  ;;  %v5949_v50 = vpop.f32.mrf.mxu1  ;;  %v4654_v51 = vsel %vm947_vm0, %v4619_v14, -inf }
 0x413   : > { %v4649_v25 = vmax.f32 %v4647_v41, %v4648_v31  ;;  %v4461_v8 = vpop.f32.mrf.mxu0  ;;  %v6143_v39 = vsel %vm947_vm0, %v6108_v21, -inf }
 0x414   : > { %v6138_v33 = vmax.f32 %v6136_v63, %v6137_v54  ;;  %v4620_v35 = vmax.f32 %v9732_v56, %v4461_v8  ;;  %v5950_v0 = vpop.f32.mrf.mxu1 }
 0x415   : > { %v4650_v28 = vrot.slane %v4649_v25, 2  ;;  %v6109_v22 = vmax.f32 %v9736_v30, %v5950_v0  ;;  %v4463_v7 = vpop.f32.mrf.mxu0 }
 0x416   : > { %v6139_v15 = vrot.slane %v6138_v33, 2  ;;  %v4655_v12 = vsel %vm947_vm0, %v4620_v35, -inf  ;;  %v5952_v29 = vpop.f32.mrf.mxu1 }
 0x417   : > { %v4651_v4 = vmax.f32 %v4649_v25, %v4650_v28  ;;  %v4656_v44 = vmax.f32 %v4654_v51, %v4655_v12  ;;  %v6144_v41 = vsel %vm947_vm0, %v6109_v22, -inf  ;;  %v4466_v63 = vpop.f32.mrf.mxu0 }
 0x418   : > { %v6140_v31 = vmax.f32 %v6138_v33, %v6139_v15  ;;  %v6145_v56 = vmax.f32 %v6143_v39, %v6144_v41  ;;  %v4621_v54 = vmax.f32 %v9743_v26, %v4466_v63  ;;  %v5955_v50 = vpop.f32.mrf.mxu1  ;;  %v10500_v33 = vld [vmem:[#allocation7_spill] sm:$0xff] }
 0x419   : > { %v4652_v30 = vrot.slane %v4651_v4, 1  ;;  %v4657_v8 = vrot.slane %v4656_v44, 4  ;;  %v6110_v0 = vmax.f32 %v9746_v19, %v5955_v50  ;;  %v4468_v14 = vpop.f32.mrf.mxu0  ;;  %v10501_v15 = vld [vmem:[#allocation39_spill] sm:$0xff] }
 0x41a   : > { %v6141_v7 = vrot.slane %v6140_v31, 1  ;;  %v6146_v35 = vrot.slane %v6145_v56, 4  ;;  %v5957_v29 = vpop.f32.mrf.mxu1  ;;  %v10502_v39 = vmax.f32 %v10500_v33, %v10501_v15  ;;  %v4663_v14 = vsel %vm947_vm0, %v4621_v54, -inf  ;;  %v9967_v54 = vld [vmem:[%s10172_s2] ss:$0 sm:$0xff] }
 0x41b   : > { %v4653_v25 = vmax.f32 %v4651_v4, %v4652_v30  ;;  %v4658_v28 = vmax.f32 %v4656_v44, %v4657_v8  ;;  %v4469_v21 = vpop.f32.mrf.mxu0  ;;  %v6152_v4 = vsel %vm947_vm0, %v6110_v0, -inf }
 0x41c   : > { %v6147_v51 = vmax.f32 %v6145_v56, %v6146_v35  ;;  %v4622_v22 = vmax.f32 %v9754_v24, %v4469_v21  ;;  %v5958_v12 = vpop.f32.mrf.mxu1  ;;  %v6142_v41 = vmax.f32 %v6140_v31, %v6141_v7 }
 0x41d   : > { %v4771_v26 = vmax.f32 %v10502_v39, %v4653_v25  ;;  %v4659_v63 = vrot.slane %v4658_v28, 2  ;;  %v6111_v1 = vmax.f32 %v9757_v10, %v5958_v12  ;;  %v4471_v19 = vpop.f32.mrf.mxu0 }
 0x41e   : > { %v6148_v50 = vrot.slane %v6147_v51, 2  ;;  %v4664_v44 = vsel %vm947_vm0, %v4622_v22, -inf  ;;  %v5960_v56 = vpop.f32.mrf.mxu1  ;;  %v10504_v19 = vld [vmem:[#allocation40_spill] sm:$0xff] }
 0x41f   : > { %v6260_v24 = vmax.f32 %v4771_v26, %v6142_v41  ;;  %v4660_v30 = vmax.f32 %v4658_v28, %v4659_v63  ;;  %v4665_v8 = vmax.f32 %v4663_v14, %v4664_v44  ;;  %v6153_v35 = vsel %vm947_vm0, %v6111_v1, -inf  ;;  %v4474_v29 = vpop.f32.mrf.mxu0 }
 0x420   : > { %v6149_v31 = vmax.f32 %v6147_v51, %v6148_v50  ;;  %v6154_v7 = vmax.f32 %v6152_v4, %v6153_v35  ;;  %v4623_v10 = vmax.f32 %v9763_v5, %v4474_v29  ;;  %v5963_v25 = vpop.f32.mrf.mxu1 }
 0x421   : > { %v4661_v0 = vrot.slane %v4660_v30, 1  ;;  %v4666_v21 = vrot.slane %v4665_v8, 4  ;;  %v6112_v22 = vmax.f32 %v9765_v9, %v5963_v25  ;;  %v4476_v28 = vpop.f32.mrf.mxu0  ;;  %v6281_v5 = vadd.f32 %v9967_v54, %v6260_v24  ;;  %v10503_v9 = vld [vmem:[#allocation8_spill] sm:$0xff] }
 0x422   : > { %v6150_v12 = vrot.slane %v6149_v31, 1  ;;  %v6155_v33 = vrot.slane %v6154_v7, 4  ;;  %v5965_v1 = vpop.f32.mrf.mxu1  ;;  %v10505_v50 = vmax.f32 %v10503_v9, %v10504_v19  ;;  %v4672_v35 = vsel %vm947_vm0, %v4623_v10, -inf  ;;  %v9985_v25 = vld [vmem:[%s9973_s9] sm:$0xff] }
 0x423   : > { %v4662_v15 = vmax.f32 %v4660_v30, %v4661_v0  ;;  %v4667_v51 = vmax.f32 %v4665_v8, %v4666_v21  ;;  %v4477_v39 = vpop.f32.mrf.mxu0  ;;  %v6161_v29 = vsel %vm947_vm0, %v6112_v22, -inf  ;;  %v6295_v9 = vmax.f32 %v6281_v5, 0.0 }
 0x424   : > { %v6156_v26 = vmax.f32 %v6154_v7, %v6155_v33  ;;  %v4624_v41 = vmax.f32 %v9771_v59, %v4477_v39  ;;  %v5966_v63 = vpop.f32.mrf.mxu1  ;;  %v6151_v4 = vmax.f32 %v6149_v31, %v6150_v12  ;;  %v6313_v12 = vrot.slane %v9985_v25, 1 }
 0x425   : > { %v4772_v14 = vmax.f32 %v10505_v50, %v4662_v15  ;;  %v4668_v44 = vrot.slane %v4667_v51, 2  ;;  %v6113_v56 = vmax.f32 %v9773_v38, %v5966_v63  ;;  %v4479_v30 = vpop.f32.mrf.mxu0 }
 0x426   : > { %v6157_v8 = vrot.slane %v6156_v26, 2  ;;  %v4673_v24 = vsel %vm947_vm0, %v4624_v41, -inf  ;;  %v5968_v7 = vpop.f32.mrf.mxu1 }
 0x427   : > { %v6261_v59 = vmax.f32 %v4772_v14, %v6151_v4  ;;  %v4669_v0 = vmax.f32 %v4667_v51, %v4668_v44  ;;  %v4674_v21 = vmax.f32 %v4672_v35, %v4673_v24  ;;  %v6162_v28 = vsel %vm947_vm0, %v6113_v56, -inf  ;;  %v4482_v31 = vpop.f32.mrf.mxu0  ;;  %v10506_v24 = vld [vmem:[#allocation9_spill] sm:$0xff] }
 0x428   : > { %v6158_v38 = vmax.f32 %v6156_v26, %v6157_v8  ;;  %v6163_v33 = vmax.f32 %v6161_v29, %v6162_v28  ;;  %v4625_v1 = vmax.f32 %v9779_v6, %v4482_v31  ;;  %v5971_v10 = vpop.f32.mrf.mxu1  ;;  %v6314_v6 = vrot.slane %v9985_v25, 2 }
 0x429   : > { %v6282_v22 = vadd.f32 %v9967_v54, %v6261_v59  ;;  %v4670_v15 = vrot.slane %v4669_v0, 1  ;;  %v4675_v39 = vrot.slane %v4674_v21, 4  ;;  %v6114_v41 = vmax.f32 %v9781_v61, %v5971_v10  ;;  %v4484_v63 = vpop.f32.mrf.mxu0  ;;  %v10507_v61 = vld [vmem:[#allocation41_spill] sm:$0xff] }
 0x42a   : > { %v6159_v51 = vrot.slane %v6158_v38, 1  ;;  %v6164_v19 = vrot.slane %v6163_v33, 4  ;;  %v5973_v50 = vpop.f32.mrf.mxu1  ;;  %v10508_v7 = vmax.f32 %v10506_v24, %v10507_v61 }
 0x42b   : > { %v6296_v14 = vmax.f32 %v6282_v22, 0.0  ;;  %v4671_v4 = vmax.f32 %v4669_v0, %v4670_v15  ;;  %v4676_v44 = vmax.f32 %v4674_v21, %v4675_v39  ;;  %v4485_v56 = vpop.f32.mrf.mxu0  ;;  %v6339_v0 = vmul.f32 %v9985_v25, %v6295_v9 }
 0x42c   : > { %v6160_v26 = vmax.f32 %v6158_v38, %v6159_v51  ;;  %v6165_v30 = vmax.f32 %v6163_v33, %v6164_v19  ;;  %v4626_v8 = vmax.f32 %v9787_v37, %v4485_v56  ;;  %v5974_v35 = vpop.f32.mrf.mxu1  ;;  %v4681_v38 = vsel %vm947_vm0, %v4625_v1, -inf }
 0x42d   : > { %v6340_v29 = vmul.f32 %v6313_v12, %v6296_v14  ;;  %v4773_v5 = vmax.f32 %v10508_v7, %v4671_v4  ;;  %v4677_v59 = vrot.slane %v4676_v44, 2  ;;  %v6115_v28 = vmax.f32 %v9789_v34, %v5974_v35  ;;  %v4487_v31 = vpop.f32.mrf.mxu0 }
 0x42e   : > { %v6166_v21 = vrot.slane %v6165_v30, 2  ;;  %v4682_v10 = vsel %vm947_vm0, %v4626_v8, -inf  ;;  %v5976_v33 = vpop.f32.mrf.mxu1  ;;  %v6170_v51 = vsel %vm947_vm0, %v6114_v41, -inf  ;;  %v10510_v31 = vld [vmem:[#allocation42_spill] sm:$0xff] }
 0x42f   : > { %v6367_v22 = vrot.slane %v6340_v29, 7  ;;  %v6262_v37 = vmax.f32 %v4773_v5, %v6160_v26  ;;  %v4678_v15 = vmax.f32 %v4676_v44, %v4677_v59  ;;  %v4683_v12 = vmax.f32 %v4681_v38, %v4682_v10  ;;  %v4490_v39 = vpop.f32.mrf.mxu0 }
 0x430   : > { %v6167_v63 = vmax.f32 %v6165_v30, %v6166_v21  ;;  %v6171_v19 = vsel %vm947_vm0, %v6115_v28, -inf  ;;  %v4627_v34 = vmax.f32 %v9795_v16, %v4490_v39  ;;  %v5979_v50 = vpop.f32.mrf.mxu1  ;;  %v10509_v28 = vld [vmem:[#allocation10_spill] sm:$0xff] }
 0x431   : > { %v6283_v9 = vadd.f32 %v9967_v54, %v6262_v37  ;;  %v4679_v14 = vrot.slane %v4678_v15, 1  ;;  %v4684_v1 = vrot.slane %v4683_v12, 4  ;;  %v6172_v4 = vmax.f32 %v6170_v51, %v6171_v19  ;;  %v4492_v56 = vpop.f32.mrf.mxu0 }
 0x432   : > { %v6168_v8 = vrot.slane %v6167_v63, 1  ;;  %v6116_v26 = vmax.f32 %v9797_v40, %v5979_v50  ;;  %v5981_v44 = vpop.f32.mrf.mxu1  ;;  %v6369_v35 = vsel %vm6368_vm1, %v6367_v22, %v6339_v0  ;;  %v10511_v21 = vmax.f32 %v10509_v28, %v10510_v31 }
 0x433   : > { %v6297_v30 = vmax.f32 %v6283_v9, 0.0  ;;  %v4680_v29 = vmax.f32 %v4678_v15, %v4679_v14  ;;  %v4685_v41 = vmax.f32 %v4683_v12, %v4684_v1  ;;  %v6173_v24 = vrot.slane %v6172_v4, 4  ;;  %v4493_v61 = vpop.f32.mrf.mxu0 }
 0x434   : > { %v6169_v7 = vmax.f32 %v6167_v63, %v6168_v8  ;;  %v4628_v16 = vmax.f32 %v9803_v27, %v4493_v61  ;;  %v5982_v5 = vpop.f32.mrf.mxu1  ;;  %v4690_v0 = vsel %vm947_vm0, %v4627_v34, -inf  ;;  %v6315_v12 = vrot.slane %v9985_v25, 3 }
 0x435   : > { %v6341_v59 = vmul.f32 %v6314_v6, %v6297_v30  ;;  %v4774_v38 = vmax.f32 %v10511_v21, %v4680_v29  ;;  %v4686_v10 = vrot.slane %v4685_v41, 2  ;;  %v6174_v40 = vmax.f32 %v6172_v4, %v6173_v24  ;;  %v4495_v33 = vpop.f32.mrf.mxu0  ;;  %v10512_v21 = vld [vmem:[#allocation11_spill] sm:$0xff] }
 0x436   : > { %v4691_v22 = vsel %vm947_vm0, %v4628_v16, -inf  ;;  %v6117_v37 = vmax.f32 %v9805_v52, %v5982_v5  ;;  %v5984_v15 = vpop.f32.mrf.mxu1  ;;  %v6179_v19 = vsel %vm947_vm0, %v6116_v26, -inf  ;;  %v6316_v31 = vrot.slane %v9985_v25, 4 }
 0x437   : > { %v6370_v27 = vrot.slane %v6341_v59, 6  ;;  %v6263_v39 = vmax.f32 %v4774_v38, %v6169_v7  ;;  %v4687_v63 = vmax.f32 %v4685_v41, %v4686_v10  ;;  %v6175_v6 = vrot.slane %v6174_v40, 2  ;;  %v4498_v51 = vpop.f32.mrf.mxu0  ;;  %v10513_v38 = vld [vmem:[#allocation43_spill] sm:$0xff] }
 0x438   : > { %v4692_v50 = vmax.f32 %v4690_v0, %v4691_v22  ;;  %v6180_v9 = vsel %vm947_vm0, %v6117_v37, -inf  ;;  %v4629_v14 = vmax.f32 %v9811_v3, %v4498_v51  ;;  %v5987_v34 = vpop.f32.mrf.mxu1 }
 0x439   : > { %v6284_v1 = vadd.f32 %v9967_v54, %v6263_v39  ;;  %v4688_v4 = vrot.slane %v4687_v63, 1  ;;  %v6176_v52 = vmax.f32 %v6174_v40, %v6175_v6  ;;  %v6181_v56 = vmax.f32 %v6179_v19, %v6180_v9  ;;  %v4500_v8 = vpop.f32.mrf.mxu0 }
 0x43a   : > { %v4693_v44 = vrot.slane %v4692_v50, 4  ;;  %v6118_v30 = vmax.f32 %v9813_v18, %v5987_v34  ;;  %v5989_v29 = vpop.f32.mrf.mxu1  ;;  %v6372_v41 = vsel %vm6371_vm2, %v6370_v27, %v6369_v35  ;;  %v4699_v5 = vsel %vm947_vm0, %v4629_v14, -inf }
 0x43b   : > { %v6298_v26 = vmax.f32 %v6284_v1, 0.0  ;;  %v4689_v24 = vmax.f32 %v4687_v63, %v4688_v4  ;;  %v6177_v61 = vrot.slane %v6176_v52, 1  ;;  %v6182_v7 = vrot.slane %v6181_v56, 4  ;;  %v4501_v16 = vpop.f32.mrf.mxu0 }
 0x43c   : > { %v4694_v3 = vmax.f32 %v4692_v50, %v4693_v44  ;;  %v4630_v59 = vmax.f32 %v9819_v2, %v4501_v16  ;;  %v5990_v28 = vpop.f32.mrf.mxu1  ;;  %v10514_v18 = vmax.f32 %v10512_v21, %v10513_v38  ;;  %v6188_v37 = vsel %vm947_vm0, %v6118_v30, -inf }
 0x43d   : > { %v6178_v40 = vmax.f32 %v6176_v52, %v6177_v61  ;;  %v6183_v35 = vmax.f32 %v6181_v56, %v6182_v7  ;;  %v6119_v33 = vmax.f32 %v9821_v20, %v5990_v28  ;;  %v4503_v0 = vpop.f32.mrf.mxu0  ;;  %v6342_v39 = vmul.f32 %v6315_v12, %v6298_v26 }
 0x43e   : > { %v4775_v10 = vmax.f32 %v10514_v18, %v4689_v24  ;;  %v4695_v22 = vrot.slane %v4694_v3, 2  ;;  %v4700_v15 = vsel %vm947_vm0, %v4630_v59, -inf  ;;  %v5992_v27 = vpop.f32.mrf.mxu1 }
 0x43f   : > { %v6184_v63 = vrot.slane %v6183_v35, 2  ;;  %v4701_v6 = vmax.f32 %v4699_v5, %v4700_v15  ;;  %v6189_v51 = vsel %vm947_vm0, %v6119_v33, -inf  ;;  %v4506_v19 = vpop.f32.mrf.mxu0  ;;  %v6373_v20 = vrot.slane %v6342_v39, 5 }
 0x440   : > { %v6264_v2 = vmax.f32 %v4775_v10, %v6178_v40  ;;  %v4696_v50 = vmax.f32 %v4694_v3, %v4695_v22  ;;  %v6190_v9 = vmax.f32 %v6188_v37, %v6189_v51  ;;  %v4631_v14 = vmax.f32 %v9827_v42, %v4506_v19  ;;  %v5995_v34 = vpop.f32.mrf.mxu1  ;;  %v10516_v10 = vld [vmem:[#allocation44_spill] sm:$0xff] }
 0x441   : > { %v6185_v4 = vmax.f32 %v6183_v35, %v6184_v63  ;;  %v4702_v52 = vrot.slane %v4701_v6, 4  ;;  %v6120_v56 = vmax.f32 %v9829_v53, %v5995_v34  ;;  %v4508_v8 = vpop.f32.mrf.mxu0  ;;  %v6375_v29 = vsel %vm6374_vm3, %v6373_v20, %v6372_v41  ;;  %v10515_v41 = vld [vmem:[#allocation12_spill] sm:$0xff] }
 0x442   : > { %v6285_v1 = vadd.f32 %v9967_v54, %v6264_v2  ;;  %v4697_v12 = vrot.slane %v4696_v50, 1  ;;  %v6191_v44 = vrot.slane %v6190_v9, 4  ;;  %v5997_v30 = vpop.f32.mrf.mxu1  ;;  %v4708_v3 = vsel %vm947_vm0, %v4631_v14, -inf }
 0x443   : > { %v6186_v24 = vrot.slane %v6185_v4, 1  ;;  %v4703_v61 = vmax.f32 %v4701_v6, %v4702_v52  ;;  %v4509_v7 = vpop.f32.mrf.mxu0  ;;  %v6197_v53 = vsel %vm947_vm0, %v6120_v56, -inf  ;;  %v10517_v40 = vmax.f32 %v10515_v41, %v10516_v10 }
 0x444   : > { %v6299_v26 = vmax.f32 %v6285_v1, 0.0  ;;  %v4698_v42 = vmax.f32 %v4696_v50, %v4697_v12  ;;  %v6192_v16 = vmax.f32 %v6190_v9, %v6191_v44  ;;  %v4632_v5 = vmax.f32 %v9835_v13, %v4509_v7  ;;  %v5998_v59 = vpop.f32.mrf.mxu1  ;;  %v10518_v7 = vld [vmem:[#allocation13_spill] sm:$0xff] }
 0x445   : > { %v4704_v28 = vrot.slane %v4703_v61, 2  ;;  %v6121_v21 = vmax.f32 %v9837_v45, %v5998_v59  ;;  %v4511_v38 = vpop.f32.mrf.mxu0  ;;  %v6187_v33 = vmax.f32 %v6185_v4, %v6186_v24  ;;  %v6317_v14 = vrot.slane %v9985_v25, 5 }
 0x446   : > { %v6343_v18 = vmul.f32 %v6316_v31, %v6299_v26  ;;  %v4776_v35 = vmax.f32 %v10517_v40, %v4698_v42  ;;  %v6193_v0 = vrot.slane %v6192_v16, 2  ;;  %v4709_v22 = vsel %vm947_vm0, %v4632_v5, -inf  ;;  %v6000_v37 = vpop.f32.mrf.mxu1 }
 0x447   : > { %v4705_v15 = vmax.f32 %v4703_v61, %v4704_v28  ;;  %v4710_v27 = vmax.f32 %v4708_v3, %v4709_v22  ;;  %v6198_v13 = vsel %vm947_vm0, %v6121_v21, -inf  ;;  %v4514_v39 = vpop.f32.mrf.mxu0  ;;  %v6318_v37 = vrot.slane %v9985_v25, 6 }
 0x448   : > { %v6376_v2 = vrot.slane %v6343_v18, 4  ;;  %v6265_v63 = vmax.f32 %v4776_v35, %v6187_v33  ;;  %v6194_v6 = vmax.f32 %v6192_v16, %v6193_v0  ;;  %v6199_v45 = vmax.f32 %v6197_v53, %v6198_v13  ;;  %v6003_v51 = vpop.f32.mrf.mxu1 }
 0x449   : > { %v4633_v31 = vmax.f32 %v9843_v60, %v4514_v39  ;;  %v4706_v19 = vrot.slane %v4705_v15, 1  ;;  %v4711_v50 = vrot.slane %v4710_v27, 4  ;;  %v4516_v9 = vpop.f32.mrf.mxu0  ;;  %v6122_v52 = vmax.f32 %v9845_v23, %v6003_v51 }
 0x44a   : > { %v6378_v34 = vsel %vm6377_vm4, %v6376_v2, %v6375_v29  ;;  %v6286_v20 = vadd.f32 %v9967_v54, %v6265_v63  ;;  %v6195_v1 = vrot.slane %v6194_v6, 1  ;;  %v6200_v4 = vrot.slane %v6199_v45, 4  ;;  %v6005_v56 = vpop.f32.mrf.mxu1  ;;  %v10519_v29 = vld [vmem:[#allocation45_spill] sm:$0xff] }
 0x44b   : > { %v4707_v8 = vmax.f32 %v4705_v15, %v4706_v19  ;;  %v4712_v12 = vmax.f32 %v4710_v27, %v4711_v50  ;;  %v4517_v44 = vpop.f32.mrf.mxu0  ;;  %v4717_v30 = vsel %vm947_vm0, %v4633_v31, -inf  ;;  %v10520_v42 = vmax.f32 %v10518_v7, %v10519_v29  ;;  %v10522_v56 = vld [vmem:[#allocation46_spill] sm:$0xff] }
 0x44c   : > { %v6201_v60 = vmax.f32 %v6199_v45, %v6200_v4  ;;  %v4634_v26 = vmax.f32 %v9851_v62, %v4517_v44  ;;  %v6006_v24 = vpop.f32.mrf.mxu1  ;;  %v6300_v61 = vmax.f32 %v6286_v20, 0.0  ;;  %v6196_v3 = vmax.f32 %v6194_v6, %v6195_v1 }
 0x44d   : > { %v4777_v16 = vmax.f32 %v10520_v42, %v4707_v8  ;;  %v4713_v5 = vrot.slane %v4712_v12, 2  ;;  %v6123_v23 = vmax.f32 %v9853_v36, %v6006_v24  ;;  %v4519_v59 = vpop.f32.mrf.mxu0  ;;  %v6206_v53 = vsel %vm947_vm0, %v6122_v52, -inf }
 0x44e   : > { %v6202_v28 = vrot.slane %v6201_v60, 2  ;;  %v4718_v21 = vsel %vm947_vm0, %v4634_v26, -inf  ;;  %v6008_v38 = vpop.f32.mrf.mxu1  ;;  %v6344_v18 = vmul.f32 %v6317_v14, %v6300_v61 }
 0x44f   : > { %v6266_v41 = vmax.f32 %v4777_v16, %v6196_v3  ;;  %v4714_v62 = vmax.f32 %v4712_v12, %v4713_v5  ;;  %v4719_v10 = vmax.f32 %v4717_v30, %v4718_v21  ;;  %v6207_v40 = vsel %vm947_vm0, %v6123_v23, -inf  ;;  %v4522_v35 = vpop.f32.mrf.mxu0 }
 0x450   : > { %v6203_v33 = vmax.f32 %v6201_v60, %v6202_v28  ;;  %v6208_v0 = vmax.f32 %v6206_v53, %v6207_v40  ;;  %v6011_v22 = vpop.f32.mrf.mxu1  ;;  %v6379_v36 = vrot.slane %v6344_v18, 3  ;;  %v4635_v13 = vmax.f32 %v9859_v47, %v4522_v35  ;;  %v10521_v47 = vld [vmem:[#allocation14_spill] sm:$0xff]  ;;  %v10524_v40 = vld [vmem:[#allocation21_spill] sm:$0xff] }
 0x451   : > { %v4715_v15 = vrot.slane %v4714_v62, 1  ;;  %v4720_v27 = vrot.slane %v4719_v10, 4  ;;  %v4524_v39 = vpop.f32.mrf.mxu0  ;;  %v6287_v2 = vadd.f32 %v9967_v54, %v6266_v41  ;;  %v6124_v45 = vmax.f32 %v9861_v57, %v6011_v22 }
 0x452   : > { %v6204_v63 = vrot.slane %v6203_v33, 1  ;;  %v6209_v6 = vrot.slane %v6208_v0, 4  ;;  %v6013_v31 = vpop.f32.mrf.mxu1  ;;  %v6381_v51 = vsel %vm6380_vm5, %v6379_v36, %v6378_v34  ;;  %v10523_v8 = vmax.f32 %v10521_v47, %v10522_v56 }
 0x453   : > { %v4716_v19 = vmax.f32 %v4714_v62, %v4715_v15  ;;  %v4721_v50 = vmax.f32 %v4719_v10, %v4720_v27  ;;  %v4525_v9 = vpop.f32.mrf.mxu0  ;;  %v6301_v14 = vmax.f32 %v6287_v2, 0.0  ;;  %v4726_v26 = vsel %vm947_vm0, %v4635_v13, -inf  ;;  %v10525_v13 = vld [vmem:[#allocation62_spill] sm:$0xff] }
 0x454   : > { %v6205_v20 = vmax.f32 %v6203_v33, %v6204_v63  ;;  %v6210_v1 = vmax.f32 %v6208_v0, %v6209_v6  ;;  %v4636_v4 = vmax.f32 %v9867_v11, %v4525_v9  ;;  %v6014_v52 = vpop.f32.mrf.mxu1  ;;  %v6215_v24 = vsel %vm947_vm0, %v6124_v45, -inf  ;;  %v10527_v63 = vld [vmem:[#allocation47_spill] sm:$0xff] }
 0x455   : > { %v4778_v12 = vmax.f32 %v10523_v8, %v4716_v19  ;;  %v4722_v44 = vrot.slane %v4721_v50, 2  ;;  %v6125_v57 = vmax.f32 %v9869_v48, %v6014_v52  ;;  %v4527_v60 = vpop.f32.mrf.mxu0  ;;  %v6345_v30 = vmul.f32 %v6318_v37, %v6301_v14  ;;  %v10529_v19 = vld [vmem:[#allocation53_spill] sm:$0xff] }
 0x456   : > { %v6211_v34 = vrot.slane %v6210_v1, 2  ;;  %v4727_v61 = vsel %vm947_vm0, %v4636_v4, -inf  ;;  %v6016_v7 = vpop.f32.mrf.mxu1  ;;  %v6319_v48 = vrot.slane %v9985_v25, 7 }
 0x457   : > { %v4723_v11 = vmax.f32 %v4721_v50, %v4722_v44  ;;  %v4728_v29 = vmax.f32 %v4726_v26, %v4727_v61  ;;  %v6216_v42 = vsel %vm947_vm0, %v6125_v57, -inf  ;;  %v4530_v16 = vpop.f32.mrf.mxu0  ;;  %v6267_v3 = vmax.f32 %v4778_v12, %v6205_v20  ;;  %v10530_v61 = vld [vmem:[#allocation63_spill] sm:$0xff] }
 0x458   : > { %v6212_v5 = vmax.f32 %v6210_v1, %v6211_v34  ;;  %v6217_v23 = vmax.f32 %v6215_v24, %v6216_v42  ;;  %v6019_v59 = vpop.f32.mrf.mxu1  ;;  %v6382_v28 = vrot.slane %v6345_v30, 2  ;;  %v4637_v38 = vmax.f32 %v9875_v32, %v4530_v16  ;;  %v10526_v32 = vld [vmem:[#allocation15_spill] sm:$0xff]  ;;  %v10531_v16 = vld [vmem:[#allocation22_spill] sm:$0xff] }
 0x459   : > { %v4724_v53 = vrot.slane %v4723_v11, 1  ;;  %v4729_v21 = vrot.slane %v4728_v29, 4  ;;  %v4532_v18 = vpop.f32.mrf.mxu0  ;;  %v6288_v41 = vadd.f32 %v9967_v54, %v6267_v3  ;;  %v6126_v35 = vmax.f32 %v10524_v40, %v6019_v59 }
 0x45a   : > { %v6213_v62 = vrot.slane %v6212_v5, 1  ;;  %v6218_v10 = vrot.slane %v6217_v23, 4  ;;  %v6021_v33 = vpop.f32.mrf.mxu1  ;;  %v6384_v0 = vsel %vm6383_vm6, %v6382_v28, %v6381_v51  ;;  %v10528_v6 = vmax.f32 %v10526_v32, %v10527_v63 }
 0x45b   : > { %v4725_v22 = vmax.f32 %v4723_v11, %v4724_v53  ;;  %v4730_v37 = vmax.f32 %v4728_v29, %v4729_v21  ;;  %v4533_v36 = vpop.f32.mrf.mxu0  ;;  %v6302_v15 = vmax.f32 %v6288_v41, 0.0  ;;  %v4735_v20 = vsel %vm947_vm0, %v4637_v38, -inf  ;;  %v10532_v21 = vld [vmem:[#allocation64_spill] sm:$0xff] }
 0x45c   : > { %v6214_v25 = vmax.f32 %v6212_v5, %v6213_v62  ;;  %v6219_v27 = vmax.f32 %v6217_v23, %v6218_v10  ;;  %v4638_v39 = vmax.f32 %v10525_v13, %v4533_v36  ;;  %v6022_v2 = vpop.f32.mrf.mxu1  ;;  %v6224_v1 = vsel %vm947_vm0, %v6126_v35, -inf  ;;  %v10533_v41 = vld [vmem:[#allocation16_spill] sm:$0xff] }
 0x45d   : > { %v4779_v45 = vmax.f32 %v10528_v6, %v4725_v22  ;;  %v4731_v31 = vrot.slane %v4730_v37, 2  ;;  %v6127_v50 = vmax.f32 %v10529_v19, %v6022_v2  ;;  %v4535_v9 = vpop.f32.mrf.mxu0  ;;  %v6346_v14 = vmul.f32 %v6319_v48, %v6302_v15  ;;  %v10534_v62 = vld [vmem:[#allocation48_spill] sm:$0xff]  ;;  %v10536_v22 = vld [vmem:[#allocation54_spill] sm:$0xff] }
 0x45e   : > { %v6220_v51 = vrot.slane %v6219_v27, 2  ;;  %v4736_v4 = vsel %vm947_vm0, %v4638_v39, -inf  ;;  %v6024_v52 = vpop.f32.mrf.mxu1  ;;  %v10535_v10 = vmax.f32 %v10533_v41, %v10534_v62  ;;  %v10102_v9 = vld [vmem:[%s9973_s9 + $0x8] sm:$0x3f] }
 0x45f   : > { %v6268_v47 = vmax.f32 %v4779_v45, %v6214_v25  ;;  %v4732_v56 = vmax.f32 %v4730_v37, %v4731_v31  ;;  %v4737_v8 = vmax.f32 %v4735_v20, %v4736_v4  ;;  %v6225_v12 = vsel %vm947_vm0, %v6127_v50, -inf  ;;  %v4538_v44 = vpop.f32.mrf.mxu0 }
 0x460   : > { %v6221_v57 = vmax.f32 %v6219_v27, %v6220_v51  ;;  %v6226_v60 = vmax.f32 %v6224_v1, %v6225_v12  ;;  %v6027_v30 = vpop.f32.mrf.mxu1  ;;  %v6385_v34 = vrot.slane %v6346_v14, 1  ;;  %v4639_v7 = vmax.f32 %v10530_v61, %v4538_v44 }
 0x461   : > { %v4733_v26 = vrot.slane %v4732_v56, 1  ;;  %v4738_v24 = vrot.slane %v4737_v8, 4  ;;  %v4540_v11 = vpop.f32.mrf.mxu0  ;;  %v6128_v3 = vmax.f32 %v10531_v16, %v6027_v30  ;;  %v6289_v45 = vadd.f32 %v9967_v54, %v6268_v47 }
 0x462   : > { %v6222_v29 = vrot.slane %v6221_v57, 1  ;;  %v6227_v42 = vrot.slane %v6226_v60, 4  ;;  %v6029_v5 = vpop.f32.mrf.mxu1  ;;  %v10089_v23 = vsel %vm6386_vm7, %v6385_v34, %v6384_v0  ;;  %v4744_v0 = vsel %vm947_vm0, %v4639_v7, -inf }
 0x463   : > { %v4734_v59 = vmax.f32 %v4732_v56, %v4733_v26  ;;  %v4739_v48 = vmax.f32 %v4737_v8, %v4738_v24  ;;  %v4541_v28 = vpop.f32.mrf.mxu0  ;;  %v6233_v25 = vsel %vm947_vm0, %v6128_v3, -inf  ;;  %v6320_v4 = vrot.slane %v10102_v9, 1  ;;  %v10540_v5 = vld [vmem:[#allocation65_spill] sm:$0xff] }
 0x464   : > { %v6228_v53 = vmax.f32 %v6226_v60, %v6227_v42  ;;  %v4640_v38 = vmax.f32 %v10532_v21, %v4541_v28  ;;  %v6030_v18 = vpop.f32.mrf.mxu1  ;;  %v6223_v35 = vmax.f32 %v6221_v57, %v6222_v29  ;;  %v6321_v34 = vrot.slane %v10102_v9, 2  ;;  %v10537_v29 = vld [vmem:[#allocation17_spill] sm:$0xff] }
 0x465   : > { %v4780_v40 = vmax.f32 %v10535_v10, %v4734_v59  ;;  %v4740_v33 = vrot.slane %v4739_v48, 2  ;;  %v6129_v37 = vmax.f32 %v10536_v22, %v6030_v18  ;;  %v4543_v36 = vpop.f32.mrf.mxu0  ;;  %v6303_v26 = vmax.f32 %v6289_v45, 0.0  ;;  %v10538_v42 = vld [vmem:[#allocation49_spill] sm:$0xff] }
 0x466   : > { %v6229_v15 = vrot.slane %v6228_v53, 2  ;;  %v4745_v27 = vsel %vm947_vm0, %v4640_v38, -inf  ;;  %v6032_v13 = vpop.f32.mrf.mxu1  ;;  %v10539_v16 = vmax.f32 %v10537_v29, %v10538_v42 }
 0x467   : > { %v6269_v39 = vmax.f32 %v4780_v40, %v6223_v35  ;;  %v4741_v2 = vmax.f32 %v4739_v48, %v4740_v33  ;;  %v4746_v32 = vmax.f32 %v4744_v0, %v4745_v27  ;;  %v6234_v63 = vsel %vm947_vm0, %v6129_v37, -inf  ;;  %v4546_v6 = vpop.f32.mrf.mxu0 }
 0x468   : > { %v6230_v31 = vmax.f32 %v6228_v53, %v6229_v15  ;;  %v6235_v19 = vmax.f32 %v6233_v25, %v6234_v63  ;;  %v6035_v50 = vpop.f32.mrf.mxu1  ;;  %v4641_v8 = vmax.f32 %v9907_v55, %v4546_v6  ;;  %v6347_v37 = vmul.f32 %v10102_v9, %v6303_v26 }
 0x469   : > { %v6290_v14 = vadd.f32 %v9967_v54, %v6269_v39  ;;  %v4742_v51 = vrot.slane %v4741_v2, 1  ;;  %v4747_v20 = vrot.slane %v4746_v32, 4  ;;  %v4548_v1 = vpop.f32.mrf.mxu0  ;;  %v6130_v12 = vmax.f32 %v9909_v49, %v6035_v50 }
 0x46a   : > { %v6231_v52 = vrot.slane %v6230_v31, 1  ;;  %v6236_v56 = vrot.slane %v6235_v19, 4  ;;  %v6037_v44 = vpop.f32.mrf.mxu1  ;;  %v4753_v53 = vsel %vm947_vm0, %v4641_v8, -inf }
 0x46b   : > { %v6304_v47 = vmax.f32 %v6290_v14, 0.0  ;;  %v4743_v57 = vmax.f32 %v4741_v2, %v4742_v51  ;;  %v4748_v60 = vmax.f32 %v4746_v32, %v4747_v20  ;;  %v4549_v30 = vpop.f32.mrf.mxu0  ;;  %v6242_v21 = vsel %vm947_vm0, %v6130_v12, -inf  ;;  %v10544_v12 = vld [vmem:[#allocation23_spill] sm:$0xff] }
 0x46c   : > { %v6232_v24 = vmax.f32 %v6230_v31, %v6231_v52  ;;  %v6237_v61 = vmax.f32 %v6235_v19, %v6236_v56  ;;  %v4642_v7 = vmax.f32 %v9915_v43, %v4549_v30  ;;  %v6038_v11 = vpop.f32.mrf.mxu1  ;;  %v10542_v52 = vld [vmem:[#allocation50_spill] sm:$0xff] }
 0x46d   : > { %v4781_v3 = vmax.f32 %v10539_v16, %v4743_v57  ;;  %v4749_v55 = vrot.slane %v4748_v60, 2  ;;  %v6131_v49 = vmax.f32 %v10540_v5, %v6038_v11  ;;  %v4551_v59 = vpop.f32.mrf.mxu0  ;;  %v6348_v48 = vmul.f32 %v6320_v4, %v6304_v47  ;;  %v10541_v4 = vld [vmem:[#allocation18_spill] sm:$0xff] }
 0x46e   : > { %v6238_v28 = vrot.slane %v6237_v61, 2  ;;  %v4754_v38 = vsel %vm947_vm0, %v4642_v7, -inf  ;;  %v6040_v18 = vpop.f32.mrf.mxu1  ;;  %v6322_v5 = vrot.slane %v10102_v9, 3 }
 0x46f   : > { %v6270_v41 = vmax.f32 %v4781_v3, %v6232_v24  ;;  %v4750_v43 = vmax.f32 %v4748_v60, %v4749_v55  ;;  %v4755_v62 = vmax.f32 %v4753_v53, %v4754_v38  ;;  %v6243_v10 = vsel %vm947_vm0, %v6131_v49, -inf  ;;  %v4554_v40 = vpop.f32.mrf.mxu0  ;;  %v10545_v18 = vld [vmem:[#allocation19_spill] sm:$0xff] }
 0x470   : > { %v6239_v35 = vmax.f32 %v6237_v61, %v6238_v28  ;;  %v6244_v33 = vmax.f32 %v6242_v21, %v6243_v10  ;;  %v6043_v22 = vpop.f32.mrf.mxu1  ;;  %v6388_v36 = vrot.slane %v6348_v48, 7  ;;  %v4643_v27 = vmax.f32 %v9923_v17, %v4554_v40 }
 0x471   : > { %v6291_v15 = vadd.f32 %v9967_v54, %v6270_v41  ;;  %v4751_v0 = vrot.slane %v4750_v43, 1  ;;  %v4756_v25 = vrot.slane %v4755_v62, 4  ;;  %v4556_v13 = vpop.f32.mrf.mxu0  ;;  %v6132_v32 = vmax.f32 %v9925_v58, %v6043_v22  ;;  %v10546_v41 = vld [vmem:[#allocation51_spill] sm:$0xff] }
 0x472   : > { %v6240_v39 = vrot.slane %v6239_v35, 1  ;;  %v6245_v2 = vrot.slane %v6244_v33, 4  ;;  %v6045_v63 = vpop.f32.mrf.mxu1  ;;  %v6389_v6 = vsel %vm6368_vm1, %v6388_v36, %v6347_v37  ;;  %v10543_v17 = vmax.f32 %v10541_v4, %v10542_v52 }
 0x473   : > { %v6305_v45 = vmax.f32 %v6291_v15, 0.0  ;;  %v4752_v31 = vmax.f32 %v4750_v43, %v4751_v0  ;;  %v4757_v19 = vmax.f32 %v4755_v62, %v4756_v25  ;;  %v4557_v50 = vpop.f32.mrf.mxu0  ;;  %v4762_v60 = vsel %vm947_vm0, %v4643_v27, -inf  ;;  %v10548_v63 = vld [vmem:[#allocation20_spill] sm:$0xff] }
 0x474   : > { %v6241_v14 = vmax.f32 %v6239_v35, %v6240_v39  ;;  %v6246_v51 = vmax.f32 %v6244_v33, %v6245_v2  ;;  %v4644_v20 = vmax.f32 %v9931_v46, %v4557_v50  ;;  %v6046_v1 = vpop.f32.mrf.mxu1  ;;  %v6251_v30 = vsel %vm947_vm0, %v6132_v32, -inf }
 0x475   : > { %v4782_v56 = vmax.f32 %v10543_v17, %v4752_v31  ;;  %v4758_v8 = vrot.slane %v4757_v19, 2  ;;  %v6133_v44 = vmax.f32 %v10544_v12, %v6046_v1  ;;  %v4559_v58 = vpop.f32.mrf.mxu0  ;;  %v6349_v47 = vmul.f32 %v6321_v34, %v6305_v45 }
 0x476   : > { %v6247_v57 = vrot.slane %v6246_v51, 2  ;;  %v4763_v26 = vsel %vm947_vm0, %v4644_v20, -inf  ;;  %v6048_v24 = vpop.f32.mrf.mxu1  ;;  %v10547_v43 = vmax.f32 %v10545_v18, %v10546_v41  ;;  %v6323_v27 = vrot.slane %v10102_v9, 4 }
 0x477   : > { %v6271_v61 = vmax.f32 %v4782_v56, %v6241_v14  ;;  %v4759_v46 = vmax.f32 %v4757_v19, %v4758_v8  ;;  %v4764_v7 = vmax.f32 %v4762_v60, %v4763_v26  ;;  %v6252_v11 = vsel %vm947_vm0, %v6133_v44, -inf }
 0x478   : > { %v6248_v29 = vmax.f32 %v6246_v51, %v6247_v57  ;;  %v6253_v42 = vmax.f32 %v6251_v30, %v6252_v11  ;;  %v6390_v16 = vrot.slane %v6349_v47, 6  ;;  %v6324_v1 = vrot.slane %v10102_v9, 5 }
 0x479   : > { %v6292_v3 = vadd.f32 %v9967_v54, %v6271_v61  ;;  %v4760_v55 = vrot.slane %v4759_v46, 1  ;;  %v4765_v34 = vrot.slane %v4764_v7, 4  ;;  %v6400_v12 = vsel %vm947_vm0, %v10089_v23, 0.0 }
 0x47a   : > { %v6249_v49 = vrot.slane %v6248_v29, 1  ;;  %v6254_v59 = vrot.slane %v6253_v42, 4  ;;  %v6391_v48 = vsel %vm6371_vm2, %v6390_v16, %v6389_v6  ;;  %v10549_v6 = vld [vmem:[#allocation52_spill] sm:$0xff] }
 0x47b   : > { %v4761_v28 = vmax.f32 %v4759_v46, %v4760_v55  ;;  %v4766_v53 = vmax.f32 %v4764_v7, %v4765_v34  ;;  %v6306_v21 = vmax.f32 %v6292_v3, 0.0  ;;  %v10550_v45 = vmax.f32 %v10548_v63, %v10549_v6 }
 0x47c   : > { %v6255_v38 = vmax.f32 %v6253_v42, %v6254_v59  ;;  %v6250_v10 = vmax.f32 %v6248_v29, %v6249_v49 }
 0x47d   : > { %v4783_v62 = vmax.f32 %v10547_v43, %v4761_v28  ;;  %v4767_v40 = vrot.slane %v4766_v53, 2  ;;  %v6350_v35 = vmul.f32 %v6322_v5, %v6306_v21 }
 0x47e   : > { %v6256_v33 = vrot.slane %v6255_v38, 2 }
 0x47f   : > { %v6272_v22 = vmax.f32 %v4783_v62, %v6250_v10  ;;  %v4768_v37 = vmax.f32 %v4766_v53, %v4767_v40  ;;  %v6392_v36 = vrot.slane %v6350_v35, 5 }
 0x480   : > { %v6257_v15 = vmax.f32 %v6255_v38, %v6256_v33 }
 0x481   : > { %v4769_v0 = vrot.slane %v4768_v37, 1  ;;  %v6293_v25 = vadd.f32 %v9967_v54, %v6272_v22  ;;  %v6393_v13 = vsel %vm6374_vm3, %v6392_v36, %v6391_v48 }
 0x482   : > { %v6258_v39 = vrot.slane %v6257_v15, 1 }
 0x483   : > { %v4770_v2 = vmax.f32 %v4768_v37, %v4769_v0  ;;  %v6307_v32 = vmax.f32 %v6293_v25, 0.0 }
 0x484   : > { %v6259_v19 = vmax.f32 %v6257_v15, %v6258_v39 }
 0x485   : > { %v4784_v31 = vmax.f32 %v10550_v45, %v4770_v2  ;;  %v6351_v50 = vmul.f32 %v6323_v27, %v6307_v32 }
 0x487   : > { %v6273_v14 = vmax.f32 %v4784_v31, %v6259_v19  ;;  %v6394_v51 = vrot.slane %v6351_v50, 4 }
 0x489   : > { %v6294_v20 = vadd.f32 %v9967_v54, %v6273_v14  ;;  %v6395_v4 = vsel %vm6377_vm4, %v6394_v51, %v6393_v13 }
 0x48b   : > { %v6308_v52 = vmax.f32 %v6294_v20, 0.0 }
 0x48d   : > { %v6352_v17 = vmul.f32 %v6324_v1, %v6308_v52 }
 0x48f   : > { %v6396_v56 = vrot.slane %v6352_v17, 3 }
 0x491   : > { %v6397_v8 = vsel %vm6380_vm5, %v6396_v56, %v6395_v4 }
 0x492   : > { %v6402_v44 = vsel %vm6401_vm8, %v6397_v8, 0.0 }
 0x493   : > { %v6403_v58 = vadd.f32 %v6402_v44, %v6400_v12 }
 0x495   : > { %6404 = vadd.xlane.f32.xlu0 %v6403_v58 }
 0x51e   : > { %v6405_v47 = vpop.xlane.xlu0 %6404 }
 0x51f   : > { %v6406_v54 = vrot.slane %v6405_v47, 4 }
 0x521   : > { %v6407_v57 = vadd.f32 %v6406_v54, %v6405_v47 }
 0x523   : > { %v6408_v9 = vrot.slane %v6407_v57, 2 }
 0x525   : > { %v6409_v60 = vadd.f32 %v6408_v9, %v6407_v57 }
 0x527   : > { %v6410_v30 = vrot.slane %v6409_v60, 1 }
 0x529   : > { %v6411_v26 = vadd.f32 %v6410_v30, %v6409_v60 }
 0x52b   : > { %7209 = vpush %v6411_v26 }
 0x55c   : > { %s7210_s22 = spop %7209 }
 0x55d   : > { %v6413_v23 = vstv %s7210_s22 }
 0x55e   : > { %6416 = vst.msk [vmem:[%s249_s14] sm:$0x1] %vm6415_vm9, %v6413_v23 }
 0x55f PF: > { %s14_s19 = sadd.s32 1, %s7972_s19   ;;  %s10551_s15 = smov %s7964_s17 }
 0x560   : > { %p11_p7 = scmp.ge.s32.totalorder %s14_s19, 30   ;;  %s10552_s16 = smov %s7968_s18 }
 0x561   : > { %s10553_s17 = smov %s10556_s20  ;;  %s10554_s18 = smov %s10560_s21 }
 0x562   :  { %13 = sbr.rel (!%p11_p7) target bundleno = 3 (0x3), region = 69 }

</bundles_post_ra>
